<compile_context>
chip_gen: v6e
topology: v6e:2x2x1
jax: 0.10.0
libtpu: 0.0.40
codegen_flags: <defaults>
</compile_context>

<pallas_src>
import math

import jax
import jax.numpy as jnp
from jax.experimental import pallas as pl
from jax.experimental.pallas import tpu as pltpu


# ---------------------------------------------------------------------------
# Pure-JAX reference (standard [N, feat] layout, f32) — mirrors the PyTorch
# module semantics; the kernel is validated against this.
# ---------------------------------------------------------------------------

def _normalize(v, eps=1e-12):
    n = jnp.sqrt(jnp.sum(v * v, axis=-1, keepdims=True))
    return v / jnp.maximum(n, eps)


def _cross(a, b):
    a0, a1, a2 = a[:, 0:1], a[:, 1:2], a[:, 2:3]
    b0, b1, b2 = b[:, 0:1], b[:, 1:2], b[:, 2:3]
    return jnp.concatenate(
        [a1 * b2 - a2 * b1, a2 * b0 - a0 * b2, a0 * b1 - a1 * b0], axis=-1)


def _forward_step(pts, rd_prev, prev_density, t_val, delta, trans, acc, p,
                  is_first):
    """One BendyNeRF.march step + volumetric accumulation (pure jnp, f32)."""
    def dense(x, w, b):
        return jnp.dot(x, w, preferred_element_type=jnp.float32) + b

    # Synthetic canonical NeRF: col 0 = density, cols 1: = intermediate feats.
    # TODO(synk): CommonNeRF.normals (autograd normals) not provided; density /
    # intermediate come from a small MLP and normals from a linear head.
    def canon(x):
        h = jnp.maximum(dense(x, p['wc1'], p['bc1']), 0.0)
        return dense(h, p['wc2'], p['bc2'])

    rd = _normalize(rd_prev)                       # F.normalize(r_d, dim=-1)
    canon_out = canon(pts)                         # [N, 1 + intermediate]
    n = _normalize(dense(pts, p['wn'], p['bn']))   # F.normalize(n, dim=-1)

    # bend = SkipConnMLP(in=intermediate+1, out=1, layers=5, hidden=128)
    # TODO(synk): SkipConnMLP skip connections not provided; plain 5-layer MLP.
    h = canon_out
    for i in range(4):
        h = jnp.maximum(dense(h, p[f'wb{i}'], p[f'bb{i}']), 0.0)
    curr_density = jax.nn.sigmoid(dense(h, p['wb4'], p['bb4'])) * 5.0 + 1.0

    # Refraction branch (prev_density is not None, i.e. every step but the 1st)
    cos_old = jnp.sum(rd * n, axis=-1, keepdims=True)
    ortho = _normalize(_cross(rd, n))
    rel_ior = curr_density / prev_density
    sin_old = jnp.sqrt(jnp.maximum(1.0 - cos_old * cos_old, 1e-5))
    sin_new = sin_old * rel_ior
    sin_theta = jnp.mod(sin_new + 1.0, 2.0) - 1.0      # torch.fmod (args > 0)
    cos_theta = jnp.sqrt(jnp.maximum(1.0 - sin_theta * sin_theta, 1e-5))
    # TODO(synk): utils.rotate_vector not provided; assumed Rodrigues' formula.
    rot = (rd * cos_theta
           + _cross(ortho, rd) * sin_theta
           + ortho * jnp.sum(ortho * rd, axis=-1, keepdims=True)
           * (1.0 - cos_theta))
    new_rd = jnp.where(is_first, rd, _normalize(rot))
    new_pt = pts + new_rd * t_val                  # march uses absolute t

    # TODO(synk): canon.from_pts / refl not provided; synthetic render head.
    render = canon(new_pt)
    sigma = jnp.maximum(render[:, 0:1], 0.0)
    rgb = jax.nn.sigmoid(dense(render[:, 1:], p['wrgb'], p['brgb']))
    alpha = 1.0 - jnp.exp(-sigma * delta)
    acc = acc + trans * alpha * rgb
    trans = trans * (1.0 - alpha)
    return new_pt, new_rd, curr_density, trans, acc


def bendy_nerf_reference(rays, ts, params, *, t_near, t_far):
    steps = ts.shape[0]
    delta = float(t_far - t_near) / float(steps - 1)
    r_o, r_d = rays[:, :3], rays[:, 3:]
    pt = r_o + r_d * t_near
    rd = r_d
    dens = jnp.ones((rays.shape[0], 1), jnp.float32)
    trans = jnp.ones((rays.shape[0], 1), jnp.float32)
    acc = jnp.zeros((rays.shape[0], 3), jnp.float32)
    for i in range(steps):
        pt, rd, dens, trans, acc = _forward_step(
            pt, rd, dens, ts[i], delta, trans, acc, params, i == 0)
    return acc


# ---------------------------------------------------------------------------
# Pallas kernel (transposed [feat, TN] layout, bf16 MXU matmuls)
# ---------------------------------------------------------------------------

def _make_kernel(t_near, delta, steps):
    bf16 = jnp.bfloat16

    def kernel(ts_ref, rays_ref,
               w_in, b_in, w_c2, b_c2, w_b0, w_bh, b_bh, w_b4, b_b4,
               w_rgb, b_rgb, out_ref):

        def mm(w, x, b):
            # [out, in] @ [in, TN] on the MXU; bf16 inputs, f32 accumulate,
            # f32 bias.
            return jnp.dot(w, x.astype(bf16),
                           preferred_element_type=jnp.float32) + b

        def normalize3(v):                          # v: [3, TN]
            n2 = v[0:1] * v[0:1] + v[1:2] * v[1:2] + v[2:3] * v[2:3]
            return v / jnp.maximum(jnp.sqrt(n2), 1e-12)

        def dot3(a, b):                             # -> [1, TN]
            return a[0:1] * b[0:1] + a[1:2] * b[1:2] + a[2:3] * b[2:3]

        def cross3(a, b):                           # -> [3, TN]
            return jnp.concatenate(
                [a[1:2] * b[2:3] - a[2:3] * b[1:2],
                 a[2:3] * b[0:1] - a[0:1] * b[2:3],
                 a[0:1] * b[1:2] - a[1:2] * b[0:1]], axis=0)

        b_bend = b_bh[...]                          # [128, 4], packed biases

        def canon_eval(pt):
            # Fused first layer: [35,3]x[3,TN]; rows 0:32 = canon hidden
            # pre-activation, rows 32:35 = normal-head pre-normalization.
            z = mm(w_in[...], pt, b_in[...])
            h = jnp.maximum(z[0:32], 0.0)
            npre = z[32:35]
            canon_out = mm(w_c2[...], h, b_c2[...])          # [33, TN]
            return canon_out, npre

        def bend_density(canon_out):
            h = jnp.maximum(mm(w_b0[...], canon_out, b_bend[:, 0:1]), 0.0)
            h = jnp.maximum(mm(w_bh[0], h, b_bend[:, 1:2]), 0.0)
            h = jnp.maximum(mm(w_bh[1], h, b_bend[:, 2:3]), 0.0)
            h = jnp.maximum(mm(w_bh[2], h, b_bend[:, 3:4]), 0.0)
            pre = mm(w_b4[...], h, b_b4[...])                # [1, TN]
            return jax.nn.sigmoid(pre) * 5.0 + 1.0

        def composite(canon_out, trans, acc):
            # TODO(synk): canon.from_pts / refl not provided; synthetic head.
            sigma = jnp.maximum(canon_out[0:1], 0.0)
            rgb = jax.nn.sigmoid(mm(w_rgb[...], canon_out[1:33], b_rgb[...]))
            alpha = 1.0 - jnp.exp(-sigma * delta)
            acc = acc + trans * alpha * rgb
            trans = trans * (1.0 - alpha)
            return trans, acc

        rays = rays_ref[...]                        # [6, TN]
        r_o = rays[0:3]
        r_d = rays[3:6]

        # ---- step 0 (peeled; refraction branch skipped: new_rd = rd) ----
        pt0 = r_o + r_d * t_near                    # curr_pt = r_o + r_d*t_near
        rd0 = normalize3(r_d)
        canon0, _ = canon_eval(pt0)
        dens0 = bend_density(canon0)                # becomes prev_density
        pt1 = pt0 + rd0 * ts_ref[0]
        canon1, npre1 = canon_eval(pt1)             # reused at step 1
        trans = jnp.ones_like(r_d[0:1])
        acc = jnp.zeros_like(r_d)
        trans, acc = composite(canon1, trans, acc)

        # ---- steps 1 .. steps-1 ----
        def body(t, carry):
            pts, rd_prev, prev_dens, canon_out, npre, trans, acc = carry
            rd = normalize3(rd_prev)
            n = normalize3(npre)
            curr_dens = bend_density(canon_out)
            cos_old = dot3(rd, n)
            ortho = normalize3(cross3(rd, n))
            rel_ior = curr_dens / prev_dens
            sin_old = jnp.sqrt(jnp.maximum(1.0 - cos_old * cos_old, 1e-5))
            sin_new = sin_old * rel_ior
            sin_theta = jnp.mod(sin_new + 1.0, 2.0) - 1.0   # torch.fmod, >0
            cos_theta = jnp.sqrt(jnp.maximum(1.0 - sin_theta * sin_theta, 1e-5))
            # TODO(synk): utils.rotate_vector not provided; Rodrigues' formula.
            rot = (rd * cos_theta
                   + cross3(ortho, rd) * sin_theta
                   + ortho * dot3(ortho, rd) * (1.0 - cos_theta))
            new_rd = normalize3(rot)
            new_pt = pts + new_rd * ts_ref[t]
            canon_new, npre_new = canon_eval(new_pt)        # reused next step
            trans, acc = composite(canon_new, trans, acc)
            return (new_pt, new_rd, curr_dens, canon_new, npre_new, trans, acc)

        carry = jax.lax.fori_loop(
            1, steps, body, (pt1, rd0, dens0, canon1, npre1, trans, acc))
        acc = carry[6]
        out_ref[...] = acc          # sky == 'black' -> contributes 0

    return kernel


def _prep_weights(params):
    """Transpose, fuse, pack and bf16-cast the weights for the kernel."""
    f32, bf16 = jnp.float32, jnp.bfloat16
    w_in = jnp.concatenate([params['wc1'], params['wn']], axis=1).T.astype(bf16)
    b_in = jnp.concatenate([params['bc1'], params['bn']], axis=1).T.astype(f32)
    w_c2 = params['wc2'].T.astype(bf16)
    b_c2 = params['bc2'].T.astype(f32)
    w_b0 = params['wb0'].T.astype(bf16)
    w_bh = jnp.stack([params['wb1'].T, params['wb2'].T,
                      params['wb3'].T]).astype(bf16)          # [3,128,128]
    b_bh = jnp.concatenate([params['bb0'], params['bb1'],
                            params['bb2'], params['bb3']],
                           axis=0).T.astype(f32)              # [128,4]
    w_b4 = params['wb4'].T.astype(bf16)
    b_b4 = params['bb4'].T.astype(f32)
    w_rgb = params['wrgb'].T.astype(bf16)
    b_rgb = params['brgb'].T.astype(f32)
    return [w_in, b_in, w_c2, b_c2, w_b0, w_bh, b_bh, w_b4, b_b4, w_rgb, b_rgb]


def _pick_tile(n, desired):
    tn = min(desired, n)
    # Keep >= 2 ray tiles when possible so both v7x TensorCores get work.
    if n >= 256 and n // tn < 2:
        tn = n // 2
    tn = max(128, (tn // 128) * 128)
    while n % tn != 0:
        tn -= 128
    return tn


def _const_map(ndim):
    zeros = (0,) * ndim
    return lambda i: zeros


def bendy_nerf_forward(rays, ts, params, *, t_near, t_far, tile_rays=512):
    N = rays.shape[0]
    assert N % 128 == 0, "pad ray count to a multiple of 128"
    steps = int(ts.shape[0])
    delta = float(t_far - t_near) / float(steps - 1)
    TN = _pick_tile(N, tile_rays)

    weights = _prep_weights(params)
    rays_t = rays.T                                   # [6, N], lane-dense rays

    in_specs = [pl.BlockSpec(memory_space=pltpu.MemorySpace.SMEM),      # ts
                pl.BlockSpec((6, TN), lambda i: (0, i))]                # rays^T
    in_specs += [pl.BlockSpec(w.shape, _const_map(w.ndim)) for w in weights]

    grid_spec = pltpu.PrefetchScalarGridSpec(
        num_scalar_prefetch=0,
        grid=(N // TN,),
        in_specs=in_specs,
        out_specs=pl.BlockSpec((3, TN), lambda i: (0, i)),
    )

    out_t = pl.pallas_call(
        _make_kernel(t_near, delta, steps),
        out_shape=jax.ShapeDtypeStruct((3, N), jnp.float32),
        grid_spec=grid_spec,
        compiler_params=pltpu.CompilerParams(
            dimension_semantics=("parallel",)),
    )(ts, rays_t, *weights)
    return out_t.T                                    # back to [N, 3]


# ---------------------------------------------------------------------------
# Parameter init + self-test
# ---------------------------------------------------------------------------

def init_params(key, intermediate_size=32, canon_hidden=32, bend_hidden=128):
    IS = intermediate_size
    shapes = {
        'wc1': (3, canon_hidden), 'bc1': (1, canon_hidden),
        'wc2': (canon_hidden, 1 + IS), 'bc2': (1, 1 + IS),
        'wn': (3, 3), 'bn': (1, 3),
        'wb0': (1 + IS, bend_hidden), 'bb0': (1, bend_hidden),
        'wb1': (bend_hidden, bend_hidden), 'bb1': (1, bend_hidden),
        'wb2': (bend_hidden, bend_hidden), 'bb2': (1, bend_hidden),
        'wb3': (bend_hidden, bend_hidden), 'bb3': (1, bend_hidden),
        'wb4': (bend_hidden, 1), 'bb4': (1, 1),
        'wrgb': (IS, 3), 'brgb': (1, 3),
    }
    params = {}
    keys = jax.random.split(key, len(shapes))
    for k, (name, shape) in zip(keys, shapes.items()):
        if name.startswith('w'):      # xavier-uniform (module uses init='xavier')
            lim = math.sqrt(6.0 / (shape[0] + shape[1]))
            params[name] = jax.random.uniform(k, shape, jnp.float32, -lim, lim)
        else:
            params[name] = jnp.zeros(shape, jnp.float32)
    return params


if __name__ == "__main__":
    key = jax.random.PRNGKey(0)
    k_rays, k_params = jax.random.split(key)

    N, STEPS = 256, 8               # small shapes: 256 rays, 8 march steps
    T_NEAR, T_FAR = 0.1, 1.0
    rays = jax.random.normal(k_rays, (N, 6), dtype=jnp.float32)
    params = init_params(k_params)
    # compute_ts with lindisp=False, perturb=0 (eval mode): plain linspace.
    ts = jnp.linspace(T_NEAR, T_FAR, STEPS, dtype=jnp.float32)

    out = bendy_nerf_forward(rays, ts, params, t_near=T_NEAR, t_far=T_FAR)
    out = jax.block_until_ready(out)
    assert out.shape == (N, 3)
    assert bool(jnp.isfinite(out).all())

    ref = bendy_nerf_reference(rays, ts, params, t_near=T_NEAR, t_far=T_FAR)
    err = float(jnp.mean(jnp.abs(out - ref)))
    assert err < 5e-2, f"mismatch vs reference: {err}"
    print("KERNEL_OK")
</pallas_src>

<mosaic_0001>
module attributes {stable_mosaic.version = 11 : i64} {
  func.func @kernel(%arg0: i32, %arg1: memref<8xf32, #tpu.memory_space<smem>>, %arg2: memref<6x128xf32, #tpu.memory_space<vmem>>, %arg3: memref<35x3xbf16, #tpu.memory_space<vmem>>, %arg4: memref<35x1xf32, #tpu.memory_space<vmem>>, %arg5: memref<33x32xbf16, #tpu.memory_space<vmem>>, %arg6: memref<33x1xf32, #tpu.memory_space<vmem>>, %arg7: memref<128x33xbf16, #tpu.memory_space<vmem>>, %arg8: memref<3x128x128xbf16, #tpu.memory_space<vmem>>, %arg9: memref<128x4xf32, #tpu.memory_space<vmem>>, %arg10: memref<1x128xbf16, #tpu.memory_space<vmem>>, %arg11: memref<1x1xf32, #tpu.memory_space<vmem>>, %arg12: memref<3x32xbf16, #tpu.memory_space<vmem>>, %arg13: memref<3x1xf32, #tpu.memory_space<vmem>>, %arg14: memref<3x128xf32, #tpu.memory_space<vmem>>) attributes {dimension_semantics = [#tpu.dimension_semantics<parallel>], iteration_bounds = array<i64: 2>, scalar_prefetch = 0 : i64, scratch_operands = 0 : i64, tpu.core_type = #tpu.core_type<tc>, window_params = [{transform_indices = @transform_0, window_bounds = array<i64: 8>}, {transform_indices = @transform_1, window_bounds = array<i64: 6, 128>}, {pipeline_mode = #tpu.pipeline_mode<synchronous>, transform_indices = @transform_2, window_bounds = array<i64: 35, 3>}, {pipeline_mode = #tpu.pipeline_mode<synchronous>, transform_indices = @transform_3, window_bounds = array<i64: 35, 1>}, {pipeline_mode = #tpu.pipeline_mode<synchronous>, transform_indices = @transform_4, window_bounds = array<i64: 33, 32>}, {pipeline_mode = #tpu.pipeline_mode<synchronous>, transform_indices = @transform_5, window_bounds = array<i64: 33, 1>}, {pipeline_mode = #tpu.pipeline_mode<synchronous>, transform_indices = @transform_6, window_bounds = array<i64: 128, 33>}, {pipeline_mode = #tpu.pipeline_mode<synchronous>, transform_indices = @transform_7, window_bounds = array<i64: 3, 128, 128>}, {pipeline_mode = #tpu.pipeline_mode<synchronous>, transform_indices = @transform_8, window_bounds = array<i64: 128, 4>}, {pipeline_mode = #tpu.pipeline_mode<synchronous>, transform_indices = @transform_9, window_bounds = array<i64: 1, 128>}, {pipeline_mode = #tpu.pipeline_mode<synchronous>, transform_indices = @transform_10, window_bounds = array<i64: 1, 1>}, {pipeline_mode = #tpu.pipeline_mode<synchronous>, transform_indices = @transform_11, window_bounds = array<i64: 3, 32>}, {pipeline_mode = #tpu.pipeline_mode<synchronous>, transform_indices = @transform_12, window_bounds = array<i64: 3, 1>}, {transform_indices = @transform_13, window_bounds = array<i64: 3, 128>}]} {
    %c0 = arith.constant 0 : index
    %c0_0 = arith.constant 0 : index
    %0 = vector.load %arg9[%c0, %c0_0] : memref<128x4xf32, #tpu.memory_space<vmem>>, vector<128x4xf32>
    %c0_1 = arith.constant 0 : index
    %c0_2 = arith.constant 0 : index
    %1 = vector.load %arg2[%c0_1, %c0_2] : memref<6x128xf32, #tpu.memory_space<vmem>>, vector<6x128xf32>
    %2 = vector.extract_strided_slice %1 {offsets = [0, 0], sizes = [3, 128], strides = [1, 1]} : vector<6x128xf32> to vector<3x128xf32>
    %3 = vector.extract_strided_slice %1 {offsets = [3, 0], sizes = [3, 128], strides = [1, 1]} : vector<6x128xf32> to vector<3x128xf32>
    %cst = arith.constant 1.000000e-01 : f32
    %4 = vector.broadcast %cst : f32 to vector<3x128xf32>
    %5 = arith.mulf %3, %4 : vector<3x128xf32>
    %6 = arith.addf %2, %5 : vector<3x128xf32>
    %7 = vector.extract_strided_slice %3 {offsets = [0, 0], sizes = [1, 128], strides = [1, 1]} : vector<3x128xf32> to vector<1x128xf32>
    %8 = vector.extract_strided_slice %3 {offsets = [0, 0], sizes = [1, 128], strides = [1, 1]} : vector<3x128xf32> to vector<1x128xf32>
    %9 = arith.mulf %7, %8 : vector<1x128xf32>
    %10 = vector.extract_strided_slice %3 {offsets = [1, 0], sizes = [1, 128], strides = [1, 1]} : vector<3x128xf32> to vector<1x128xf32>
    %11 = vector.extract_strided_slice %3 {offsets = [1, 0], sizes = [1, 128], strides = [1, 1]} : vector<3x128xf32> to vector<1x128xf32>
    %12 = arith.mulf %10, %11 : vector<1x128xf32>
    %13 = arith.addf %9, %12 : vector<1x128xf32>
    %14 = vector.extract_strided_slice %3 {offsets = [2, 0], sizes = [1, 128], strides = [1, 1]} : vector<3x128xf32> to vector<1x128xf32>
    %15 = vector.extract_strided_slice %3 {offsets = [2, 0], sizes = [1, 128], strides = [1, 1]} : vector<3x128xf32> to vector<1x128xf32>
    %16 = arith.mulf %14, %15 : vector<1x128xf32>
    %17 = arith.addf %13, %16 : vector<1x128xf32>
    %18 = math.sqrt %17 : vector<1x128xf32>
    %cst_3 = arith.constant 9.99999996E-13 : f32
    %19 = vector.broadcast %cst_3 : f32 to vector<1x128xf32>
    %20 = arith.maximumf %18, %19 : vector<1x128xf32>
    %21 = vector.broadcast %20 : vector<1x128xf32> to vector<3x128xf32>
    %22 = arith.divf %3, %21 : vector<3x128xf32>
    %c0_4 = arith.constant 0 : index
    %c0_5 = arith.constant 0 : index
    %23 = vector.load %arg3[%c0_4, %c0_5] : memref<35x3xbf16, #tpu.memory_space<vmem>>, vector<35x3xbf16>
    %c0_6 = arith.constant 0 : index
    %c0_7 = arith.constant 0 : index
    %24 = vector.load %arg4[%c0_6, %c0_7] : memref<35x1xf32, #tpu.memory_space<vmem>>, vector<35x1xf32>
    %25 = arith.truncf %6 : vector<3x128xf32> to vector<3x128xbf16>
    %cst_8 = arith.constant dense<0.000000e+00> : vector<35x128xf32>
    %26 = tpu.matmul %23, %25, %cst_8 {dimension_numbers = #tpu.dot_dimension_numbers<[1], [0], [0], [1], [0, 0, 1, 1], [], []>} : vector<35x3xbf16>, vector<3x128xbf16>, vector<35x128xf32> -> vector<35x128xf32>
    %27 = vector.broadcast %24 : vector<35x1xf32> to vector<35x128xf32>
    %28 = arith.addf %26, %27 : vector<35x128xf32>
    %29 = vector.extract_strided_slice %28 {offsets = [0, 0], sizes = [32, 128], strides = [1, 1]} : vector<35x128xf32> to vector<32x128xf32>
    %cst_9 = arith.constant 0.000000e+00 : f32
    %30 = vector.broadcast %cst_9 : f32 to vector<32x128xf32>
    %31 = arith.maximumf %29, %30 : vector<32x128xf32>
    %c0_10 = arith.constant 0 : index
    %c0_11 = arith.constant 0 : index
    %32 = vector.load %arg5[%c0_10, %c0_11] : memref<33x32xbf16, #tpu.memory_space<vmem>>, vector<33x32xbf16>
    %c0_12 = arith.constant 0 : index
    %c0_13 = arith.constant 0 : index
    %33 = vector.load %arg6[%c0_12, %c0_13] : memref<33x1xf32, #tpu.memory_space<vmem>>, vector<33x1xf32>
    %34 = arith.truncf %31 : vector<32x128xf32> to vector<32x128xbf16>
    %cst_14 = arith.constant dense<0.000000e+00> : vector<33x128xf32>
    %35 = tpu.matmul %32, %34, %cst_14 {dimension_numbers = #tpu.dot_dimension_numbers<[1], [0], [0], [1], [0, 0, 1, 1], [], []>} : vector<33x32xbf16>, vector<32x128xbf16>, vector<33x128xf32> -> vector<33x128xf32>
    %36 = vector.broadcast %33 : vector<33x1xf32> to vector<33x128xf32>
    %37 = arith.addf %35, %36 : vector<33x128xf32>
    %c0_15 = arith.constant 0 : index
    %c0_16 = arith.constant 0 : index
    %38 = vector.load %arg7[%c0_15, %c0_16] : memref<128x33xbf16, #tpu.memory_space<vmem>>, vector<128x33xbf16>
    %39 = vector.extract_strided_slice %0 {offsets = [0, 0], sizes = [128, 1], strides = [1, 1]} : vector<128x4xf32> to vector<128x1xf32>
    %40 = arith.truncf %37 : vector<33x128xf32> to vector<33x128xbf16>
    %cst_17 = arith.constant dense<0.000000e+00> : vector<128x128xf32>
    %41 = tpu.matmul %38, %40, %cst_17 {dimension_numbers = #tpu.dot_dimension_numbers<[1], [0], [0], [1], [0, 0, 1, 1], [], []>} : vector<128x33xbf16>, vector<33x128xbf16>, vector<128x128xf32> -> vector<128x128xf32>
    %42 = vector.broadcast %39 : vector<128x1xf32> to vector<128x128xf32>
    %43 = arith.addf %41, %42 : vector<128x128xf32>
    %cst_18 = arith.constant 0.000000e+00 : f32
    %44 = vector.broadcast %cst_18 : f32 to vector<128x128xf32>
    %45 = arith.maximumf %43, %44 : vector<128x128xf32>
    %c0_19 = arith.constant 0 : index
    %c0_20 = arith.constant 0 : index
    %c0_21 = arith.constant 0 : index
    %46 = vector.load %arg8[%c0_19, %c0_20, %c0_21] : memref<3x128x128xbf16, #tpu.memory_space<vmem>>, vector<1x128x128xbf16>
    %47 = vector.shape_cast %46 : vector<1x128x128xbf16> to vector<128x128xbf16>
    %48 = vector.extract_strided_slice %0 {offsets = [0, 1], sizes = [128, 1], strides = [1, 1]} : vector<128x4xf32> to vector<128x1xf32>
    %49 = arith.truncf %45 : vector<128x128xf32> to vector<128x128xbf16>
    %cst_22 = arith.constant dense<0.000000e+00> : vector<128x128xf32>
    %50 = tpu.matmul %47, %49, %cst_22 {dimension_numbers = #tpu.dot_dimension_numbers<[1], [0], [0], [1], [0, 0, 1, 1], [], []>} : vector<128x128xbf16>, vector<128x128xbf16>, vector<128x128xf32> -> vector<128x128xf32>
    %51 = vector.broadcast %48 : vector<128x1xf32> to vector<128x128xf32>
    %52 = arith.addf %50, %51 : vector<128x128xf32>
    %cst_23 = arith.constant 0.000000e+00 : f32
    %53 = vector.broadcast %cst_23 : f32 to vector<128x128xf32>
    %54 = arith.maximumf %52, %53 : vector<128x128xf32>
    %c1 = arith.constant 1 : index
    %c0_24 = arith.constant 0 : index
    %c0_25 = arith.constant 0 : index
    %55 = vector.load %arg8[%c1, %c0_24, %c0_25] : memref<3x128x128xbf16, #tpu.memory_space<vmem>>, vector<1x128x128xbf16>
    %56 = vector.shape_cast %55 : vector<1x128x128xbf16> to vector<128x128xbf16>
    %57 = vector.extract_strided_slice %0 {offsets = [0, 2], sizes = [128, 1], strides = [1, 1]} : vector<128x4xf32> to vector<128x1xf32>
    %58 = arith.truncf %54 : vector<128x128xf32> to vector<128x128xbf16>
    %cst_26 = arith.constant dense<0.000000e+00> : vector<128x128xf32>
    %59 = tpu.matmul %56, %58, %cst_26 {dimension_numbers = #tpu.dot_dimension_numbers<[1], [0], [0], [1], [0, 0, 1, 1], [], []>} : vector<128x128xbf16>, vector<128x128xbf16>, vector<128x128xf32> -> vector<128x128xf32>
    %60 = vector.broadcast %57 : vector<128x1xf32> to vector<128x128xf32>
    %61 = arith.addf %59, %60 : vector<128x128xf32>
    %cst_27 = arith.constant 0.000000e+00 : f32
    %62 = vector.broadcast %cst_27 : f32 to vector<128x128xf32>
    %63 = arith.maximumf %61, %62 : vector<128x128xf32>
    %c2 = arith.constant 2 : index
    %c0_28 = arith.constant 0 : index
    %c0_29 = arith.constant 0 : index
    %64 = vector.load %arg8[%c2, %c0_28, %c0_29] : memref<3x128x128xbf16, #tpu.memory_space<vmem>>, vector<1x128x128xbf16>
    %65 = vector.shape_cast %64 : vector<1x128x128xbf16> to vector<128x128xbf16>
    %66 = vector.extract_strided_slice %0 {offsets = [0, 3], sizes = [128, 1], strides = [1, 1]} : vector<128x4xf32> to vector<128x1xf32>
    %67 = arith.truncf %63 : vector<128x128xf32> to vector<128x128xbf16>
    %cst_30 = arith.constant dense<0.000000e+00> : vector<128x128xf32>
    %68 = tpu.matmul %65, %67, %cst_30 {dimension_numbers = #tpu.dot_dimension_numbers<[1], [0], [0], [1], [0, 0, 1, 1], [], []>} : vector<128x128xbf16>, vector<128x128xbf16>, vector<128x128xf32> -> vector<128x128xf32>
    %69 = vector.broadcast %66 : vector<128x1xf32> to vector<128x128xf32>
    %70 = arith.addf %68, %69 : vector<128x128xf32>
    %cst_31 = arith.constant 0.000000e+00 : f32
    %71 = vector.broadcast %cst_31 : f32 to vector<128x128xf32>
    %72 = arith.maximumf %70, %71 : vector<128x128xf32>
    %c0_32 = arith.constant 0 : index
    %c0_33 = arith.constant 0 : index
    %73 = vector.load %arg10[%c0_32, %c0_33] : memref<1x128xbf16, #tpu.memory_space<vmem>>, vector<1x128xbf16>
    %c0_34 = arith.constant 0 : index
    %c0_35 = arith.constant 0 : index
    %74 = vector.load %arg11[%c0_34, %c0_35] : memref<1x1xf32, #tpu.memory_space<vmem>>, vector<1x1xf32>
    %75 = arith.truncf %72 : vector<128x128xf32> to vector<128x128xbf16>
    %cst_36 = arith.constant dense<0.000000e+00> : vector<1x128xf32>
    %76 = tpu.matmul %73, %75, %cst_36 {dimension_numbers = #tpu.dot_dimension_numbers<[1], [0], [0], [1], [0, 0, 1, 1], [], []>} : vector<1x128xbf16>, vector<128x128xbf16>, vector<1x128xf32> -> vector<1x128xf32>
    %77 = vector.broadcast %74 : vector<1x1xf32> to vector<1x128xf32>
    %78 = arith.addf %76, %77 : vector<1x128xf32>
    %79 = arith.negf %78 : vector<1x128xf32>
    %80 = math.exp %79 : vector<1x128xf32>
    %cst_37 = arith.constant 1.000000e+00 : f32
    %81 = vector.broadcast %cst_37 : f32 to vector<1x128xf32>
    %82 = arith.addf %81, %80 : vector<1x128xf32>
    %83 = arith.divf %81, %82 : vector<1x128xf32>
    %cst_38 = arith.constant 5.000000e+00 : f32
    %84 = vector.broadcast %cst_38 : f32 to vector<1x128xf32>
    %85 = arith.mulf %83, %84 : vector<1x128xf32>
    %cst_39 = arith.constant 1.000000e+00 : f32
    %86 = vector.broadcast %cst_39 : f32 to vector<1x128xf32>
    %87 = arith.addf %85, %86 : vector<1x128xf32>
    %c0_40 = arith.constant 0 : index
    %88 = memref.load %arg1[%c0_40] : memref<8xf32, #tpu.memory_space<smem>>
    %89 = vector.broadcast %88 : f32 to vector<3x128xf32>
    %90 = arith.mulf %22, %89 : vector<3x128xf32>
    %91 = arith.addf %6, %90 : vector<3x128xf32>
    %c0_41 = arith.constant 0 : index
    %c0_42 = arith.constant 0 : index
    %92 = vector.load %arg3[%c0_41, %c0_42] : memref<35x3xbf16, #tpu.memory_space<vmem>>, vector<35x3xbf16>
    %c0_43 = arith.constant 0 : index
    %c0_44 = arith.constant 0 : index
    %93 = vector.load %arg4[%c0_43, %c0_44] : memref<35x1xf32, #tpu.memory_space<vmem>>, vector<35x1xf32>
    %94 = arith.truncf %91 : vector<3x128xf32> to vector<3x128xbf16>
    %cst_45 = arith.constant dense<0.000000e+00> : vector<35x128xf32>
    %95 = tpu.matmul %92, %94, %cst_45 {dimension_numbers = #tpu.dot_dimension_numbers<[1], [0], [0], [1], [0, 0, 1, 1], [], []>} : vector<35x3xbf16>, vector<3x128xbf16>, vector<35x128xf32> -> vector<35x128xf32>
    %96 = vector.broadcast %93 : vector<35x1xf32> to vector<35x128xf32>
    %97 = arith.addf %95, %96 : vector<35x128xf32>
    %98 = vector.extract_strided_slice %97 {offsets = [0, 0], sizes = [32, 128], strides = [1, 1]} : vector<35x128xf32> to vector<32x128xf32>
    %cst_46 = arith.constant 0.000000e+00 : f32
    %99 = vector.broadcast %cst_46 : f32 to vector<32x128xf32>
    %100 = arith.maximumf %98, %99 : vector<32x128xf32>
    %101 = vector.extract_strided_slice %97 {offsets = [32, 0], sizes = [3, 128], strides = [1, 1]} : vector<35x128xf32> to vector<3x128xf32>
    %c0_47 = arith.constant 0 : index
    %c0_48 = arith.constant 0 : index
    %102 = vector.load %arg5[%c0_47, %c0_48] : memref<33x32xbf16, #tpu.memory_space<vmem>>, vector<33x32xbf16>
    %c0_49 = arith.constant 0 : index
    %c0_50 = arith.constant 0 : index
    %103 = vector.load %arg6[%c0_49, %c0_50] : memref<33x1xf32, #tpu.memory_space<vmem>>, vector<33x1xf32>
    %104 = arith.truncf %100 : vector<32x128xf32> to vector<32x128xbf16>
    %cst_51 = arith.constant dense<0.000000e+00> : vector<33x128xf32>
    %105 = tpu.matmul %102, %104, %cst_51 {dimension_numbers = #tpu.dot_dimension_numbers<[1], [0], [0], [1], [0, 0, 1, 1], [], []>} : vector<33x32xbf16>, vector<32x128xbf16>, vector<33x128xf32> -> vector<33x128xf32>
    %106 = vector.broadcast %103 : vector<33x1xf32> to vector<33x128xf32>
    %107 = arith.addf %105, %106 : vector<33x128xf32>
    %cst_52 = arith.constant 1.000000e+00 : f32
    %108 = vector.broadcast %cst_52 : f32 to vector<1x128xf32>
    %cst_53 = arith.constant 0.000000e+00 : f32
    %109 = vector.broadcast %cst_53 : f32 to vector<3x128xf32>
    %110 = vector.extract_strided_slice %107 {offsets = [0, 0], sizes = [1, 128], strides = [1, 1]} : vector<33x128xf32> to vector<1x128xf32>
    %cst_54 = arith.constant 0.000000e+00 : f32
    %111 = vector.broadcast %cst_54 : f32 to vector<1x128xf32>
    %112 = arith.maximumf %110, %111 : vector<1x128xf32>
    %c0_55 = arith.constant 0 : index
    %c0_56 = arith.constant 0 : index
    %113 = vector.load %arg12[%c0_55, %c0_56] : memref<3x32xbf16, #tpu.memory_space<vmem>>, vector<3x32xbf16>
    %114 = vector.extract_strided_slice %107 {offsets = [1, 0], sizes = [32, 128], strides = [1, 1]} : vector<33x128xf32> to vector<32x128xf32>
    %c0_57 = arith.constant 0 : index
    %c0_58 = arith.constant 0 : index
    %115 = vector.load %arg13[%c0_57, %c0_58] : memref<3x1xf32, #tpu.memory_space<vmem>>, vector<3x1xf32>
    %116 = arith.truncf %114 : vector<32x128xf32> to vector<32x128xbf16>
    %cst_59 = arith.constant dense<0.000000e+00> : vector<3x128xf32>
    %117 = tpu.matmul %113, %116, %cst_59 {dimension_numbers = #tpu.dot_dimension_numbers<[1], [0], [0], [1], [0, 0, 1, 1], [], []>} : vector<3x32xbf16>, vector<32x128xbf16>, vector<3x128xf32> -> vector<3x128xf32>
    %118 = vector.broadcast %115 : vector<3x1xf32> to vector<3x128xf32>
    %119 = arith.addf %117, %118 : vector<3x128xf32>
    %120 = arith.negf %119 : vector<3x128xf32>
    %121 = math.exp %120 : vector<3x128xf32>
    %cst_60 = arith.constant 1.000000e+00 : f32
    %122 = vector.broadcast %cst_60 : f32 to vector<3x128xf32>
    %123 = arith.addf %122, %121 : vector<3x128xf32>
    %124 = arith.divf %122, %123 : vector<3x128xf32>
    %cst_61 = arith.constant 0.000000e+00 : f32
    %125 = vector.broadcast %cst_61 : f32 to vector<1x128xf32>
    %126 = arith.subf %125, %112 : vector<1x128xf32>
    %cst_62 = arith.constant 0.128571436 : f32
    %127 = vector.broadcast %cst_62 : f32 to vector<1x128xf32>
    %128 = arith.mulf %126, %127 : vector<1x128xf32>
    %129 = math.exp %128 : vector<1x128xf32>
    %cst_63 = arith.constant 1.000000e+00 : f32
    %130 = vector.broadcast %cst_63 : f32 to vector<1x128xf32>
    %131 = arith.subf %130, %129 : vector<1x128xf32>
    %132 = arith.mulf %108, %131 : vector<1x128xf32>
    %133 = vector.broadcast %132 : vector<1x128xf32> to vector<3x128xf32>
    %134 = arith.mulf %133, %124 : vector<3x128xf32>
    %135 = arith.addf %109, %134 : vector<3x128xf32>
    %cst_64 = arith.constant 1.000000e+00 : f32
    %136 = vector.broadcast %cst_64 : f32 to vector<1x128xf32>
    %137 = arith.subf %136, %131 : vector<1x128xf32>
    %138 = arith.mulf %108, %137 : vector<1x128xf32>
    %c1_i32 = arith.constant 1 : i32
    %c7_i32 = arith.constant 7 : i32
    %139 = arith.addi %c1_i32, %c7_i32 : i32
    %c1_i32_65 = arith.constant 1 : i32
    %140:7 = scf.for %arg15 = %c1_i32 to %139 step %c1_i32_65 iter_args(%arg16 = %91, %arg17 = %22, %arg18 = %87, %arg19 = %107, %arg20 = %101, %arg21 = %138, %arg22 = %135) -> (vector<3x128xf32>, vector<3x128xf32>, vector<1x128xf32>, vector<33x128xf32>, vector<3x128xf32>, vector<1x128xf32>, vector<3x128xf32>)  : i32 {
      %142 = vector.extract_strided_slice %arg17 {offsets = [0, 0], sizes = [1, 128], strides = [1, 1]} : vector<3x128xf32> to vector<1x128xf32>
      %143 = vector.extract_strided_slice %arg17 {offsets = [0, 0], sizes = [1, 128], strides = [1, 1]} : vector<3x128xf32> to vector<1x128xf32>
      %144 = arith.mulf %142, %143 : vector<1x128xf32>
      %145 = vector.extract_strided_slice %arg17 {offsets = [1, 0], sizes = [1, 128], strides = [1, 1]} : vector<3x128xf32> to vector<1x128xf32>
      %146 = vector.extract_strided_slice %arg17 {offsets = [1, 0], sizes = [1, 128], strides = [1, 1]} : vector<3x128xf32> to vector<1x128xf32>
      %147 = arith.mulf %145, %146 : vector<1x128xf32>
      %148 = arith.addf %144, %147 : vector<1x128xf32>
      %149 = vector.extract_strided_slice %arg17 {offsets = [2, 0], sizes = [1, 128], strides = [1, 1]} : vector<3x128xf32> to vector<1x128xf32>
      %150 = vector.extract_strided_slice %arg17 {offsets = [2, 0], sizes = [1, 128], strides = [1, 1]} : vector<3x128xf32> to vector<1x128xf32>
      %151 = arith.mulf %149, %150 : vector<1x128xf32>
      %152 = arith.addf %148, %151 : vector<1x128xf32>
      %153 = math.sqrt %152 : vector<1x128xf32>
      %cst_69 = arith.constant 9.99999996E-13 : f32
      %154 = vector.broadcast %cst_69 : f32 to vector<1x128xf32>
      %155 = arith.maximumf %153, %154 : vector<1x128xf32>
      %156 = vector.broadcast %155 : vector<1x128xf32> to vector<3x128xf32>
      %157 = arith.divf %arg17, %156 : vector<3x128xf32>
      %158 = vector.extract_strided_slice %arg20 {offsets = [0, 0], sizes = [1, 128], strides = [1, 1]} : vector<3x128xf32> to vector<1x128xf32>
      %159 = vector.extract_strided_slice %arg20 {offsets = [0, 0], sizes = [1, 128], strides = [1, 1]} : vector<3x128xf32> to vector<1x128xf32>
      %160 = arith.mulf %158, %159 : vector<1x128xf32>
      %161 = vector.extract_strided_slice %arg20 {offsets = [1, 0], sizes = [1, 128], strides = [1, 1]} : vector<3x128xf32> to vector<1x128xf32>
      %162 = vector.extract_strided_slice %arg20 {offsets = [1, 0], sizes = [1, 128], strides = [1, 1]} : vector<3x128xf32> to vector<1x128xf32>
      %163 = arith.mulf %161, %162 : vector<1x128xf32>
      %164 = arith.addf %160, %163 : vector<1x128xf32>
      %165 = vector.extract_strided_slice %arg20 {offsets = [2, 0], sizes = [1, 128], strides = [1, 1]} : vector<3x128xf32> to vector<1x128xf32>
      %166 = vector.extract_strided_slice %arg20 {offsets = [2, 0], sizes = [1, 128], strides = [1, 1]} : vector<3x128xf32> to vector<1x128xf32>
      %167 = arith.mulf %165, %166 : vector<1x128xf32>
      %168 = arith.addf %164, %167 : vector<1x128xf32>
      %169 = math.sqrt %168 : vector<1x128xf32>
      %cst_70 = arith.constant 9.99999996E-13 : f32
      %170 = vector.broadcast %cst_70 : f32 to vector<1x128xf32>
      %171 = arith.maximumf %169, %170 : vector<1x128xf32>
      %172 = vector.broadcast %171 : vector<1x128xf32> to vector<3x128xf32>
      %173 = arith.divf %arg20, %172 : vector<3x128xf32>
      %c0_71 = arith.constant 0 : index
      %c0_72 = arith.constant 0 : index
      %174 = vector.load %arg7[%c0_71, %c0_72] : memref<128x33xbf16, #tpu.memory_space<vmem>>, vector<128x33xbf16>
      %175 = vector.extract_strided_slice %0 {offsets = [0, 0], sizes = [128, 1], strides = [1, 1]} : vector<128x4xf32> to vector<128x1xf32>
      %176 = arith.truncf %arg19 : vector<33x128xf32> to vector<33x128xbf16>
      %cst_73 = arith.constant dense<0.000000e+00> : vector<128x128xf32>
      %177 = tpu.matmul %174, %176, %cst_73 {dimension_numbers = #tpu.dot_dimension_numbers<[1], [0], [0], [1], [0, 0, 1, 1], [], []>} : vector<128x33xbf16>, vector<33x128xbf16>, vector<128x128xf32> -> vector<128x128xf32>
      %178 = vector.broadcast %175 : vector<128x1xf32> to vector<128x128xf32>
      %179 = arith.addf %177, %178 : vector<128x128xf32>
      %cst_74 = arith.constant 0.000000e+00 : f32
      %180 = vector.broadcast %cst_74 : f32 to vector<128x128xf32>
      %181 = arith.maximumf %179, %180 : vector<128x128xf32>
      %c0_75 = arith.constant 0 : index
      %c0_76 = arith.constant 0 : index
      %c0_77 = arith.constant 0 : index
      %182 = vector.load %arg8[%c0_75, %c0_76, %c0_77] : memref<3x128x128xbf16, #tpu.memory_space<vmem>>, vector<1x128x128xbf16>
      %183 = vector.shape_cast %182 : vector<1x128x128xbf16> to vector<128x128xbf16>
      %184 = vector.extract_strided_slice %0 {offsets = [0, 1], sizes = [128, 1], strides = [1, 1]} : vector<128x4xf32> to vector<128x1xf32>
      %185 = arith.truncf %181 : vector<128x128xf32> to vector<128x128xbf16>
      %cst_78 = arith.constant dense<0.000000e+00> : vector<128x128xf32>
      %186 = tpu.matmul %183, %185, %cst_78 {dimension_numbers = #tpu.dot_dimension_numbers<[1], [0], [0], [1], [0, 0, 1, 1], [], []>} : vector<128x128xbf16>, vector<128x128xbf16>, vector<128x128xf32> -> vector<128x128xf32>
      %187 = vector.broadcast %184 : vector<128x1xf32> to vector<128x128xf32>
      %188 = arith.addf %186, %187 : vector<128x128xf32>
      %cst_79 = arith.constant 0.000000e+00 : f32
      %189 = vector.broadcast %cst_79 : f32 to vector<128x128xf32>
      %190 = arith.maximumf %188, %189 : vector<128x128xf32>
      %c1_80 = arith.constant 1 : index
      %c0_81 = arith.constant 0 : index
      %c0_82 = arith.constant 0 : index
      %191 = vector.load %arg8[%c1_80, %c0_81, %c0_82] : memref<3x128x128xbf16, #tpu.memory_space<vmem>>, vector<1x128x128xbf16>
      %192 = vector.shape_cast %191 : vector<1x128x128xbf16> to vector<128x128xbf16>
      %193 = vector.extract_strided_slice %0 {offsets = [0, 2], sizes = [128, 1], strides = [1, 1]} : vector<128x4xf32> to vector<128x1xf32>
      %194 = arith.truncf %190 : vector<128x128xf32> to vector<128x128xbf16>
      %cst_83 = arith.constant dense<0.000000e+00> : vector<128x128xf32>
      %195 = tpu.matmul %192, %194, %cst_83 {dimension_numbers = #tpu.dot_dimension_numbers<[1], [0], [0], [1], [0, 0, 1, 1], [], []>} : vector<128x128xbf16>, vector<128x128xbf16>, vector<128x128xf32> -> vector<128x128xf32>
      %196 = vector.broadcast %193 : vector<128x1xf32> to vector<128x128xf32>
      %197 = arith.addf %195, %196 : vector<128x128xf32>
      %cst_84 = arith.constant 0.000000e+00 : f32
      %198 = vector.broadcast %cst_84 : f32 to vector<128x128xf32>
      %199 = arith.maximumf %197, %198 : vector<128x128xf32>
      %c2_85 = arith.constant 2 : index
      %c0_86 = arith.constant 0 : index
      %c0_87 = arith.constant 0 : index
      %200 = vector.load %arg8[%c2_85, %c0_86, %c0_87] : memref<3x128x128xbf16, #tpu.memory_space<vmem>>, vector<1x128x128xbf16>
      %201 = vector.shape_cast %200 : vector<1x128x128xbf16> to vector<128x128xbf16>
      %202 = vector.extract_strided_slice %0 {offsets = [0, 3], sizes = [128, 1], strides = [1, 1]} : vector<128x4xf32> to vector<128x1xf32>
      %203 = arith.truncf %199 : vector<128x128xf32> to vector<128x128xbf16>
      %cst_88 = arith.constant dense<0.000000e+00> : vector<128x128xf32>
      %204 = tpu.matmul %201, %203, %cst_88 {dimension_numbers = #tpu.dot_dimension_numbers<[1], [0], [0], [1], [0, 0, 1, 1], [], []>} : vector<128x128xbf16>, vector<128x128xbf16>, vector<128x128xf32> -> vector<128x128xf32>
      %205 = vector.broadcast %202 : vector<128x1xf32> to vector<128x128xf32>
      %206 = arith.addf %204, %205 : vector<128x128xf32>
      %cst_89 = arith.constant 0.000000e+00 : f32
      %207 = vector.broadcast %cst_89 : f32 to vector<128x128xf32>
      %208 = arith.maximumf %206, %207 : vector<128x128xf32>
      %c0_90 = arith.constant 0 : index
      %c0_91 = arith.constant 0 : index
      %209 = vector.load %arg10[%c0_90, %c0_91] : memref<1x128xbf16, #tpu.memory_space<vmem>>, vector<1x128xbf16>
      %c0_92 = arith.constant 0 : index
      %c0_93 = arith.constant 0 : index
      %210 = vector.load %arg11[%c0_92, %c0_93] : memref<1x1xf32, #tpu.memory_space<vmem>>, vector<1x1xf32>
      %211 = arith.truncf %208 : vector<128x128xf32> to vector<128x128xbf16>
      %cst_94 = arith.constant dense<0.000000e+00> : vector<1x128xf32>
      %212 = tpu.matmul %209, %211, %cst_94 {dimension_numbers = #tpu.dot_dimension_numbers<[1], [0], [0], [1], [0, 0, 1, 1], [], []>} : vector<1x128xbf16>, vector<128x128xbf16>, vector<1x128xf32> -> vector<1x128xf32>
      %213 = vector.broadcast %210 : vector<1x1xf32> to vector<1x128xf32>
      %214 = arith.addf %212, %213 : vector<1x128xf32>
      %215 = arith.negf %214 : vector<1x128xf32>
      %216 = math.exp %215 : vector<1x128xf32>
      %cst_95 = arith.constant 1.000000e+00 : f32
      %217 = vector.broadcast %cst_95 : f32 to vector<1x128xf32>
      %218 = arith.addf %217, %216 : vector<1x128xf32>
      %219 = arith.divf %217, %218 : vector<1x128xf32>
      %cst_96 = arith.constant 5.000000e+00 : f32
      %220 = vector.broadcast %cst_96 : f32 to vector<1x128xf32>
      %221 = arith.mulf %219, %220 : vector<1x128xf32>
      %cst_97 = arith.constant 1.000000e+00 : f32
      %222 = vector.broadcast %cst_97 : f32 to vector<1x128xf32>
      %223 = arith.addf %221, %222 : vector<1x128xf32>
      %224 = vector.extract_strided_slice %157 {offsets = [0, 0], sizes = [1, 128], strides = [1, 1]} : vector<3x128xf32> to vector<1x128xf32>
      %225 = vector.extract_strided_slice %173 {offsets = [0, 0], sizes = [1, 128], strides = [1, 1]} : vector<3x128xf32> to vector<1x128xf32>
      %226 = arith.mulf %224, %225 : vector<1x128xf32>
      %227 = vector.extract_strided_slice %157 {offsets = [1, 0], sizes = [1, 128], strides = [1, 1]} : vector<3x128xf32> to vector<1x128xf32>
      %228 = vector.extract_strided_slice %173 {offsets = [1, 0], sizes = [1, 128], strides = [1, 1]} : vector<3x128xf32> to vector<1x128xf32>
      %229 = arith.mulf %227, %228 : vector<1x128xf32>
      %230 = arith.addf %226, %229 : vector<1x128xf32>
      %231 = vector.extract_strided_slice %157 {offsets = [2, 0], sizes = [1, 128], strides = [1, 1]} : vector<3x128xf32> to vector<1x128xf32>
      %232 = vector.extract_strided_slice %173 {offsets = [2, 0], sizes = [1, 128], strides = [1, 1]} : vector<3x128xf32> to vector<1x128xf32>
      %233 = arith.mulf %231, %232 : vector<1x128xf32>
      %234 = arith.addf %230, %233 : vector<1x128xf32>
      %235 = vector.extract_strided_slice %157 {offsets = [1, 0], sizes = [1, 128], strides = [1, 1]} : vector<3x128xf32> to vector<1x128xf32>
      %236 = vector.extract_strided_slice %173 {offsets = [2, 0], sizes = [1, 128], strides = [1, 1]} : vector<3x128xf32> to vector<1x128xf32>
      %237 = arith.mulf %235, %236 : vector<1x128xf32>
      %238 = vector.extract_strided_slice %157 {offsets = [2, 0], sizes = [1, 128], strides = [1, 1]} : vector<3x128xf32> to vector<1x128xf32>
      %239 = vector.extract_strided_slice %173 {offsets = [1, 0], sizes = [1, 128], strides = [1, 1]} : vector<3x128xf32> to vector<1x128xf32>
      %240 = arith.mulf %238, %239 : vector<1x128xf32>
      %241 = arith.subf %237, %240 : vector<1x128xf32>
      %242 = vector.extract_strided_slice %157 {offsets = [2, 0], sizes = [1, 128], strides = [1, 1]} : vector<3x128xf32> to vector<1x128xf32>
      %243 = vector.extract_strided_slice %173 {offsets = [0, 0], sizes = [1, 128], strides = [1, 1]} : vector<3x128xf32> to vector<1x128xf32>
      %244 = arith.mulf %242, %243 : vector<1x128xf32>
      %245 = vector.extract_strided_slice %157 {offsets = [0, 0], sizes = [1, 128], strides = [1, 1]} : vector<3x128xf32> to vector<1x128xf32>
      %246 = vector.extract_strided_slice %173 {offsets = [2, 0], sizes = [1, 128], strides = [1, 1]} : vector<3x128xf32> to vector<1x128xf32>
      %247 = arith.mulf %245, %246 : vector<1x128xf32>
      %248 = arith.subf %244, %247 : vector<1x128xf32>
      %249 = vector.extract_strided_slice %157 {offsets = [0, 0], sizes = [1, 128], strides = [1, 1]} : vector<3x128xf32> to vector<1x128xf32>
      %250 = vector.extract_strided_slice %173 {offsets = [1, 0], sizes = [1, 128], strides = [1, 1]} : vector<3x128xf32> to vector<1x128xf32>
      %251 = arith.mulf %249, %250 : vector<1x128xf32>
      %252 = vector.extract_strided_slice %157 {offsets = [1, 0], sizes = [1, 128], strides = [1, 1]} : vector<3x128xf32> to vector<1x128xf32>
      %253 = vector.extract_strided_slice %173 {offsets = [0, 0], sizes = [1, 128], strides = [1, 1]} : vector<3x128xf32> to vector<1x128xf32>
      %254 = arith.mulf %252, %253 : vector<1x128xf32>
      %255 = arith.subf %251, %254 : vector<1x128xf32>
      %256 = tpu.concatenate %241, %248, %255 in 0 : vector<1x128xf32>, vector<1x128xf32>, vector<1x128xf32> -> vector<3x128xf32>
      %257 = vector.extract_strided_slice %256 {offsets = [0, 0], sizes = [1, 128], strides = [1, 1]} : vector<3x128xf32> to vector<1x128xf32>
      %258 = vector.extract_strided_slice %256 {offsets = [0, 0], sizes = [1, 128], strides = [1, 1]} : vector<3x128xf32> to vector<1x128xf32>
      %259 = arith.mulf %257, %258 : vector<1x128xf32>
      %260 = vector.extract_strided_slice %256 {offsets = [1, 0], sizes = [1, 128], strides = [1, 1]} : vector<3x128xf32> to vector<1x128xf32>
      %261 = vector.extract_strided_slice %256 {offsets = [1, 0], sizes = [1, 128], strides = [1, 1]} : vector<3x128xf32> to vector<1x128xf32>
      %262 = arith.mulf %260, %261 : vector<1x128xf32>
      %263 = arith.addf %259, %262 : vector<1x128xf32>
      %264 = vector.extract_strided_slice %256 {offsets = [2, 0], sizes = [1, 128], strides = [1, 1]} : vector<3x128xf32> to vector<1x128xf32>
      %265 = vector.extract_strided_slice %256 {offsets = [2, 0], sizes = [1, 128], strides = [1, 1]} : vector<3x128xf32> to vector<1x128xf32>
      %266 = arith.mulf %264, %265 : vector<1x128xf32>
      %267 = arith.addf %263, %266 : vector<1x128xf32>
      %268 = math.sqrt %267 : vector<1x128xf32>
      %cst_98 = arith.constant 9.99999996E-13 : f32
      %269 = vector.broadcast %cst_98 : f32 to vector<1x128xf32>
      %270 = arith.maximumf %268, %269 : vector<1x128xf32>
      %271 = vector.broadcast %270 : vector<1x128xf32> to vector<3x128xf32>
      %272 = arith.divf %256, %271 : vector<3x128xf32>
      %273 = arith.divf %223, %arg18 : vector<1x128xf32>
      %274 = arith.mulf %234, %234 : vector<1x128xf32>
      %cst_99 = arith.constant 1.000000e+00 : f32
      %275 = vector.broadcast %cst_99 : f32 to vector<1x128xf32>
      %276 = arith.subf %275, %274 : vector<1x128xf32>
      %cst_100 = arith.constant 9.99999974E-6 : f32
      %277 = vector.broadcast %cst_100 : f32 to vector<1x128xf32>
      %278 = arith.maximumf %276, %277 : vector<1x128xf32>
      %279 = math.sqrt %278 : vector<1x128xf32>
      %280 = arith.mulf %279, %273 : vector<1x128xf32>
      %cst_101 = arith.constant 1.000000e+00 : f32
      %281 = vector.broadcast %cst_101 : f32 to vector<1x128xf32>
      %282 = arith.addf %280, %281 : vector<1x128xf32>
      %cst_102 = arith.constant 2.000000e+00 : f32
      %283 = vector.broadcast %cst_102 : f32 to vector<1x128xf32>
      %284 = arith.remf %282, %283 : vector<1x128xf32>
      %cst_103 = arith.constant 0.000000e+00 : f32
      %285 = vector.broadcast %cst_103 : f32 to vector<1x128xf32>
      %286 = arith.cmpf one, %284, %285 : vector<1x128xf32>
      %cst_104 = arith.constant 0.000000e+00 : f32
      %287 = vector.broadcast %cst_104 : f32 to vector<1x128xf32>
      %288 = arith.cmpf olt, %284, %287 : vector<1x128xf32>
      %cst_105 = arith.constant 0.000000e+00 : f32
      %289 = arith.cmpf olt, %cst_102, %cst_105 : f32
      %290 = vector.broadcast %289 : i1 to vector<1x128xi1>
      %291 = vector.broadcast %290 : vector<1x128xi1> to vector<1x128xi1>
      %292 = arith.xori %288, %291 : vector<1x128xi1>
      %293 = arith.andi %292, %286 : vector<1x128xi1>
      %294 = vector.broadcast %cst_102 : f32 to vector<1x128xf32>
      %295 = arith.addf %284, %294 : vector<1x128xf32>
      %296 = arith.select %293, %295, %284 : vector<1x128xi1>, vector<1x128xf32>
      %cst_106 = arith.constant 1.000000e+00 : f32
      %297 = vector.broadcast %cst_106 : f32 to vector<1x128xf32>
      %298 = arith.subf %296, %297 : vector<1x128xf32>
      %299 = arith.mulf %298, %298 : vector<1x128xf32>
      %cst_107 = arith.constant 1.000000e+00 : f32
      %300 = vector.broadcast %cst_107 : f32 to vector<1x128xf32>
      %301 = arith.subf %300, %299 : vector<1x128xf32>
      %cst_108 = arith.constant 9.99999974E-6 : f32
      %302 = vector.broadcast %cst_108 : f32 to vector<1x128xf32>
      %303 = arith.maximumf %301, %302 : vector<1x128xf32>
      %304 = math.sqrt %303 : vector<1x128xf32>
      %305 = vector.broadcast %304 : vector<1x128xf32> to vector<3x128xf32>
      %306 = arith.mulf %157, %305 : vector<3x128xf32>
      %307 = vector.extract_strided_slice %272 {offsets = [1, 0], sizes = [1, 128], strides = [1, 1]} : vector<3x128xf32> to vector<1x128xf32>
      %308 = vector.extract_strided_slice %157 {offsets = [2, 0], sizes = [1, 128], strides = [1, 1]} : vector<3x128xf32> to vector<1x128xf32>
      %309 = arith.mulf %307, %308 : vector<1x128xf32>
      %310 = vector.extract_strided_slice %272 {offsets = [2, 0], sizes = [1, 128], strides = [1, 1]} : vector<3x128xf32> to vector<1x128xf32>
      %311 = vector.extract_strided_slice %157 {offsets = [1, 0], sizes = [1, 128], strides = [1, 1]} : vector<3x128xf32> to vector<1x128xf32>
      %312 = arith.mulf %310, %311 : vector<1x128xf32>
      %313 = arith.subf %309, %312 : vector<1x128xf32>
      %314 = vector.extract_strided_slice %272 {offsets = [2, 0], sizes = [1, 128], strides = [1, 1]} : vector<3x128xf32> to vector<1x128xf32>
      %315 = vector.extract_strided_slice %157 {offsets = [0, 0], sizes = [1, 128], strides = [1, 1]} : vector<3x128xf32> to vector<1x128xf32>
      %316 = arith.mulf %314, %315 : vector<1x128xf32>
      %317 = vector.extract_strided_slice %272 {offsets = [0, 0], sizes = [1, 128], strides = [1, 1]} : vector<3x128xf32> to vector<1x128xf32>
      %318 = vector.extract_strided_slice %157 {offsets = [2, 0], sizes = [1, 128], strides = [1, 1]} : vector<3x128xf32> to vector<1x128xf32>
      %319 = arith.mulf %317, %318 : vector<1x128xf32>
      %320 = arith.subf %316, %319 : vector<1x128xf32>
      %321 = vector.extract_strided_slice %272 {offsets = [0, 0], sizes = [1, 128], strides = [1, 1]} : vector<3x128xf32> to vector<1x128xf32>
      %322 = vector.extract_strided_slice %157 {offsets = [1, 0], sizes = [1, 128], strides = [1, 1]} : vector<3x128xf32> to vector<1x128xf32>
      %323 = arith.mulf %321, %322 : vector<1x128xf32>
      %324 = vector.extract_strided_slice %272 {offsets = [1, 0], sizes = [1, 128], strides = [1, 1]} : vector<3x128xf32> to vector<1x128xf32>
      %325 = vector.extract_strided_slice %157 {offsets = [0, 0], sizes = [1, 128], strides = [1, 1]} : vector<3x128xf32> to vector<1x128xf32>
      %326 = arith.mulf %324, %325 : vector<1x128xf32>
      %327 = arith.subf %323, %326 : vector<1x128xf32>
      %328 = tpu.concatenate %313, %320, %327 in 0 : vector<1x128xf32>, vector<1x128xf32>, vector<1x128xf32> -> vector<3x128xf32>
      %329 = vector.broadcast %298 : vector<1x128xf32> to vector<3x128xf32>
      %330 = arith.mulf %328, %329 : vector<3x128xf32>
      %331 = arith.addf %306, %330 : vector<3x128xf32>
      %332 = vector.extract_strided_slice %272 {offsets = [0, 0], sizes = [1, 128], strides = [1, 1]} : vector<3x128xf32> to vector<1x128xf32>
      %333 = vector.extract_strided_slice %157 {offsets = [0, 0], sizes = [1, 128], strides = [1, 1]} : vector<3x128xf32> to vector<1x128xf32>
      %334 = arith.mulf %332, %333 : vector<1x128xf32>
      %335 = vector.extract_strided_slice %272 {offsets = [1, 0], sizes = [1, 128], strides = [1, 1]} : vector<3x128xf32> to vector<1x128xf32>
      %336 = vector.extract_strided_slice %157 {offsets = [1, 0], sizes = [1, 128], strides = [1, 1]} : vector<3x128xf32> to vector<1x128xf32>
      %337 = arith.mulf %335, %336 : vector<1x128xf32>
      %338 = arith.addf %334, %337 : vector<1x128xf32>
      %339 = vector.extract_strided_slice %272 {offsets = [2, 0], sizes = [1, 128], strides = [1, 1]} : vector<3x128xf32> to vector<1x128xf32>
      %340 = vector.extract_strided_slice %157 {offsets = [2, 0], sizes = [1, 128], strides = [1, 1]} : vector<3x128xf32> to vector<1x128xf32>
      %341 = arith.mulf %339, %340 : vector<1x128xf32>
      %342 = arith.addf %338, %341 : vector<1x128xf32>
      %343 = vector.broadcast %342 : vector<1x128xf32> to vector<3x128xf32>
      %344 = arith.mulf %272, %343 : vector<3x128xf32>
      %cst_109 = arith.constant 1.000000e+00 : f32
      %345 = vector.broadcast %cst_109 : f32 to vector<1x128xf32>
      %346 = arith.subf %345, %304 : vector<1x128xf32>
      %347 = vector.broadcast %346 : vector<1x128xf32> to vector<3x128xf32>
      %348 = arith.mulf %344, %347 : vector<3x128xf32>
      %349 = arith.addf %331, %348 : vector<3x128xf32>
      %350 = vector.extract_strided_slice %349 {offsets = [0, 0], sizes = [1, 128], strides = [1, 1]} : vector<3x128xf32> to vector<1x128xf32>
      %351 = vector.extract_strided_slice %349 {offsets = [0, 0], sizes = [1, 128], strides = [1, 1]} : vector<3x128xf32> to vector<1x128xf32>
      %352 = arith.mulf %350, %351 : vector<1x128xf32>
      %353 = vector.extract_strided_slice %349 {offsets = [1, 0], sizes = [1, 128], strides = [1, 1]} : vector<3x128xf32> to vector<1x128xf32>
      %354 = vector.extract_strided_slice %349 {offsets = [1, 0], sizes = [1, 128], strides = [1, 1]} : vector<3x128xf32> to vector<1x128xf32>
      %355 = arith.mulf %353, %354 : vector<1x128xf32>
      %356 = arith.addf %352, %355 : vector<1x128xf32>
      %357 = vector.extract_strided_slice %349 {offsets = [2, 0], sizes = [1, 128], strides = [1, 1]} : vector<3x128xf32> to vector<1x128xf32>
      %358 = vector.extract_strided_slice %349 {offsets = [2, 0], sizes = [1, 128], strides = [1, 1]} : vector<3x128xf32> to vector<1x128xf32>
      %359 = arith.mulf %357, %358 : vector<1x128xf32>
      %360 = arith.addf %356, %359 : vector<1x128xf32>
      %361 = math.sqrt %360 : vector<1x128xf32>
      %cst_110 = arith.constant 9.99999996E-13 : f32
      %362 = vector.broadcast %cst_110 : f32 to vector<1x128xf32>
      %363 = arith.maximumf %361, %362 : vector<1x128xf32>
      %364 = vector.broadcast %363 : vector<1x128xf32> to vector<3x128xf32>
      %365 = arith.divf %349, %364 : vector<3x128xf32>
      %366 = arith.index_cast %arg15 : i32 to index
      %367 = memref.load %arg1[%366] : memref<8xf32, #tpu.memory_space<smem>>
      %368 = vector.broadcast %367 : f32 to vector<3x128xf32>
      %369 = arith.mulf %365, %368 : vector<3x128xf32>
      %370 = arith.addf %arg16, %369 : vector<3x128xf32>
      %c0_111 = arith.constant 0 : index
      %c0_112 = arith.constant 0 : index
      %371 = vector.load %arg3[%c0_111, %c0_112] : memref<35x3xbf16, #tpu.memory_space<vmem>>, vector<35x3xbf16>
      %c0_113 = arith.constant 0 : index
      %c0_114 = arith.constant 0 : index
      %372 = vector.load %arg4[%c0_113, %c0_114] : memref<35x1xf32, #tpu.memory_space<vmem>>, vector<35x1xf32>
      %373 = arith.truncf %370 : vector<3x128xf32> to vector<3x128xbf16>
      %cst_115 = arith.constant dense<0.000000e+00> : vector<35x128xf32>
      %374 = tpu.matmul %371, %373, %cst_115 {dimension_numbers = #tpu.dot_dimension_numbers<[1], [0], [0], [1], [0, 0, 1, 1], [], []>} : vector<35x3xbf16>, vector<3x128xbf16>, vector<35x128xf32> -> vector<35x128xf32>
      %375 = vector.broadcast %372 : vector<35x1xf32> to vector<35x128xf32>
      %376 = arith.addf %374, %375 : vector<35x128xf32>
      %377 = vector.extract_strided_slice %376 {offsets = [0, 0], sizes = [32, 128], strides = [1, 1]} : vector<35x128xf32> to vector<32x128xf32>
      %cst_116 = arith.constant 0.000000e+00 : f32
      %378 = vector.broadcast %cst_116 : f32 to vector<32x128xf32>
      %379 = arith.maximumf %377, %378 : vector<32x128xf32>
      %380 = vector.extract_strided_slice %376 {offsets = [32, 0], sizes = [3, 128], strides = [1, 1]} : vector<35x128xf32> to vector<3x128xf32>
      %c0_117 = arith.constant 0 : index
      %c0_118 = arith.constant 0 : index
      %381 = vector.load %arg5[%c0_117, %c0_118] : memref<33x32xbf16, #tpu.memory_space<vmem>>, vector<33x32xbf16>
      %c0_119 = arith.constant 0 : index
      %c0_120 = arith.constant 0 : index
      %382 = vector.load %arg6[%c0_119, %c0_120] : memref<33x1xf32, #tpu.memory_space<vmem>>, vector<33x1xf32>
      %383 = arith.truncf %379 : vector<32x128xf32> to vector<32x128xbf16>
      %cst_121 = arith.constant dense<0.000000e+00> : vector<33x128xf32>
      %384 = tpu.matmul %381, %383, %cst_121 {dimension_numbers = #tpu.dot_dimension_numbers<[1], [0], [0], [1], [0, 0, 1, 1], [], []>} : vector<33x32xbf16>, vector<32x128xbf16>, vector<33x128xf32> -> vector<33x128xf32>
      %385 = vector.broadcast %382 : vector<33x1xf32> to vector<33x128xf32>
      %386 = arith.addf %384, %385 : vector<33x128xf32>
      %387 = vector.extract_strided_slice %386 {offsets = [0, 0], sizes = [1, 128], strides = [1, 1]} : vector<33x128xf32> to vector<1x128xf32>
      %cst_122 = arith.constant 0.000000e+00 : f32
      %388 = vector.broadcast %cst_122 : f32 to vector<1x128xf32>
      %389 = arith.maximumf %387, %388 : vector<1x128xf32>
      %c0_123 = arith.constant 0 : index
      %c0_124 = arith.constant 0 : index
      %390 = vector.load %arg12[%c0_123, %c0_124] : memref<3x32xbf16, #tpu.memory_space<vmem>>, vector<3x32xbf16>
      %391 = vector.extract_strided_slice %386 {offsets = [1, 0], sizes = [32, 128], strides = [1, 1]} : vector<33x128xf32> to vector<32x128xf32>
      %c0_125 = arith.constant 0 : index
      %c0_126 = arith.constant 0 : index
      %392 = vector.load %arg13[%c0_125, %c0_126] : memref<3x1xf32, #tpu.memory_space<vmem>>, vector<3x1xf32>
      %393 = arith.truncf %391 : vector<32x128xf32> to vector<32x128xbf16>
      %cst_127 = arith.constant dense<0.000000e+00> : vector<3x128xf32>
      %394 = tpu.matmul %390, %393, %cst_127 {dimension_numbers = #tpu.dot_dimension_numbers<[1], [0], [0], [1], [0, 0, 1, 1], [], []>} : vector<3x32xbf16>, vector<32x128xbf16>, vector<3x128xf32> -> vector<3x128xf32>
      %395 = vector.broadcast %392 : vector<3x1xf32> to vector<3x128xf32>
      %396 = arith.addf %394, %395 : vector<3x128xf32>
      %397 = arith.negf %396 : vector<3x128xf32>
      %398 = math.exp %397 : vector<3x128xf32>
      %cst_128 = arith.constant 1.000000e+00 : f32
      %399 = vector.broadcast %cst_128 : f32 to vector<3x128xf32>
      %400 = arith.addf %399, %398 : vector<3x128xf32>
      %401 = arith.divf %399, %400 : vector<3x128xf32>
      %cst_129 = arith.constant 0.000000e+00 : f32
      %402 = vector.broadcast %cst_129 : f32 to vector<1x128xf32>
      %403 = arith.subf %402, %389 : vector<1x128xf32>
      %cst_130 = arith.constant 0.128571436 : f32
      %404 = vector.broadcast %cst_130 : f32 to vector<1x128xf32>
      %405 = arith.mulf %403, %404 : vector<1x128xf32>
      %406 = math.exp %405 : vector<1x128xf32>
      %cst_131 = arith.constant 1.000000e+00 : f32
      %407 = vector.broadcast %cst_131 : f32 to vector<1x128xf32>
      %408 = arith.subf %407, %406 : vector<1x128xf32>
      %409 = arith.mulf %arg21, %408 : vector<1x128xf32>
      %410 = vector.broadcast %409 : vector<1x128xf32> to vector<3x128xf32>
      %411 = arith.mulf %410, %401 : vector<3x128xf32>
      %412 = arith.addf %arg22, %411 : vector<3x128xf32>
      %cst_132 = arith.constant 1.000000e+00 : f32
      %413 = vector.broadcast %cst_132 : f32 to vector<1x128xf32>
      %414 = arith.subf %413, %408 : vector<1x128xf32>
      %415 = arith.mulf %arg21, %414 : vector<1x128xf32>
      scf.yield %370, %365, %223, %386, %380, %415, %412 : vector<3x128xf32>, vector<3x128xf32>, vector<1x128xf32>, vector<33x128xf32>, vector<3x128xf32>, vector<1x128xf32>, vector<3x128xf32>
    }
    %c7_i32_66 = arith.constant 7 : i32
    %c0_67 = arith.constant 0 : index
    %c0_68 = arith.constant 0 : index
    %141 = vector.load %arg14[%c0_67, %c0_68] : memref<3x128xf32, #tpu.memory_space<vmem>>, vector<3x128xf32>
    tpu.vector_store %arg14[%c0_67, %c0_68], %140#6 {strides = array<i32>} : memref<3x128xf32, #tpu.memory_space<vmem>>, vector<3x128xf32>,
    return
  }
  func.func @transform_0(%arg0: i32) -> i32 {
    %c0_i32 = arith.constant 0 : i32
    %c0_i32_0 = arith.constant 0 : i32
    return %c0_i32 : i32
  }
  func.func @transform_1(%arg0: i32) -> (i32, i32) {
    %c0_i32 = arith.constant 0 : i32
    %c0_i32_0 = arith.constant 0 : i32
    return %c0_i32, %arg0 : i32, i32
  }
  func.func @transform_2(%arg0: i32) -> (i32, i32) {
    %c0_i32 = arith.constant 0 : i32
    %c0_i32_0 = arith.constant 0 : i32
    %c0_i32_1 = arith.constant 0 : i32
    return %c0_i32, %c0_i32_0 : i32, i32
  }
  func.func @transform_3(%arg0: i32) -> (i32, i32) {
    %c0_i32 = arith.constant 0 : i32
    %c0_i32_0 = arith.constant 0 : i32
    %c0_i32_1 = arith.constant 0 : i32
    return %c0_i32, %c0_i32_0 : i32, i32
  }
  func.func @transform_4(%arg0: i32) -> (i32, i32) {
    %c0_i32 = arith.constant 0 : i32
    %c0_i32_0 = arith.constant 0 : i32
    %c0_i32_1 = arith.constant 0 : i32
    return %c0_i32, %c0_i32_0 : i32, i32
  }
  func.func @transform_5(%arg0: i32) -> (i32, i32) {
    %c0_i32 = arith.constant 0 : i32
    %c0_i32_0 = arith.constant 0 : i32
    %c0_i32_1 = arith.constant 0 : i32
    return %c0_i32, %c0_i32_0 : i32, i32
  }
  func.func @transform_6(%arg0: i32) -> (i32, i32) {
    %c0_i32 = arith.constant 0 : i32
    %c0_i32_0 = arith.constant 0 : i32
    %c0_i32_1 = arith.constant 0 : i32
    return %c0_i32, %c0_i32_0 : i32, i32
  }
  func.func @transform_7(%arg0: i32) -> (i32, i32, i32) {
    %c0_i32 = arith.constant 0 : i32
    %c0_i32_0 = arith.constant 0 : i32
    %c0_i32_1 = arith.constant 0 : i32
    %c0_i32_2 = arith.constant 0 : i32
    return %c0_i32, %c0_i32_0, %c0_i32_1 : i32, i32, i32
  }
  func.func @transform_8(%arg0: i32) -> (i32, i32) {
    %c0_i32 = arith.constant 0 : i32
    %c0_i32_0 = arith.constant 0 : i32
    %c0_i32_1 = arith.constant 0 : i32
    return %c0_i32, %c0_i32_0 : i32, i32
  }
  func.func @transform_9(%arg0: i32) -> (i32, i32) {
    %c0_i32 = arith.constant 0 : i32
    %c0_i32_0 = arith.constant 0 : i32
    %c0_i32_1 = arith.constant 0 : i32
    return %c0_i32, %c0_i32_0 : i32, i32
  }
  func.func @transform_10(%arg0: i32) -> (i32, i32) {
    %c0_i32 = arith.constant 0 : i32
    %c0_i32_0 = arith.constant 0 : i32
    %c0_i32_1 = arith.constant 0 : i32
    return %c0_i32, %c0_i32_0 : i32, i32
  }
  func.func @transform_11(%arg0: i32) -> (i32, i32) {
    %c0_i32 = arith.constant 0 : i32
    %c0_i32_0 = arith.constant 0 : i32
    %c0_i32_1 = arith.constant 0 : i32
    return %c0_i32, %c0_i32_0 : i32, i32
  }
  func.func @transform_12(%arg0: i32) -> (i32, i32) {
    %c0_i32 = arith.constant 0 : i32
    %c0_i32_0 = arith.constant 0 : i32
    %c0_i32_1 = arith.constant 0 : i32
    return %c0_i32, %c0_i32_0 : i32, i32
  }
  func.func @transform_13(%arg0: i32) -> (i32, i32) {
    %c0_i32 = arith.constant 0 : i32
    %c0_i32_0 = arith.constant 0 : i32
    return %c0_i32, %arg0 : i32, i32
  }
}

</mosaic_0001>

<bundles_post_ra>
// kernel: tpu_custom_call.1
= control target key start
LH: loop header
LB: loop body
LE: loop exit
PB: predicated region body
PF: predicated region fallthrough
CT: control target
= control target key end

     0   :  { %s6133_s0 = inlined_call_operand.vmem [shape: f32[8], index: 0, kind: input, shape index: {}]   ;;  %s6134_s1 = inlined_call_operand.vmem [shape: f32[6,256], index: 1, kind: input, shape index: {}]   ;;  %s6135_s2 = inlined_call_operand.vmem [shape: bf16[35,3], index: 2, kind: input, shape index: {}]   ;;  %s6136_s3 = inlined_call_operand.vmem [shape: f32[35,1], index: 3, kind: input, shape index: {}]   ;;  %s6137_s4 = inlined_call_operand.vmem [shape: bf16[33,32], index: 4, kind: input, shape index: {}]   ;;  %s6138_s5 = inlined_call_operand.vmem [shape: f32[33,1], index: 5, kind: input, shape index: {}]   ;;  %s6139_s6 = inlined_call_operand.vmem [shape: bf16[128,33], index: 6, kind: input, shape index: {}]   ;;  %s6140_s7 = inlined_call_operand.vmem [shape: bf16[3,128,128], index: 7, kind: input, shape index: {}]   ;;  %s6141_s8 = inlined_call_operand.vmem [shape: f32[128,4], index: 8, kind: input, shape index: {}]   ;;  %s6142_s9 = inlined_call_operand.vmem [shape: bf16[1,128], index: 9, kind: input, shape index: {}]   ;;  %s6143_s10 = inlined_call_operand.<no memory space> [shape: f32[1,1], index: 10, kind: input, shape index: {}]   ;;  %s6144_s11 = inlined_call_operand.vmem [shape: bf16[3,32], index: 11, kind: input, shape index: {}]   ;;  %s6145_s12 = inlined_call_operand.vmem [shape: f32[3,1], index: 12, kind: input, shape index: {}]   ;;  %s6146_s13 = inlined_call_operand.hbm [shape: f32[3,256], index: 13, kind: output, shape index: {}]  }
   0x1   :  { %6197 = sst [smem:[#allocation56_spill]] %s6133_s0  ;;  %v18_v0 = vstv %s6143_s10 }
   0x2   :  { %6198 = sst [smem:[#allocation57_spill]] %s6134_s1  ;;  %19 = vst [vmem:[#allocation2] sm:$0x1] %v18_v0 }
   0x3   :  { %6199 = sst [smem:[#allocation58_spill]] %s6135_s2 }
   0x4   :  { %6200 = sst [smem:[#allocation59_spill]] %s6136_s3 }
   0x5   :  { %20 = vsyncpa [#allocation5], 0 }
   0x6   :  { %21 = vsyncpa [#allocation4], 0 }
   0x7   :  { %23 = vsyncpa [#allocation4 + $0x1], 0  ;;  %s4906_s27 = smov 0   ;;  %s4908_s28 = smov 0  }
   0x8   :  { %s4910_s29 = smov 0   ;;  %s4912_s30 = smov 0  }
   0x9 LB: > { %s4927_s10 = sadd.s32 4294967295, %s4771_s30   ;;  %s3604_s14 = sadd.s32 4294967294, %s4771_s30   ;;  %s4771_s30 = sphi %s4912_s30, %s6313_s30   ;;  %s4767_s29 = sphi %s4910_s29, %s6312_s29   ;;  %s4763_s28 = sphi %s4908_s28, %s6311_s28   ;;  %s4759_s27 = sphi %s4906_s27, %s6310_s27  }
   0xa   : > { %s4931_s15 = sadd.s32 1, %s4771_s30   ;;  %s314_s16 = sadd.s32 1, %s4767_s29 }
   0xb   : > { %s311_s17 = ssub.s32 %s4771_s30, %s4931_s15  ;;  %p324_p0 = scmp.ne.s32.totalorder %s4767_s29, %s4763_s28 }
   0xc   : > { %p312_p1 = scmp.eq.s32.totalorder %s311_s17, 0  ;;  %p325_p2 = scmp.eq.s32.totalorder %s4927_s10, 1 }
   0xd   : > { %p330_p3 = scmp.ne.s32.totalorder %s4763_s28, %s4759_s27  ;;  %p331_p4 = scmp.eq.s32.totalorder %s3604_s14, 1 }
   0xe   : > { %s4942_s18 = scalar_select %p312_p1, %s4767_s29, %s314_s16  }
   0xf   : > { %p4944_p5 = por %p325_p2, %p324_p0  ;;  %p4948_p6 = por %p331_p4, %p330_p3 }
  0x10   : > { %6201 = sst [smem:[#allocation9_spill]] %s4942_s18  ;;  %p3605_p7 = scmp.ge.s32.totalorder %s4771_s30, 1 }
  0x11   : > { %p338_p8 = scmp.lt.s32.totalorder %s4771_s30, 3  ;;  %p4362_p9 = scmp.eq.s32.totalorder %s4927_s10, 0 }
  0x12   : > { %s6205_s0 = sld [smem:[#allocation56_spill]] }
  0x13   : > { %p4955_p10 = pnand %p3605_p7, %p338_p8 }
  0x15   : > { %p4354_p11 = pneg %p4955_p10 }
  0x17   : > { %p4355_p12 = pnand %p4362_p9, %p4354_p11 }
  0x18   : > { %s351_s24 = sshll.u32 %s6205_s0, 4  ;;  %s352_s24 = int_to_ptr.vmem [resolvable:$true] %s351_s24 }
  0x19   : > { %s4644_s25 = scalar_lea.vmem %s352_s24, 16  ;;  %p4646_p0 = pneg %p4355_p12 }
  0x1a   : > { %p4645_p13 = scmp.ne.s32.totalorder %s352_s24, %s4644_s25  ;;  %p4652_p3 = scmp.lt.s32.totalorder %s352_s24, %s352_s24 }
  0x1b   : > { %p4653_p4 = scmp.lt.s32.totalorder %s4644_s25, %s4644_s25 }
  0x1c   : > { %p4647_p1 = pnand %p4646_p0, %p4645_p13 }
  0x1d   : > { %p4654_p7 = por %p4653_p4, %p4652_p3 }
  0x1e   : > { %p4648_p2 = pneg %p4647_p1 }
  0x20   : > { %p4655_p8 = pnand %p4654_p7, %p4648_p2 }
  0x22   : > { %4658 = shalt.err (!%p4655_p8)
}
  0x23   : > { %s4821_s26 = smov [#allocation3]   ;;  %404 = sbr.rel (%p4955_p10) target bundleno = 4317 (0x10dd), region = 72 }
  0x24   : > { %4357 = dma.vmem_to_smem (!%p4355_p12), %s352_s24, 16, %s4821_s26, [#allocation5]  }
  0x28   : > { %4750 = dma.done.wait (%p4362_p9), [#allocation5], 16  }
  0x29   : > { %4752 = vsyncadd (%p4362_p9), [#allocation5], 4294967280 }
  0x2a   : > { %410 = sfence }
  0x2b   : > { %s6147_s14 = sand.u32 1, %s4763_s28   ;;  %p448_p11 = scmp.lt.s32.totalorder %s4927_s10, 1  ;;  %v6150_v1 = vmov 0.0   ;;  %vm4823_vm0 = vmmov 0   ;;  %v6148_v3 = vmov 0   ;;  %vm556_vm1 = vcmask 1040384  }
  0x2c   : > { %s4976_s16 = sshll.u32 %s6147_s14, 2  ;;  %3966 = vmatprep.subr.bf16.mxu0 %v6150_v1  ;;  %3980 = vmatprep.subr.bf16.mxu1 %v6150_v1  ;;  %s6206_s3 = sld [smem:[#allocation59_spill]]  ;;  %v491_v10 = vlaneseq  ;;  %vm557_vm2 = vcmask 1041408   ;;  %v4825_v11 = vmov 65535   ;;  %v631_v16 = vld [vmem:[%s6138_s5 + $0x20] sm:$0x1] }
  0x2d   : > { %3968 = vmatprep.mubr.msk.bf16.mxu0 %vm4823_vm0, %v6150_v1  ;;  %3984 = vmatprep.mubr.msk.bf16.mxu1 %vm4823_vm0, %v6150_v1  ;;  %s449_s17 = scalar_select %p448_p11, %s4927_s10, 1  ;;  %v558_v12 = vsel %vm556_vm1, 4294967295, %v4825_v11  ;;  %v629_v17 = vld [vmem:[%s6138_s5 + $0x10] sm:$0xff]  ;;  %v630_v22 = vld [vmem:[%s6138_s5 + $0x18] sm:$0xff]  ;;  %v627_v23 = vld [vmem:[%s6138_s5] sm:$0xff]  ;;  %vm546_vm3 = vcmask 23552  }
  0x2e   : > { %4504 = vset.pattern.permute.xlu0 %v6148_v3  ;;  %4505 = vset.pattern.permute.xlu1 %v6148_v3  ;;  %s6207_s1 = sld [smem:[#allocation57_spill]]  ;;  %v5017_v20 = vshrl.u32 %v491_v10, 7  ;;  %v5020_v21 = vsel %vm557_vm2, %v558_v12, 0  ;;  %v628_v30 = vld [vmem:[%s6138_s5 + $0x8] sm:$0xff]  ;;  %v5043_v31 = vld [vmem:[%s6141_s8 + $0x70] sm:$0xff]  ;;  %v5048_v32 = vld [vmem:[%s6141_s8 + $0x78] sm:$0xff] }
  0x2f   : > { %s3611_s23 = sshll.u32 %s449_s17, 3  ;;  %6208 = vst [vmem:[#allocation10_spill] sm:$0xff] %v5020_v21  ;;  %s6210_s2 = sld [smem:[#allocation58_spill]]  ;;  %v5054_v33 = vld [vmem:[%s6141_s8 + $0x60] sm:$0xff]  ;;  %v5065_v35 = vld [vmem:[%s6141_s8 + $0x68] sm:$0xff]  ;;  %v5071_v36 = vld [vmem:[%s6141_s8 + $0x50] sm:$0xff] }
  0x30   : > { %v5031_v27 = vsub.s32 3, %v5017_v20  ;;  %v5077_v38 = vld [vmem:[%s6141_s8 + $0x58] sm:$0xff]  ;;  %v5084_v40 = vld [vmem:[%s6141_s8 + $0x40] sm:$0xff]  ;;  %v5094_v43 = vld [vmem:[%s6141_s8 + $0x48] sm:$0xff]  ;;  %s1836_s26 = sld [smem:[#allocation3]]  ;;  %vm672_vm6 = vcmask 261120  }
  0x31   : > { %v5100_v45 = vld [vmem:[%s6141_s8 + $0x30] sm:$0xff]  ;;  %v5108_v47 = vld [vmem:[%s6141_s8 + $0x38] sm:$0xff]  ;;  %v5114_v48 = vld [vmem:[%s6141_s8 + $0x20] sm:$0xff]  ;;  %vm877_vm7 = vcmask 269312   ;;  %vm1976_vm8 = vsmask.f32 7424 }
  0x32   : > { %v504_v2 = vld [vmem:[%s6206_s3 + $0x10] sm:$0xff]  ;;  %v502_v4 = vld [vmem:[%s6206_s3] sm:$0xff]  ;;  %v505_v6 = vld [vmem:[%s6206_s3 + $0x18] sm:$0xff]  ;;  %6209 = vst [vmem:[#allocation11_spill] sm:$0xff] %v5031_v27 }
  0x33   : > { %520 = vperm.xlu0 %4504, %v504_v2   ;;  %510 = vperm.xlu1 %4505, %v502_v4   ;;  %v503_v7 = vld [vmem:[%s6206_s3 + $0x8] sm:$0xff]  ;;  %v5126_v50 = vld [vmem:[%s6141_s8 + $0x10] sm:$0xff]  ;;  %v5132_v51 = vld [vmem:[%s6141_s8 + $0x18] sm:$0xff] }
  0x34   : > { %s451_s0 = scalar_lea.vmem %s6207_s1, %s3611_s23  ;;  %v5120_v49 = vld [vmem:[%s6141_s8 + $0x28] sm:$0xff]  ;;  %v5138_v52 = vld [vmem:[%s6141_s8] sm:$0xff] }
  0x35   : > { %v4996_v5 = vld [vmem:[%s451_s0] sm:$0x3f]  ;;  %v4515_v34 = vld [vmem:[%s6210_s2 + $0x8] sm:$0xff]   ;;  %s5711_s0 = smov 1  }
  0x36   : > { %v470_v8 = vmul.f32 0.1, %v4996_v5  ;;  %v475_v9 = vmul.f32 %v4996_v5, %v4996_v5  ;;  %v4514_v28 = vld [vmem:[%s6210_s2] sm:$0xff]   ;;  %v1837_v54 = vstv %s1836_s26  ;;  %v5144_v55 = vld [vmem:[%s6141_s8 + $0x8] sm:$0xff] }
  0x37   : > { %525 = vperm.xlu0 %4504, %v505_v6   ;;  %515 = vperm.xlu1 %4505, %v503_v7  }
  0x38   : > { %v472_v13 = vrot.slane %v470_v8, 3  ;;  %v477_v14 = vrot.slane %v475_v9, 1  ;;  %v480_v15 = vrot.slane %v475_v9, 2 }
  0x3a   : > { %v5015_v18 = vadd.f32 %v472_v13, %v4996_v5  ;;  %v479_v19 = vadd.f32 %v477_v14, %v475_v9 }
  0x3b   : > { %656 = vperm.xlu0 %4504, %v631_v16   ;;  %646 = vperm.xlu1 %4505, %v629_v17  }
  0x3c   : > { %v482_v24 = vadd.f32 %v480_v15, %v479_v19  ;;  %v507_v25 = vpack.c.bf16 %v5015_v18, %v5015_v18 }
  0x3e   : > { %4552 = vrsqrt.f32 %v482_v24  ;;  %v488_v26 = vand.u32 2147483648, %v482_v24  ;;  %v561_v29 = vand.u32 %v5020_v21, %v507_v25  ;;  %vm485_vm4 = vcmp.eq.f32.partialorder %v482_v24, inf  ;;  %v4517_v25 = vld [vmem:[%s6137_s4 + $0x8] sm:$0xff]  }
  0x3f   : > { %651 = vperm.xlu0 %4504, %v630_v22   ;;  %636 = vperm.xlu1 %4505, %v627_v23   ;;  %vm487_vm5 = vcmp.eq.f32.partialorder %v482_v24, 0.0 }
  0x40   : > { %3967 = vmatpush3.bf16.msra.mxu0 %v561_v29  ;;  %v4520_v29 = vld [vmem:[%s6139_s6] sm:$0xff]  }
  0x43   : > { %3969 = vmatmul.mubr.msk.bf16.vlgmr.msra.gmra.mxu0 %vm546_vm3, %v4514_v28  ;;  %641 = vperm.xlu0 %4504, %v628_v30   ;;  %v4519_v28 = vld [vmem:[%s6210_s2 + $0x10] ss:$0 sps:$4 sm:$0x33]  }
  0x44   : > { %3972 = vmatprep.mubr.msk.bf16.mxu0 %vm4823_vm0, %v6150_v1  ;;  %829 = vperm.xlu1 %4505, %v5043_v31  }
  0x47   : > { %834 = vperm.xlu0 %4504, %v5048_v32  }
  0x48   : > { %819 = vperm.xlu1 %4505, %v5054_v33  }
  0x4b   : > { %v4553_v37 = vpop.eup %4552  ;;  %3973 = vmatmul.mubr.msk.bf16.gmra.mxu0 %vm546_vm3, %v4515_v34  ;;  %824 = vperm.xlu0 %4504, %v5065_v35  }
  0x4c   : > { %v484_v39 = vmul.f32 %v4553_v37, %v482_v24  ;;  %809 = vperm.xlu1 %4505, %v5071_v36   ;;  %3976 = vmatprep.mubr.msk.bf16.mxu0 %vm4823_vm0, %v6150_v1 }
  0x4e   : > { %v486_v41 = vsel %vm485_vm4, %v482_v24, %v484_v39  ;;  %v4516_v24 = vld [vmem:[%s6137_s4] sm:$0xff]  }
  0x4f   : > { %v489_v42 = vsel %vm487_vm5, %v488_v26, %v486_v41  ;;  %814 = vperm.xlu0 %4504, %v5077_v38   ;;  %v4518_v26 = vld [vmem:[%s6137_s4 + $0x10] ss:$0 sps:$4 sm:$0x11]  }
  0x50   : > { %v490_v44 = vmax.f32 %v489_v42, 1e-12  ;;  %799 = vperm.xlu1 %4505, %v5084_v40  }
  0x52   : > { %v494_v46 = vrot.slane %v490_v44, %v5031_v27 }
  0x53   : > { %804 = vperm.xlu0 %4504, %v5094_v43   ;;  %3977 = vmatmul.mubr.msk.bf16.gmra.mxu0 %vm546_vm3, %v4519_v28 }
  0x54   : > { %4554 = vrcp.f32 %v494_v46  ;;  %789 = vperm.xlu1 %4505, %v5100_v45   ;;  %4002 = vmatprep.mubr.msk.bf16.mxu0 %vm877_vm7, %v4520_v29 }
  0x57   : > { %794 = vperm.xlu0 %4504, %v5108_v47  }
  0x58   : > { %779 = vperm.xlu1 %4505, %v5114_v48  }
  0x5b   : > { %784 = vperm.xlu0 %4504, %v5120_v49  }
  0x5c   : > { %769 = vperm.xlu1 %4505, %v5126_v50  }
  0x5f   : > { %774 = vperm.xlu0 %4504, %v5132_v51  }
  0x60   : > { %759 = vperm.xlu1 %4505, %v5138_v52  }
  0x61   : > { %v4555_v53 = vpop.eup %4554 }
  0x62   : > { %v5148_v56 = vmul.f32 %v4555_v53, %v4996_v5  }
  0x63   : > { %764 = vperm.xlu0 %4504, %v5144_v55  }
  0x64   : > { %v1838_v57 = vmul.f32 %v1837_v54, %v5148_v56 }
  0x66   : > { %v1840_v58 = vrot.slane %v1838_v57, 3 }
  0x68   : > { %v5153_v59 = vadd.f32 %v1840_v58, %v5015_v18  }
  0x6a   : > { %6211 = vst [vmem:[#allocation12_spill] sm:$0xff] %v5153_v59  ;;  %v1843_v60 = vpack.c.bf16 %v5153_v59, %v5153_v59 }
  0x6c   : > { %v5158_v61 = vand.u32 %v1843_v60, %v5020_v21 }
  0xae   : > { %v5160_v2 = vpop.permute.xlu0 %520  ;;  %v5162_v4 = vpop.permute.xlu1 %510 }
  0xb2   : > { %v5164_v8 = vpop.permute.xlu0 %525  ;;  %v5167_v10 = vpop.permute.xlu1 %515 }
  0xb6   : > { %v5197_v42 = vpop.permute.xlu0 %656  ;;  %v5202_v60 = vpop.permute.xlu1 %646 }
  0xba   : > { %v5199_v54 = vpop.permute.xlu0 %651 }
 0x103   : > { %v597_v62 = vpop.f32.mrf.mxu0 }
 0x104   : > { %v598_v15 = vadd.f32 %v597_v62, %v5162_v4  ;;  %v5206_v62 = vsel %vm556_vm1, 65535, %v6148_v3 }
 0x105   : > { %v3970_v63 = vpop.f32.mrf.mxu0  ;;  %6212 = vst [vmem:[#allocation13_spill] sm:$0xff] %v5206_v62 }
 0x106   : > { %v618_v22 = vmax.f32 %v598_v15, 0.0  ;;  %v5214_v15 = vpop.permute.xlu1 %636 }
 0x107   : > { %v600_v0 = vpop.f32.mrf.mxu0 }
 0x108   : > { %v601_v12 = vadd.f32 %v600_v0, %v5167_v10 }
 0x109   : > { %v3971_v5 = vpop.f32.mrf.mxu0 }
 0x10a   : > { %v619_v18 = vmax.f32 %v601_v12, 0.0 }
 0x10b   : > { %v605_v6 = vpop.f32.mrf.mxu0 }
 0x10c   : > { %v606_v9 = vadd.f32 %v605_v6, %v5160_v2  ;;  %v632_v23 = vpack.c.bf16 %v619_v18, %v618_v22  ;;  %v4521_v18 = vld [vmem:[%s6139_s6 + $0x8] sm:$0xff]   ;;  %v4523_v22 = vld [vmem:[%s6139_s6 + $0x18] sm:$0xff]  }
 0x10d   : > { %v3974_v7 = vpop.f32.mrf.mxu0 }
 0x10e   : > { %v620_v16 = vmax.f32 %v606_v9, 0.0 }
 0x10f   : > { %v608_v11 = vpop.f32.mrf.mxu0 }
 0x110   : > { %v609_v13 = vadd.f32 %v608_v11, %v5164_v8  ;;  %v5211_v11 = vpop.permute.xlu0 %641 }
 0x111   : > { %v3975_v14 = vpop.f32.mrf.mxu0 }
 0x112   : > { %v621_v17 = vmax.f32 %v609_v13, 0.0 }
 0x113   : > { %v613_v28 = vpop.f32.mrf.mxu0 }
 0x114   : > { %v633_v19 = vpack.c.bf16 %v621_v17, %v620_v16 }
 0x115   : > { %v3978_v29 = vpop.f32.mrf.mxu0 }
 0x116   : > { %3981 = vmatpush3.bf16.msra.mxu1 %v633_v19  ;;  %v4522_v19 = vld [vmem:[%s6139_s6 + $0x10] sm:$0xff]  }
 0x117   : > { %3982 = vmatprep.subr.bf16.mxu1 %v6150_v1 }
 0x11a   : > { %3983 = vmatpush3.bf16.msra.mxu1 %v632_v23  ;;  %v4524_v23 = vld [vmem:[%s6139_s6 + $0x20] sm:$0xff]  }
 0x11d   : > { %3985 = vmatmul.mubr.msk.bf16.vlgmr.msra.gmra.mxu1 %vm672_vm6, %v4516_v24  ;;  %v4525_v24 = vld [vmem:[%s6139_s6 + $0x28] sm:$0xff]  }
 0x11e   : > { %3988 = vmatprep.mubr.msk.bf16.mxu1 %vm4823_vm0, %v6150_v1 }
 0x125   : > { %3989 = vmatmul.mubr.msk.bf16.gmra.mxu1 %vm672_vm6, %v4517_v25  ;;  %v4526_v25 = vld [vmem:[%s6139_s6 + $0x30] sm:$0xff]  }
 0x126   : > { %3992 = vmatprep.mubr.msk.bf16.mxu1 %vm4823_vm0, %v6150_v1 }
 0x12d   : > { %3993 = vmatmul.mubr.msk.bf16.gmra.mxu1 %vm672_vm6, %v4518_v26  ;;  %v4527_v26 = vld [vmem:[%s6139_s6 + $0x38] sm:$0xff]  }
 0x1dd   : > { %v716_v30 = vpop.f32.mrf.mxu1 }
 0x1de   : > { %v717_v16 = vadd.f32 %v716_v30, %v5214_v15  ;;  %v615_v30 = vpop.f32.mrf.mxu0 }
 0x1df   : > { %v3986_v34 = vpop.f32.mrf.mxu1 }
 0x1e0   : > { %v3979_v34 = vpop.f32.mrf.mxu0 }
 0x1e1   : > { %v719_v37 = vpop.f32.mrf.mxu1 }
 0x1e2   : > { %v720_v13 = vadd.f32 %v719_v37, %v5211_v11  ;;  %v4528_v37 = vld [vmem:[%s6140_s7] sm:$0xff]  }
 0x1e3   : > { %v3987_v39 = vpop.f32.mrf.mxu1  ;;  %4034 = vmatprep.mubr.bf16.mxu1 %v4528_v37 }
 0x1e4   : > { %v754_v17 = vpack.c.bf16 %v720_v13, %v717_v16  ;;  %v4826_v39 = vmov 1  }
 0x1e5   : > { %v724_v41 = vpop.f32.mrf.mxu1  ;;  %4506 = vset.pattern.permute.xlu1 %v4826_v39  ;;  %4507 = vset.pattern.permute.xlu0 %v4826_v39 }
 0x1e6   : > { %v725_v7 = vadd.f32 %v724_v41, %v5202_v60  ;;  %1101 = vperm.xlu1 %4506, %v5043_v31   ;;  %1105 = vperm.xlu0 %4507, %v5048_v32  }
 0x1e7   : > { %v3990_v44 = vpop.f32.mrf.mxu1 }
 0x1e9   : > { %v727_v46 = vpop.f32.mrf.mxu1 }
 0x1ea   : > { %v728_v0 = vadd.f32 %v727_v46, %v5199_v54  ;;  %1093 = vperm.xlu1 %4506, %v5054_v33   ;;  %1085 = vperm.xlu0 %4507, %v5071_v36  }
 0x1eb   : > { %v3991_v53 = vpop.f32.mrf.mxu1 }
 0x1ec   : > { %v755_v14 = vpack.c.bf16 %v728_v0, %v725_v7 }
 0x1ed   : > { %v732_v57 = vpop.f32.mrf.mxu1 }
 0x1ee   : > { %v733_v58 = vadd.f32 %v732_v57, %v5197_v42  ;;  %1097 = vperm.xlu1 %4506, %v5065_v35   ;;  %1077 = vperm.xlu0 %4507, %v5084_v40   ;;  %v5270_v57 = vpop.permute.xlu0 %834 }
 0x1ef   : > { %v3994_v63 = vpop.f32.mrf.mxu1  ;;  %6213 = vst [vmem:[#allocation14_spill] sm:$0xff] %v5270_v57 }
 0x1f0   : > { %v756_v5 = vpack.c.bf16 %v733_v58, %v733_v58  ;;  %v5272_v63 = vpop.permute.xlu1 %829 }
 0x1f1   : > { %v735_v6 = vpop.f32.mrf.mxu1  ;;  %6214 = vst [vmem:[#allocation15_spill] sm:$0xff] %v5272_v63 }
 0x1f2   : > { %v905_v9 = vand.u32 %v5206_v62, %v756_v5  ;;  %1089 = vperm.xlu1 %4506, %v5077_v38   ;;  %1069 = vperm.xlu0 %4507, %v5100_v45   ;;  %v5274_v6 = vpop.permute.xlu0 %824 }
 0x1f3   : > { %v3995_v12 = vpop.f32.mrf.mxu1  ;;  %6215 = vst [vmem:[#allocation16_spill] sm:$0xff] %v5274_v6 }
 0x1f4   : > { %3996 = vmatprep.subr.bf16.mxu0 %v905_v9 }
 0x1f5   : > { %3997 = vmatpush3.bf16.msra.mxu0 %v905_v9  ;;  %v5276_v9 = vpop.permute.xlu1 %819 }
 0x1f6   : > { %3998 = vmatprep.subr.bf16.mxu0 %v755_v14  ;;  %1081 = vperm.xlu1 %4506, %v5094_v43   ;;  %6216 = vst [vmem:[#allocation17_spill] sm:$0xff] %v5276_v9 }
 0x1f7   : > { %1061 = vperm.xlu0 %4507, %v5114_v48  }
 0x1f9   : > { %3999 = vmatpush3.bf16.msra.mxu0 %v755_v14  ;;  %v5278_v14 = vpop.permute.xlu0 %814 }
 0x1fa   : > { %4000 = vmatprep.subr.bf16.mxu0 %v754_v17  ;;  %1073 = vperm.xlu1 %4506, %v5108_v47   ;;  %6217 = vst [vmem:[#allocation18_spill] sm:$0xff] %v5278_v14 }
 0x1fb   : > { %1053 = vperm.xlu0 %4507, %v5126_v50  }
 0x1fd   : > { %4001 = vmatpush3.bf16.msra.mxu0 %v754_v17  ;;  %v5280_v17 = vpop.permute.xlu1 %809 }
 0x1fe   : > { %1065 = vperm.xlu1 %4506, %v5120_v49   ;;  %6218 = vst [vmem:[#allocation19_spill] sm:$0xff] %v5280_v17 }
 0x1ff   : > { %1045 = vperm.xlu0 %4507, %v5138_v52  }
 0x200   : > { %4003 = vmatmul.mubr.msk.bf16.vlgmr.msra.gmra.mxu0 %vm877_vm7, %v4521_v18 }
 0x201   : > { %4006 = vmatprep.mubr.msk.bf16.mxu0 %vm877_vm7, %v4522_v19 }
 0x202   : > { %1057 = vperm.xlu1 %4506, %v5132_v51  }
 0x206   : > { %1049 = vperm.xlu1 %4506, %v5144_v55  }
 0x208   : > { %4007 = vmatmul.mubr.msk.bf16.gmra.mxu0 %vm877_vm7, %v4523_v22  ;;  %v5282_v22 = vpop.permute.xlu0 %804 }
 0x209   : > { %4010 = vmatprep.mubr.msk.bf16.mxu0 %vm877_vm7, %v4524_v23  ;;  %6219 = vst [vmem:[#allocation20_spill] sm:$0xff] %v5282_v22 }
 0x20c   : > { %v5291_v1 = vpop.permute.xlu0 %794 }
 0x20d   : > { %6221 = vst [vmem:[#allocation22_spill] sm:$0xff] %v5291_v1 }
 0x210   : > { %4011 = vmatmul.mubr.msk.bf16.gmra.mxu0 %vm877_vm7, %v4525_v24 }
 0x211   : > { %4014 = vmatprep.mubr.msk.bf16.mxu0 %vm877_vm7, %v4526_v25  ;;  %v5285_v25 = vpop.permute.xlu1 %799 }
 0x212   : > { %6220 = vst [vmem:[#allocation21_spill] sm:$0xff] %v5285_v25 }
 0x215   : > { %v5294_v62 = vpop.permute.xlu1 %789 }
 0x216   : > { %6222 = vst [vmem:[#allocation23_spill] sm:$0xff] %v5294_v62 }
 0x218   : > { %4015 = vmatmul.mubr.msk.bf16.gmra.mxu0 %vm877_vm7, %v4527_v26 }
 0x2c0   : > { %v5264_v41 = vpop.f32.mrf.mxu0 }
 0x2c2   : > { %v5266_v44 = vpop.f32.mrf.mxu0 }
 0x2c4   : > { %v4005_v46 = vpop.f32.mrf.mxu0 }
 0x2c6   : > { %v5268_v53 = vpop.f32.mrf.mxu0 }
 0x2c8   : > { %v4008_v58 = vpop.f32.mrf.mxu0 }
 0x2ca   : > { %v957_v0 = vpop.f32.mrf.mxu0 }
 0x2cc   : > { %v4009_v5 = vpop.f32.mrf.mxu0 }
 0x2ce   : > { %v960_v7 = vpop.f32.mrf.mxu0 }
 0x2d0   : > { %v4012_v12 = vpop.f32.mrf.mxu0 }
 0x2d1   : > { %v982_v21 = vadd.f32 %v4012_v12, %v5280_v17 }
 0x2d2   : > { %v973_v13 = vpop.f32.mrf.mxu0 }
 0x2d4   : > { %v4013_v16 = vpop.f32.mrf.mxu0 }
 0x2d5   : > { %v985_v34 = vadd.f32 %v4013_v16, %v5278_v14  ;;  %v1014_v16 = vmax.f32 %v982_v21, 0.0 }
 0x2d6   : > { %v976_v18 = vpop.f32.mrf.mxu0 }
 0x2d7   : > { %v1015_v59 = vmax.f32 %v985_v34, 0.0 }
 0x2d8   : > { %v4016_v19 = vpop.f32.mrf.mxu0 }
 0x2d9   : > { %v998_v24 = vadd.f32 %v4016_v19, %v5272_v63  ;;  %v1041_v12 = vpack.c.bf16 %v1015_v59, %v1014_v16 }
 0x2da   : > { %v989_v23 = vpop.f32.mrf.mxu0 }
 0x2db   : > { %v990_v28 = vadd.f32 %v989_v23, %v5276_v9  ;;  %v1018_v37 = vmax.f32 %v998_v24, 0.0  ;;  %v977_v23 = vadd.f32 %v976_v18, %v5282_v22  ;;  %v974_v24 = vadd.f32 %v973_v13, %v5285_v25 }
 0x2dc   : > { %v4017_v26 = vpop.f32.mrf.mxu0 }
 0x2dd   : > { %v1001_v29 = vadd.f32 %v4017_v26, %v5270_v57  ;;  %v1016_v27 = vmax.f32 %v990_v28, 0.0  ;;  %v1013_v28 = vmax.f32 %v977_v23, 0.0  ;;  %v1012_v34 = vmax.f32 %v974_v24, 0.0 }
 0x2de   : > { %v992_v30 = vpop.f32.mrf.mxu0 }
 0x2df   : > { %v1019_v39 = vmax.f32 %v1001_v29, 0.0  ;;  %v993_v3 = vadd.f32 %v992_v30, %v5274_v6  ;;  %v5298_v29 = vpop.permute.xlu0 %784  ;;  %v969_v30 = vadd.f32 %v4009_v5, %v5291_v1  ;;  %v1040_v21 = vpack.c.bf16 %v1013_v28, %v1012_v34 }
 0x2e0   : > { %6223 = vst [vmem:[#allocation24_spill] sm:$0xff] %v5298_v29 }
 0x2e1   : > { %v1043_v19 = vpack.c.bf16 %v1019_v39, %v1018_v37  ;;  %v1017_v63 = vmax.f32 %v993_v3, 0.0  ;;  %v5301_v37 = vpop.permute.xlu1 %779  ;;  %v966_v3 = vadd.f32 %v4008_v58, %v5294_v62 }
 0x2e2   : > { %6224 = vst [vmem:[#allocation25_spill] sm:$0xff] %v5301_v37  ;;  %v958_v39 = vadd.f32 %v957_v0, %v5301_v37 }
 0x2e3   : > { %v1042_v26 = vpack.c.bf16 %v1017_v63, %v1016_v27  ;;  %4018 = vmatprep.subr.bf16.mxu1 %v1043_v19  ;;  %v1011_v27 = vmax.f32 %v969_v30, 0.0  ;;  %v961_v63 = vadd.f32 %v960_v7, %v5298_v29  ;;  %v5305_v18 = vpop.permute.xlu0 %774  ;;  %v1010_v13 = vmax.f32 %v966_v3, 0.0 }
 0x2e4   : > { %4019 = vmatpush3.bf16.msra.mxu1 %v1043_v19  ;;  %6225 = vst [vmem:[#allocation26_spill] sm:$0xff] %v5305_v18  ;;  %v953_v5 = vadd.f32 %v4005_v46, %v5305_v18 }
 0x2e5   : > { %4020 = vmatprep.subr.bf16.mxu1 %v1042_v26  ;;  %v5308_v59 = vpop.permute.xlu1 %769  ;;  %v1039_v19 = vpack.c.bf16 %v1011_v27, %v1010_v13  ;;  %v1009_v23 = vmax.f32 %v961_v63, 0.0  ;;  %v4530_v27 = vld [vmem:[%s6140_s7 + $0x10] sm:$0xff]   ;;  %v4532_v63 = vld [vmem:[%s6140_s7 + $0x20] sm:$0xff]  }
 0x2e6   : > { %6226 = vst [vmem:[#allocation27_spill] sm:$0xff] %v5308_v59  ;;  %v950_v58 = vadd.f32 %v5264_v41, %v5308_v59  ;;  %v1007_v16 = vmax.f32 %v953_v5, 0.0  ;;  %v4534_v13 = vld [vmem:[%s6140_s7 + $0x30] sm:$0xff]   ;;  %v4536_v5 = vld [vmem:[%s6140_s7 + $0x40] sm:$0xff]  }
 0x2e7   : > { %v5313_v7 = vpop.permute.xlu0 %764  ;;  %4066 = vmatprep.mubr.bf16.mxu0 %v4536_v5 }
 0x2e8   : > { %4021 = vmatpush3.bf16.msra.mxu1 %v1042_v26  ;;  %v1008_v26 = vmax.f32 %v958_v39, 0.0  ;;  %6227 = vst [vmem:[#allocation28_spill] sm:$0xff] %v5313_v7  ;;  %v945_v24 = vadd.f32 %v5268_v53, %v5313_v7  ;;  %v4529_v53 = vld [vmem:[%s6140_s7 + $0x8] sm:$0xff]   ;;  %v4535_v39 = vld [vmem:[%s6140_s7 + $0x38] sm:$0xff]  }
 0x2e9   : > { %4022 = vmatprep.subr.bf16.mxu1 %v1041_v12  ;;  %v5317_v30 = vpop.permute.xlu1 %759 }
 0x2ea   : > { %v1038_v0 = vpack.c.bf16 %v1009_v23, %v1008_v26  ;;  %6228 = vst [vmem:[#allocation29_spill] sm:$0xff] %v5317_v30  ;;  %v942_v46 = vadd.f32 %v5266_v44, %v5317_v30  ;;  %v1005_v3 = vmax.f32 %v945_v24, 0.0  ;;  %v4531_v44 = vld [vmem:[%s6140_s7 + $0x18] sm:$0xff]  }
 0x2ec   : > { %4023 = vmatpush3.bf16.msra.mxu1 %v1041_v12  ;;  %v1006_v12 = vmax.f32 %v950_v58, 0.0  ;;  %v1004_v41 = vmax.f32 %v942_v46, 0.0 }
 0x2ed   : > { %4024 = vmatprep.subr.bf16.mxu1 %v1040_v21  ;;  %v5361_v23 = vpop.permute.xlu1 %1101 }
 0x2ee   : > { %v1037_v28 = vpack.c.bf16 %v1007_v16, %v1006_v12  ;;  %v1036_v34 = vpack.c.bf16 %v1005_v3, %v1004_v41  ;;  %6229 = vst [vmem:[#allocation30_spill] sm:$0xff] %v5361_v23  ;;  %v5373_v41 = vpop.permute.xlu0 %1105 }
 0x2ef   : > { %6230 = vst [vmem:[#allocation31_spill] sm:$0xff] %v5373_v41 }
 0x2f0   : > { %4025 = vmatpush3.bf16.msra.mxu1 %v1040_v21  ;;  %v4533_v21 = vld [vmem:[%s6140_s7 + $0x28] sm:$0xff]  }
 0x2f1   : > { %4026 = vmatprep.subr.bf16.mxu1 %v1039_v19  ;;  %v5367_v24 = vpop.permute.xlu1 %1093 }
 0x2f4   : > { %4027 = vmatpush3.bf16.msra.mxu1 %v1039_v19  ;;  %v4827_v19 = vmov 2  }
 0x2f5   : > { %4028 = vmatprep.subr.bf16.mxu1 %v1038_v0  ;;  %4509 = vset.pattern.permute.xlu1 %v4827_v19 }
 0x2f6   : > { %4508 = vset.pattern.permute.xlu0 %v4827_v19  ;;  %1355 = vperm.xlu1 %4509, %v5048_v32  }
 0x2f7   : > { %1351 = vperm.xlu0 %4508, %v5043_v31  }
 0x2f8   : > { %4029 = vmatpush3.bf16.msra.mxu1 %v1038_v0 }
 0x2f9   : > { %4030 = vmatprep.subr.bf16.mxu1 %v1037_v28 }
 0x2fa   : > { %1343 = vperm.xlu1 %4509, %v5054_v33  }
 0x2fb   : > { %1347 = vperm.xlu0 %4508, %v5065_v35  }
 0x2fc   : > { %4031 = vmatpush3.bf16.msra.mxu1 %v1037_v28  ;;  %v5371_v28 = vpop.permute.xlu1 %1097 }
 0x2fd   : > { %4032 = vmatprep.subr.bf16.mxu1 %v1036_v34 }
 0x2fe   : > { %1335 = vperm.xlu1 %4509, %v5071_v36  }
 0x2ff   : > { %1339 = vperm.xlu0 %4508, %v5077_v38  }
 0x300   : > { %4033 = vmatpush3.bf16.msra.mxu1 %v1036_v34 }
 0x302   : > { %1327 = vperm.xlu1 %4509, %v5084_v40  }
 0x303   : > { %4035 = vmatmul.mubr.bf16.vlgmr.msra.gmra.mxu1 %v4529_v53  ;;  %1331 = vperm.xlu0 %4508, %v5094_v43  }
 0x304   : > { %4038 = vmatprep.mubr.bf16.mxu1 %v4530_v27  ;;  %v5375_v27 = vpop.permute.xlu1 %1089 }
 0x306   : > { %1319 = vperm.xlu1 %4509, %v5100_v45  }
 0x307   : > { %1323 = vperm.xlu0 %4508, %v5108_v47  }
 0x30a   : > { %1311 = vperm.xlu1 %4509, %v5114_v48  }
 0x30b   : > { %4039 = vmatmul.mubr.bf16.gmra.mxu1 %v4531_v44  ;;  %1315 = vperm.xlu0 %4508, %v5120_v49  }
 0x30c   : > { %4042 = vmatprep.mubr.bf16.mxu1 %v4532_v63  ;;  %v5377_v63 = vpop.permute.xlu0 %1085 }
 0x30e   : > { %1303 = vperm.xlu1 %4509, %v5126_v50  }
 0x30f   : > { %1307 = vperm.xlu0 %4508, %v5132_v51  }
 0x310   : > { %v5381_v19 = vpop.permute.xlu0 %1077 }
 0x312   : > { %1295 = vperm.xlu1 %4509, %v5138_v52  }
 0x313   : > { %4043 = vmatmul.mubr.bf16.gmra.mxu1 %v4533_v21  ;;  %1299 = vperm.xlu0 %4508, %v5144_v55  }
 0x314   : > { %4046 = vmatprep.mubr.bf16.mxu1 %v4534_v13  ;;  %v5390_v6 = vpop.permute.xlu0 %1069 }
 0x31b   : > { %4047 = vmatmul.mubr.bf16.gmra.mxu1 %v4535_v39  ;;  %v5379_v39 = vpop.permute.xlu1 %1081 }
 0x31f   : > { %v5386_v29 = vpop.permute.xlu1 %1073 }
 0x3c3   : > { %v5363_v58 = vpop.f32.mrf.mxu1 }
 0x3c5   : > { %v5365_v26 = vpop.f32.mrf.mxu1 }
 0x3c7   : > { %v4037_v16 = vpop.f32.mrf.mxu1 }
 0x3c9   : > { %v5369_v0 = vpop.f32.mrf.mxu1 }
 0x3cb   : > { %v4040_v12 = vpop.f32.mrf.mxu1 }
 0x3cd   : > { %v1206_v46 = vpop.f32.mrf.mxu1 }
 0x3cf   : > { %v4041_v3 = vpop.f32.mrf.mxu1 }
 0x3d1   : > { %v1209_v34 = vpop.f32.mrf.mxu1 }
 0x3d3   : > { %v4044_v53 = vpop.f32.mrf.mxu1 }
 0x3d4   : > { %v1231_v14 = vadd.f32 %v4044_v53, %v5377_v63 }
 0x3d5   : > { %v1222_v44 = vpop.f32.mrf.mxu1 }
 0x3d7   : > { %v4045_v21 = vpop.f32.mrf.mxu1 }
 0x3d8   : > { %v1234_v1 = vadd.f32 %v4045_v21, %v5375_v27  ;;  %v1263_v21 = vmax.f32 %v1231_v14, 0.0 }
 0x3d9   : > { %v1225_v13 = vpop.f32.mrf.mxu1 }
 0x3da   : > { %v1264_v9 = vmax.f32 %v1234_v1, 0.0  ;;  %v1215_v1 = vadd.f32 %v4040_v12, %v5390_v6 }
 0x3db   : > { %v4048_v5 = vpop.f32.mrf.mxu1 }
 0x3dc   : > { %v1247_v7 = vadd.f32 %v4048_v5, %v5361_v23  ;;  %v1291_v53 = vpack.c.bf16 %v1264_v9, %v1263_v21 }
 0x3dd   : > { %v1238_v30 = vpop.f32.mrf.mxu1 }
 0x3de   : > { %v1239_v18 = vadd.f32 %v1238_v30, %v5367_v24  ;;  %v1267_v25 = vmax.f32 %v1247_v7, 0.0  ;;  %v1226_v30 = vadd.f32 %v1225_v13, %v5379_v39  ;;  %v1218_v7 = vadd.f32 %v4041_v3, %v5386_v29 }
 0x3df   : > { %v4049_v59 = vpop.f32.mrf.mxu1 }
 0x3e0   : > { %v1250_v37 = vadd.f32 %v4049_v59, %v5373_v41  ;;  %v1265_v57 = vmax.f32 %v1239_v18, 0.0  ;;  %v5394_v41 = vpop.permute.xlu1 %1065  ;;  %v1262_v18 = vmax.f32 %v1226_v30, 0.0 }
 0x3e1   : > { %v1241_v62 = vpop.f32.mrf.mxu1 }
 0x3e2   : > { %v1268_v22 = vmax.f32 %v1250_v37, 0.0  ;;  %v1242_v17 = vadd.f32 %v1241_v62, %v5371_v28  ;;  %v1223_v37 = vadd.f32 %v1222_v44, %v5381_v19  ;;  %v5397_v62 = vpop.permute.xlu0 %1061  ;;  %v1259_v44 = vmax.f32 %v1215_v1, 0.0 }
 0x3e3   : > { %v1207_v13 = vadd.f32 %v1206_v46, %v5397_v62 }
 0x3e4   : > { %v1293_v5 = vpack.c.bf16 %v1268_v22, %v1267_v25  ;;  %v1266_v23 = vmax.f32 %v1242_v17, 0.0  ;;  %v1261_v17 = vmax.f32 %v1223_v37, 0.0  ;;  %v1260_v22 = vmax.f32 %v1218_v7, 0.0 }
 0x3e5   : > { %v1210_v25 = vadd.f32 %v1209_v34, %v5394_v41 }
 0x3e6   : > { %v1292_v59 = vpack.c.bf16 %v1266_v23, %v1265_v57  ;;  %4050 = vmatprep.subr.bf16.mxu0 %v1293_v5  ;;  %v5401_v57 = vpop.permute.xlu1 %1057  ;;  %v1290_v14 = vpack.c.bf16 %v1262_v18, %v1261_v17  ;;  %v5404_v23 = vpop.permute.xlu0 %1053  ;;  %v1289_v3 = vpack.c.bf16 %v1260_v22, %v1259_v44  ;;  %v4537_v17 = vld [vmem:[%s6140_s7 + $0x48] sm:$0xff]   ;;  %v6231_v22 = vmov 0.0   ;;  %v4542_v44 = vld [vmem:[%s6140_s7 + $0x70] sm:$0xff]  }
 0x3e7   : > { %4051 = vmatpush3.bf16.msra.mxu0 %v1293_v5  ;;  %v1202_v9 = vadd.f32 %v4037_v16, %v5401_v57  ;;  %v1258_v5 = vmax.f32 %v1210_v25, 0.0  ;;  %v1199_v30 = vadd.f32 %v5363_v58, %v5404_v23  ;;  %v4540_v25 = vld [vmem:[%s6140_s7 + $0x60] sm:$0xff]  }
 0x3e8   : > { %4052 = vmatprep.subr.bf16.mxu0 %v1292_v59 }
 0x3e9   : > { %v1256_v21 = vmax.f32 %v1202_v9, 0.0  ;;  %v1255_v7 = vmax.f32 %v1199_v30, 0.0  ;;  %v4544_v9 = vld [vmem:[%s6140_s7 + $0x80] sm:$0xff]  }
 0x3ea   : > { %v5408_v12 = vpop.permute.xlu1 %1049  ;;  %v5412_v34 = vpop.permute.xlu0 %1045  ;;  %4098 = vmatprep.mubr.bf16.mxu1 %v4544_v9 }
 0x3eb   : > { %4053 = vmatpush3.bf16.msra.mxu0 %v1292_v59  ;;  %v1257_v59 = vmax.f32 %v1207_v13, 0.0  ;;  %v1194_v37 = vadd.f32 %v5369_v0, %v5408_v12  ;;  %v1191_v16 = vadd.f32 %v5365_v26, %v5412_v34  ;;  %v4538_v0 = vld [vmem:[%s6140_s7 + $0x50] sm:$0xff]   ;;  %v4539_v26 = vld [vmem:[%s6140_s7 + $0x58] sm:$0xff]  }
 0x3ec   : > { %4054 = vmatprep.subr.bf16.mxu0 %v1291_v53  ;;  %v4543_v13 = vld [vmem:[%s6140_s7 + $0x78] sm:$0xff]  }
 0x3ed   : > { %v1288_v46 = vpack.c.bf16 %v1258_v5, %v1257_v59  ;;  %v1254_v18 = vmax.f32 %v1194_v37, 0.0  ;;  %v1253_v1 = vmax.f32 %v1191_v16, 0.0 }
 0x3ef   : > { %4055 = vmatpush3.bf16.msra.mxu0 %v1291_v53  ;;  %v1287_v53 = vpack.c.bf16 %v1256_v21, %v1255_v7  ;;  %v1286_v58 = vpack.c.bf16 %v1254_v18, %v1253_v1 }
 0x3f0   : > { %4056 = vmatprep.subr.bf16.mxu0 %v1290_v14 }
 0x3f3   : > { %4057 = vmatpush3.bf16.msra.mxu0 %v1290_v14  ;;  %v4541_v14 = vld [vmem:[%s6140_s7 + $0x68] sm:$0xff]  }
 0x3f4   : > { %4058 = vmatprep.subr.bf16.mxu0 %v1289_v3 }
 0x3f7   : > { %4059 = vmatpush3.bf16.msra.mxu0 %v1289_v3  ;;  %v4828_v3 = vmov 3  }
 0x3f8   : > { %4060 = vmatprep.subr.bf16.mxu0 %v1288_v46  ;;  %4510 = vset.pattern.permute.xlu1 %v4828_v3 }
 0x3f9   : > { %4511 = vset.pattern.permute.xlu0 %v4828_v3  ;;  %1601 = vperm.xlu1 %4510, %v5043_v31   ;;  %v6232_v31 = vmov 0  }
 0x3fa   : > { %1605 = vperm.xlu0 %4511, %v5048_v32  }
 0x3fb   : > { %4061 = vmatpush3.bf16.msra.mxu0 %v1288_v46 }
 0x3fc   : > { %4062 = vmatprep.subr.bf16.mxu0 %v1287_v53 }
 0x3fd   : > { %1593 = vperm.xlu1 %4510, %v5054_v33  }
 0x3fe   : > { %1585 = vperm.xlu0 %4511, %v5071_v36   ;;  %v5467_v36 = vpop.permute.xlu0 %1351 }
 0x3ff   : > { %4063 = vmatpush3.bf16.msra.mxu0 %v1287_v53 }
 0x400   : > { %4064 = vmatprep.subr.bf16.mxu0 %v1286_v58 }
 0x401   : > { %1597 = vperm.xlu1 %4510, %v5065_v35  }
 0x402   : > { %1577 = vperm.xlu0 %4511, %v5084_v40   ;;  %v5471_v40 = vpop.permute.xlu1 %1355 }
 0x403   : > { %4065 = vmatpush3.bf16.msra.mxu0 %v1286_v58  ;;  %6233 = vst [vmem:[#allocation32_spill] sm:$0xff] %v5471_v40 }
 0x404   : > { %4114 = vmatprep.subr.bf16.mxu0 %v6231_v22 }
 0x405   : > { %1589 = vperm.xlu1 %4510, %v5077_v38  }
 0x406   : > { %4067 = vmatmul.mubr.bf16.vlgmr.msra.gmra.mxu0 %v4537_v17  ;;  %1569 = vperm.xlu0 %4511, %v5100_v45  }
 0x407   : > { %4070 = vmatprep.mubr.bf16.mxu0 %v4538_v0 }
 0x409   : > { %1581 = vperm.xlu1 %4510, %v5094_v43  }
 0x40a   : > { %1561 = vperm.xlu0 %4511, %v5114_v48  }
 0x40d   : > { %1573 = vperm.xlu1 %4510, %v5108_v47   ;;  %v5473_v47 = vpop.permute.xlu0 %1347 }
 0x40e   : > { %4071 = vmatmul.mubr.bf16.gmra.mxu0 %v4539_v26  ;;  %1553 = vperm.xlu0 %4511, %v5126_v50   ;;  %6234 = vst [vmem:[#allocation33_spill] sm:$0xff] %v5473_v47 }
 0x40f   : > { %4074 = vmatprep.mubr.bf16.mxu0 %v4540_v25 }
 0x411   : > { %1565 = vperm.xlu1 %4510, %v5120_v49   ;;  %v5475_v49 = vpop.permute.xlu1 %1343 }
 0x412   : > { %1545 = vperm.xlu0 %4511, %v5138_v52   ;;  %v5477_v52 = vpop.permute.xlu0 %1339 }
 0x413   : > { %6235 = vst [vmem:[#allocation34_spill] sm:$0xff] %v5477_v52 }
 0x415   : > { %1557 = vperm.xlu1 %4510, %v5132_v51   ;;  %v5479_v5 = vpop.permute.xlu1 %1335 }
 0x416   : > { %4075 = vmatmul.mubr.bf16.gmra.mxu0 %v4541_v14  ;;  %4512 = vset.pattern.permute.xlu0 %v6232_v31  ;;  %6236 = vst [vmem:[#allocation35_spill] sm:$0xff] %v5479_v5  ;;  %v5481_v21 = vpop.permute.xlu0 %1331 }
 0x417   : > { %4078 = vmatprep.mubr.bf16.mxu0 %v4542_v44  ;;  %6237 = vst [vmem:[#allocation36_spill] sm:$0xff] %v5481_v21 }
 0x419   : > { %1549 = vperm.xlu1 %4510, %v5144_v55   ;;  %v5483_v46 = vpop.permute.xlu1 %1327 }
 0x41a   : > { %6238 = vst [vmem:[#allocation37_spill] sm:$0xff] %v5483_v46  ;;  %v5488_v58 = vpop.permute.xlu0 %1323 }
 0x41b   : > { %6239 = vst [vmem:[#allocation38_spill] sm:$0xff] %v5488_v58 }
 0x41d   : > { %4513 = vset.pattern.permute.xlu1 %v6232_v31  ;;  %v5492_v44 = vpop.permute.xlu1 %1319 }
 0x41e   : > { %4079 = vmatmul.mubr.bf16.gmra.mxu0 %v4543_v13  ;;  %6240 = vst [vmem:[#allocation39_spill] sm:$0xff] %v5492_v44 }
 0x41f   : > { %4130 = vmatprep.mubr.msk.bf16.mxu0 %vm4823_vm0, %v6231_v22 }
 0x4c6   : > { %v5462_v32 = vpop.f32.mrf.mxu0 }
 0x4c8   : > { %v5465_v33 = vpop.f32.mrf.mxu0 }
 0x4ca   : > { %v4069_v35 = vpop.f32.mrf.mxu0 }
 0x4cc   : > { %v5469_v38 = vpop.f32.mrf.mxu0 }
 0x4ce   : > { %v4072_v43 = vpop.f32.mrf.mxu0 }
 0x4d0   : > { %v1456_v45 = vpop.f32.mrf.mxu0 }
 0x4d2   : > { %v4073_v48 = vpop.f32.mrf.mxu0 }
 0x4d4   : > { %v1459_v50 = vpop.f32.mrf.mxu0 }
 0x4d6   : > { %v4076_v51 = vpop.f32.mrf.mxu0 }
 0x4d7   : > { %v1481_v13 = vadd.f32 %v4076_v51, %v5479_v5 }
 0x4d8   : > { %v1472_v55 = vpop.f32.mrf.mxu0 }
 0x4da   : > { %v4077_v30 = vpop.f32.mrf.mxu0 }
 0x4db   : > { %v1484_v0 = vadd.f32 %v4077_v30, %v5477_v52  ;;  %v1513_v30 = vmax.f32 %v1481_v13, 0.0 }
 0x4dc   : > { %v1475_v59 = vpop.f32.mrf.mxu0 }
 0x4de   : > { %v4080_v37 = vpop.f32.mrf.mxu0 }
 0x4df   : > { %v1497_v16 = vadd.f32 %v4080_v37, %v5467_v36  ;;  %v1514_v37 = vmax.f32 %v1484_v0, 0.0  ;;  %v1465_v0 = vadd.f32 %v4072_v43, %v5492_v44 }
 0x4e0   : > { %v1488_v7 = vpop.f32.mrf.mxu0 }
 0x4e1   : > { %v1489_v18 = vadd.f32 %v1488_v7, %v5475_v49  ;;  %v1517_v26 = vmax.f32 %v1497_v16, 0.0  ;;  %v1476_v7 = vadd.f32 %v1475_v59, %v5481_v21  ;;  %v1473_v16 = vadd.f32 %v1472_v55, %v5483_v46 }
 0x4e2   : > { %v4081_v53 = vpop.f32.mrf.mxu0  ;;  %v1541_v51 = vpack.c.bf16 %v1514_v37, %v1513_v30  ;;  %v1509_v55 = vmax.f32 %v1465_v0, 0.0 }
 0x4e3   : > { %v1500_v1 = vadd.f32 %v4081_v53, %v5471_v40  ;;  %v1515_v9 = vmax.f32 %v1489_v18, 0.0  ;;  %v5496_v40 = vpop.permute.xlu0 %1315  ;;  %v1512_v18 = vmax.f32 %v1476_v7, 0.0 }
 0x4e4   : > { %v1491_v17 = vpop.f32.mrf.mxu0  ;;  %6241 = vst [vmem:[#allocation40_spill] sm:$0xff] %v5496_v40 }
 0x4e5   : > { %v1518_v25 = vmax.f32 %v1500_v1, 0.0  ;;  %v1492_v14 = vadd.f32 %v1491_v17, %v5473_v47  ;;  %v5499_v1 = vpop.permute.xlu1 %1311  ;;  %v1468_v17 = vadd.f32 %v4073_v48, %v5488_v58 }
 0x4e6   : > { %6242 = vst [vmem:[#allocation41_spill] sm:$0xff] %v5499_v1 }
 0x4e7   : > { %v1543_v3 = vpack.c.bf16 %v1518_v25, %v1517_v26  ;;  %v1516_v31 = vmax.f32 %v1492_v14, 0.0  ;;  %v1511_v26 = vmax.f32 %v1473_v16, 0.0  ;;  %v5503_v59 = vpop.permute.xlu0 %1307  ;;  %v1510_v25 = vmax.f32 %v1468_v17, 0.0 }
 0x4e8   : > { %6243 = vst [vmem:[#allocation42_spill] sm:$0xff] %v5503_v59  ;;  %v1460_v14 = vadd.f32 %v1459_v50, %v5496_v40  ;;  %v1452_v48 = vadd.f32 %v4069_v35, %v5503_v59 }
 0x4e9   : > { %v1542_v53 = vpack.c.bf16 %v1516_v31, %v1515_v9  ;;  %4082 = vmatprep.subr.bf16.mxu1 %v1543_v3  ;;  %v1540_v13 = vpack.c.bf16 %v1512_v18, %v1511_v26  ;;  %v5506_v9 = vpop.permute.xlu1 %1303  ;;  %v1539_v31 = vpack.c.bf16 %v1510_v25, %v1509_v55  ;;  %v4545_v26 = vld [vmem:[%s6140_s7 + $0x88] sm:$0xff]   ;;  %v4548_v25 = vld [vmem:[%s6140_s7 + $0xa0] sm:$0xff]   ;;  %v4551_v55 = vld [vmem:[%s6140_s7 + $0xb8] sm:$0xff]  }
 0x4ea   : > { %4083 = vmatpush3.bf16.msra.mxu1 %v1543_v3  ;;  %6244 = vst [vmem:[#allocation43_spill] sm:$0xff] %v5506_v9  ;;  %v1457_v3 = vadd.f32 %v1456_v45, %v5499_v1  ;;  %v1508_v37 = vmax.f32 %v1460_v14, 0.0  ;;  %v1449_v7 = vadd.f32 %v5462_v32, %v5506_v9  ;;  %v1506_v30 = vmax.f32 %v1452_v48, 0.0  ;;  %v4549_v14 = vld [vmem:[%s6140_s7 + $0xa8] sm:$0xff]  }
 0x4eb   : > { %4084 = vmatprep.subr.bf16.mxu1 %v1542_v53  ;;  %v5510_v43 = vpop.permute.xlu0 %1299 }
 0x4ec   : > { %6245 = vst [vmem:[#allocation44_spill] sm:$0xff] %v5510_v43  ;;  %v1444_v16 = vadd.f32 %v5469_v38, %v5510_v43  ;;  %v1505_v17 = vmax.f32 %v1449_v7, 0.0  ;;  %v4546_v38 = vld [vmem:[%s6140_s7 + $0x90] sm:$0xff]  }
 0x4ed   : > { %v5514_v50 = vpop.permute.xlu1 %1295 }
 0x4ee   : > { %4085 = vmatpush3.bf16.msra.mxu1 %v1542_v53  ;;  %v1507_v53 = vmax.f32 %v1457_v3, 0.0  ;;  %6246 = vst [vmem:[#allocation45_spill] sm:$0xff] %v5514_v50  ;;  %v1441_v35 = vadd.f32 %v5465_v33, %v5514_v50  ;;  %v1504_v18 = vmax.f32 %v1444_v16, 0.0  ;;  %v4547_v33 = vld [vmem:[%s6140_s7 + $0x98] sm:$0xff]   ;;  %v1770_v3 = vld [vmem:[#allocation2] sm:$0x1] }
 0x4ef   : > { %4086 = vmatprep.subr.bf16.mxu1 %v1541_v51  ;;  %1781 = vperm.xlu0 %4512, %v1770_v3  }
 0x4f0   : > { %v1538_v45 = vpack.c.bf16 %v1508_v37, %v1507_v53  ;;  %v1503_v0 = vmax.f32 %v1441_v35, 0.0 }
 0x4f2   : > { %4087 = vmatpush3.bf16.msra.mxu1 %v1541_v51  ;;  %v1537_v51 = vpack.c.bf16 %v1506_v30, %v1505_v17  ;;  %v1536_v32 = vpack.c.bf16 %v1504_v18, %v1503_v0  ;;  %v5556_v18 = vpop.permute.xlu0 %1605 }
 0x4f3   : > { %4088 = vmatprep.subr.bf16.mxu1 %v1540_v13 }
 0x4f6   : > { %4089 = vmatpush3.bf16.msra.mxu1 %v1540_v13  ;;  %v4550_v13 = vld [vmem:[%s6140_s7 + $0xb0] sm:$0xff]  }
 0x4f7   : > { %4090 = vmatprep.subr.bf16.mxu1 %v1539_v31 }
 0x4fa   : > { %4091 = vmatpush3.bf16.msra.mxu1 %v1539_v31  ;;  %v5546_v31 = vpop.permute.xlu1 %1601 }
 0x4fb   : > { %4092 = vmatprep.subr.bf16.mxu1 %v1538_v45  ;;  %6247 = vst [vmem:[#allocation46_spill] sm:$0xff] %v5546_v31 }
 0x4fe   : > { %4093 = vmatpush3.bf16.msra.mxu1 %v1538_v45  ;;  %v5552_v30 = vpop.permute.xlu1 %1593 }
 0x4ff   : > { %4094 = vmatprep.subr.bf16.mxu1 %v1537_v51 }
 0x502   : > { %4095 = vmatpush3.bf16.msra.mxu1 %v1537_v51  ;;  %v5554_v35 = vpop.permute.xlu1 %1597 }
 0x503   : > { %4096 = vmatprep.subr.bf16.mxu1 %v1536_v32  ;;  %6248 = vst [vmem:[#allocation47_spill] sm:$0xff] %v5554_v35 }
 0x506   : > { %4097 = vmatpush3.bf16.msra.mxu1 %v1536_v32 }
 0x507   : > { %4148 = vmatprep.subr.bf16.mxu1 %v6231_v22 }
 0x509   : > { %4099 = vmatmul.mubr.bf16.vlgmr.msra.gmra.mxu1 %v4545_v26  ;;  %v5558_v26 = vpop.permute.xlu1 %1589 }
 0x50a   : > { %4102 = vmatprep.mubr.bf16.mxu1 %v4546_v38 }
 0x511   : > { %4103 = vmatmul.mubr.bf16.gmra.mxu1 %v4547_v33  ;;  %v5560_v33 = vpop.permute.xlu0 %1585 }
 0x512   : > { %4106 = vmatprep.mubr.bf16.mxu1 %v4548_v25 }
 0x515   : > { %v5565_v50 = vpop.permute.xlu0 %1577 }
 0x519   : > { %4107 = vmatmul.mubr.bf16.gmra.mxu1 %v4549_v14  ;;  %v5573_v52 = vpop.permute.xlu0 %1569 }
 0x51a   : > { %4110 = vmatprep.mubr.bf16.mxu1 %v4550_v13  ;;  %v5562_v13 = vpop.permute.xlu1 %1581 }
 0x51e   : > { %v5570_v46 = vpop.permute.xlu1 %1573 }
 0x521   : > { %4111 = vmatmul.mubr.bf16.gmra.mxu1 %v4551_v55 }
 0x522   : > { %4152 = vmatprep.mubr.msk.bf16.mxu1 %vm4823_vm0, %v6231_v22 }
 0x5c9   : > { %v5544_v48 = vpop.f32.mrf.mxu1 }
 0x5cb   : > { %v5548_v37 = vpop.f32.mrf.mxu1 }
 0x5cd   : > { %v4101_v7 = vpop.f32.mrf.mxu1 }
 0x5cf   : > { %v5550_v53 = vpop.f32.mrf.mxu1 }
 0x5d1   : > { %v4104_v16 = vpop.f32.mrf.mxu1 }
 0x5d3   : > { %v1706_v45 = vpop.f32.mrf.mxu1 }
 0x5d5   : > { %v4105_v17 = vpop.f32.mrf.mxu1 }
 0x5d7   : > { %v1709_v51 = vpop.f32.mrf.mxu1 }
 0x5d9   : > { %v4108_v0 = vpop.f32.mrf.mxu1 }
 0x5db   : > { %v1722_v32 = vpop.f32.mrf.mxu1 }
 0x5dd   : > { %v4109_v38 = vpop.f32.mrf.mxu1 }
 0x5de   : > { %v1734_v21 = vadd.f32 %v4109_v38, %v5558_v26 }
 0x5df   : > { %v1725_v25 = vpop.f32.mrf.mxu1 }
 0x5e1   : > { %v4112_v14 = vpop.f32.mrf.mxu1 }
 0x5e2   : > { %v1747_v3 = vadd.f32 %v4112_v14, %v5546_v31  ;;  %v1731_v14 = vadd.f32 %v4108_v0, %v5560_v33 }
 0x5e3   : > { %v1738_v55 = vpop.f32.mrf.mxu1 }
 0x5e4   : > { %v1767_v1 = vmax.f32 %v1747_v3, 0.0  ;;  %v1739_v40 = vadd.f32 %v1738_v55, %v5552_v30  ;;  %v1726_v55 = vadd.f32 %v1725_v25, %v5562_v13  ;;  %v5578_v3 = vpop.permute.xlu1 %1565 }
 0x5e5   : > { %v4113_v43 = vpop.f32.mrf.mxu1 }
 0x5e6   : > { %v1750_v9 = vadd.f32 %v4113_v43, %v5556_v18  ;;  %v1765_v31 = vmax.f32 %v1739_v40, 0.0  ;;  %v1764_v43 = vmax.f32 %v1734_v21, 0.0 }
 0x5e7   : > { %v1741_v59 = vpop.f32.mrf.mxu1 }
 0x5e8   : > { %v1768_v44 = vmax.f32 %v1750_v9, 0.0  ;;  %v1742_v58 = vadd.f32 %v1741_v59, %v5554_v35  ;;  %v1763_v59 = vmax.f32 %v1731_v14, 0.0  ;;  %v1723_v35 = vadd.f32 %v1722_v32, %v5565_v50  ;;  %v5586_v0 = vpop.permute.xlu1 %1557 }
 0x5ea   : > { %v1778_v5 = vpack.c.bf16 %v1768_v44, %v1767_v1  ;;  %v1766_v47 = vmax.f32 %v1742_v58, 0.0  ;;  %v5581_v44 = vpop.permute.xlu0 %1561  ;;  %v1718_v58 = vadd.f32 %v4105_v17, %v5570_v46  ;;  %v1776_v40 = vpack.c.bf16 %v1764_v43, %v1763_v59 }
 0x5eb   : > { %v1715_v1 = vadd.f32 %v4104_v16, %v5573_v52  ;;  %v1761_v21 = vmax.f32 %v1723_v35, 0.0  ;;  %v1707_v14 = vadd.f32 %v1706_v45, %v5581_v44  ;;  %v1702_v16 = vadd.f32 %v4101_v7, %v5586_v0 }
 0x5ec   : > { %4115 = vmatpush3.bf16.msra.mxu0 %v1778_v5  ;;  %v1777_v9 = vpack.c.bf16 %v1766_v47, %v1765_v31  ;;  %v1762_v5 = vmax.f32 %v1726_v55, 0.0  ;;  %v1760_v47 = vmax.f32 %v1718_v58, 0.0  ;;  %v1710_v31 = vadd.f32 %v1709_v51, %v5578_v3  ;;  %v5595_v43 = vpop.permute.xlu1 %1549 }
 0x5ed   : > { %4116 = vmatprep.subr.bf16.mxu0 %v6231_v22  ;;  %v1759_v25 = vmax.f32 %v1715_v1, 0.0  ;;  %v1756_v59 = vmax.f32 %v1702_v16, 0.0  ;;  %v1694_v45 = vadd.f32 %v5550_v53, %v5595_v43  ;;  %v1769_v53 = vld [vmem:[%s6142_s9] sm:$0x1] }
 0x5ee   : > { %v1775_v32 = vpack.c.bf16 %v1762_v5, %v1761_v21  ;;  %v5590_v38 = vpop.permute.xlu0 %1553  ;;  %v1758_v35 = vmax.f32 %v1710_v31, 0.0  ;;  %v5635_v31 = vsub.s32 0, %v5017_v20 }
 0x5ef   : > { %v1774_v17 = vpack.c.bf16 %v1760_v47, %v1759_v25  ;;  %v1699_v55 = vadd.f32 %v5544_v48, %v5590_v38  ;;  %v1754_v48 = vmax.f32 %v1694_v45, 0.0  ;;  %v4567_v47 = vld [vmem:[%s6210_s2 + $0x8] sm:$0xff]  }
 0x5f0   : > { %4117 = vmatpush3.bf16.msra.mxu0 %v1777_v9  ;;  %v1757_v9 = vmax.f32 %v1707_v14, 0.0  ;;  %6250 = vst [vmem:[#allocation49_spill] sm:$0xff] %v5635_v31 }
 0x5f1   : > { %4118 = vmatprep.subr.bf16.mxu0 %v6231_v22 }
 0x5f2   : > { %v5599_v51 = vpop.permute.xlu0 %1545  ;;  %v1773_v58 = vpack.c.bf16 %v1758_v35, %v1757_v9 }
 0x5f3   : > { %6249 = vst [vmem:[#allocation48_spill] sm:$0xff] %v5599_v51  ;;  %v1691_v7 = vadd.f32 %v5548_v37, %v5599_v51  ;;  %v4566_v37 = vld [vmem:[%s6210_s2] sm:$0xff]  }
 0x5f4   : > { %4119 = vmatpush3.bf16.msra.mxu0 %v1776_v40  ;;  %v1755_v40 = vmax.f32 %v1699_v55, 0.0 }
 0x5f5   : > { %4120 = vmatprep.subr.bf16.mxu0 %v6231_v22  ;;  %v1753_v1 = vmax.f32 %v1691_v7, 0.0 }
 0x5f6   : > { %v1772_v5 = vpack.c.bf16 %v1756_v59, %v1755_v40 }
 0x5f7   : > { %v1771_v21 = vpack.c.bf16 %v1754_v48, %v1753_v1 }
 0x5f8   : > { %4121 = vmatpush3.bf16.msra.mxu0 %v1775_v32  ;;  %v1782_v32 = vpop.permute.xlu0 %1781 }
 0x5f9   : > { %4122 = vmatprep.subr.bf16.mxu0 %v6231_v22  ;;  %v1787_v25 = vrot.slane %v1782_v32, %v5635_v31 }
 0x5fc   : > { %4123 = vmatpush3.bf16.msra.mxu0 %v1774_v17 }
 0x5fd   : > { %4124 = vmatprep.subr.bf16.mxu0 %v6231_v22 }
 0x600   : > { %4125 = vmatpush3.bf16.msra.mxu0 %v1773_v58 }
 0x601   : > { %4126 = vmatprep.subr.bf16.mxu0 %v6231_v22 }
 0x604   : > { %4127 = vmatpush3.bf16.msra.mxu0 %v1772_v5 }
 0x605   : > { %4128 = vmatprep.subr.bf16.mxu0 %v6231_v22 }
 0x608   : > { %4129 = vmatpush3.bf16.msra.mxu0 %v1771_v21 }
 0x609   : > { %4134 = vmatprep.subr.bf16.mxu0 %v6231_v22 }
 0x60b   : > { %4131 = vmatmul.mubr.bf16.vlgmr.msra.gmra.mxu0 %v1769_v53 }
 0x60c   : > { %4135 = vmatpush3.bf16.msra.mxu0 %v5158_v61  ;;  %4136 = vmatprep.mubr.msk.bf16.mxu0 %vm4823_vm0, %v6231_v22  ;;  %v4568_v61 = vld [vmem:[%s6210_s2 + $0x10] ss:$0 sps:$4 sm:$0x33]  }
 0x60d   : > { %4164 = vmatprep.subr.bf16.mxu0 %v6231_v22 }
 0x613   : > { %4137 = vmatmul.mubr.msk.bf16.vlgmr.msra.gmra.mxu0 %vm546_vm3, %v4566_v37 }
 0x614   : > { %4140 = vmatprep.mubr.msk.bf16.mxu0 %vm4823_vm0, %v6231_v22 }
 0x61b   : > { %4141 = vmatmul.mubr.msk.bf16.gmra.mxu0 %vm546_vm3, %v4567_v47 }
 0x61c   : > { %4144 = vmatprep.mubr.msk.bf16.mxu0 %vm4823_vm0, %v6231_v22 }
 0x623   : > { %4145 = vmatmul.mubr.msk.bf16.gmra.mxu0 %vm546_vm3, %v4568_v61 }
 0x624   : > { %4168 = vmatprep.mubr.msk.bf16.mxu0 %vm4823_vm0, %v6231_v22 }
 0x6cb   : > { %v1822_v14 = vpop.f32.mrf.mxu0 }
 0x6cc   : > { %v1823_v16 = vadd.f32 %v1822_v14, %v1787_v25 }
 0x6cd   : > { %v4132_v17 = vpop.f32.mrf.mxu0 }
 0x6ce   : > { %v3696_v35 = vmul.f32 -1.442695, %v1823_v16 }
 0x6cf   : > { %v1825_v55 = vpop.f32.mrf.mxu0 }
 0x6d0   : > { %4556 = vpow2.f32 %v3696_v35  ;;  %v4570_v55 = vld [vmem:[%s6137_s4 + $0x8] sm:$0xff]  }
 0x6d1   : > { %v4133_v9 = vpop.f32.mrf.mxu0 }
 0x6d2   : > { %v4571_v9 = vld [vmem:[%s6137_s4 + $0x10] ss:$0 sps:$4 sm:$0x11]  }
 0x6d3   : > { %v1881_v59 = vpop.f32.mrf.mxu0 }
 0x6d4   : > { %v1882_v61 = vadd.f32 %v1881_v59, %v5162_v4  ;;  %v1967_v59 = vld [vmem:[%s6145_s12] sm:$0x7] }
 0x6d5   : > { %v4138_v45 = vpop.f32.mrf.mxu0  ;;  %1973 = vperm.xlu1 %4513, %v1967_v59  }
 0x6d6   : > { %v1903_v17 = vmax.f32 %v1882_v61, 0.0 }
 0x6d7   : > { %v1884_v58 = vpop.f32.mrf.mxu0 }
 0x6d8   : > { %v1885_v53 = vadd.f32 %v1884_v58, %v5167_v10  ;;  %v4569_v10 = vld [vmem:[%s6137_s4] sm:$0xff]  }
 0x6d9   : > { %v4139_v40 = vpop.f32.mrf.mxu0  ;;  %v506_v58 = vld [vmem:[%s6206_s3 + $0x20] sm:$0x7] }
 0x6da   : > { %v1904_v14 = vmax.f32 %v1885_v53, 0.0  ;;  %530 = vperm.xlu1 %4513, %v506_v58  }
 0x6db   : > { %v1889_v7 = vpop.f32.mrf.mxu0 }
 0x6dc   : > { %v1890_v20 = vadd.f32 %v1889_v7, %v5160_v2  ;;  %v1907_v35 = vpack.c.bf16 %v1904_v14, %v1903_v17 }
 0x6dd   : > { %v4557_v5 = vpop.eup %4556  ;;  %v4142_v48 = vpop.f32.mrf.mxu0 }
 0x6de   : > { %v1831_v1 = vadd.f32 1.0, %v4557_v5  ;;  %v1905_v32 = vmax.f32 %v1890_v20, 0.0 }
 0x6df   : > { %v1892_v21 = vpop.f32.mrf.mxu0 }
 0x6e0   : > { %4558 = vrcp.f32 %v1831_v1  ;;  %v1893_v37 = vadd.f32 %v1892_v21, %v5164_v8 }
 0x6e1   : > { %v4143_v47 = vpop.f32.mrf.mxu0 }
 0x6e2   : > { %v1906_v25 = vmax.f32 %v1893_v37, 0.0 }
 0x6e3   : > { %v1897_v45 = vpop.f32.mrf.mxu0 }
 0x6e4   : > { %v1908_v16 = vpack.c.bf16 %v1906_v25, %v1905_v32 }
 0x6e5   : > { %v4146_v40 = vpop.f32.mrf.mxu0 }
 0x6e6   : > { %4149 = vmatpush3.bf16.msra.mxu1 %v1908_v16 }
 0x6e7   : > { %4150 = vmatprep.subr.bf16.mxu1 %v6231_v22  ;;  %v1900_v7 = vpop.f32.mrf.mxu0 }
 0x6e9   : > { %v4147_v5 = vpop.f32.mrf.mxu0 }
 0x6ea   : > { %4151 = vmatpush3.bf16.msra.mxu1 %v1907_v35 }
 0x6ed   : > { %v4559_v2 = vpop.eup %4558  ;;  %4153 = vmatmul.mubr.msk.bf16.vlgmr.msra.gmra.mxu1 %vm672_vm6, %v4569_v10 }
 0x6ee   : > { %v1834_v8 = vmul.f32 5.0, %v4559_v2  ;;  %4156 = vmatprep.mubr.msk.bf16.mxu1 %vm4823_vm0, %v6231_v22 }
 0x6f0   : > { %v5649_v4 = vadd.f32 1.0, %v1834_v8  }
 0x6f5   : > { %4157 = vmatmul.mubr.msk.bf16.gmra.mxu1 %vm672_vm6, %v4570_v55 }
 0x6f6   : > { %4160 = vmatprep.mubr.msk.bf16.mxu1 %vm4823_vm0, %v6231_v22 }
 0x6fd   : > { %4161 = vmatmul.mubr.msk.bf16.gmra.mxu1 %vm672_vm6, %v4571_v9 }
 0x7ad   : > { %v1943_v48 = vpop.f32.mrf.mxu1 }
 0x7ae   : > { %v5668_v1 = vadd.f32 %v1943_v48, %v5214_v15  }
 0x7af   : > { %v4154_v20 = vpop.f32.mrf.mxu1 }
 0x7b0   : > { %v1965_v21 = vmax.f32 %v5668_v1, 0.0 }
 0x7b1   : > { %v1946_v53 = vpop.f32.mrf.mxu1 }
 0x7b2   : > { %v2048_v37 = vsub.f32 0.0, %v1965_v21  ;;  %v1947_v16 = vadd.f32 %v1946_v53, %v5211_v11  }
 0x7b3   : > { %v4155_v47 = vpop.f32.mrf.mxu1 }
 0x7b4   : > { %v2049_v61 = vmul.f32 0.12857144, %v2048_v37  ;;  %v1968_v10 = vpack.c.bf16 %v1947_v16, %v5668_v1 }
 0x7b5   : > { %v1951_v32 = vpop.f32.mrf.mxu1 }
 0x7b6   : > { %v2050_v25 = vmul.f32 1.442695, %v2049_v61  ;;  %v1952_v35 = vadd.f32 %v1951_v32, %v5202_v60   ;;  %v1980_v40 = vshll.u32 %v1968_v10, 16  ;;  %v1978_v61 = vshrl.u32 %v1968_v10, 16 }
 0x7b7   : > { %v4158_v14 = vpop.f32.mrf.mxu1 }
 0x7b8   : > { %4560 = vpow2.f32 %v2050_v25  ;;  %v1982_v53 = vrot.slane %v1980_v40, 1 }
 0x7b9   : > { %v1954_v17 = vpop.f32.mrf.mxu1 }
 0x7ba   : > { %v1955_v2 = vadd.f32 %v1954_v17, %v5199_v54   ;;  %v1966_v17 = vld [vmem:[%s6144_s11] sm:$0x3] }
 0x7bb   : > { %v4159_v15 = vpop.f32.mrf.mxu1 }
 0x7bc   : > { %v1969_v8 = vpack.c.bf16 %v1955_v2, %v1952_v35  ;;  %v1974_v15 = vpop.permute.xlu1 %1973 }
 0x7bd   : > { %v1959_v55 = vpop.f32.mrf.mxu1 }
 0x7be   : > { %v1985_v9 = vshll.u32 %v1969_v8, 16  ;;  %v1960_v59 = vadd.f32 %v1959_v55, %v5197_v42   ;;  %v1989_v20 = vshrl.u32 %v1969_v8, 16  ;;  %v1983_v42 = vor.u32 %v1982_v53, %v1978_v61 }
 0x7bf   : > { %v4162_v58 = vpop.f32.mrf.mxu1 }
 0x7c0   : > { %v1987_v7 = vrot.slane %v1985_v9, 1  ;;  %v1970_v5 = vpack.c.bf16 %v1960_v59, %v1960_v59  ;;  %v531_v8 = vpop.permute.xlu1 %530 }
 0x7c1   : > { %v1962_v48 = vpop.f32.mrf.mxu1  ;;  %v1898_v10 = vadd.f32 %v1897_v45, %v531_v8   ;;  %v6251_v45 = vld [vmem:[#allocation12_spill] sm:$0xff] }
 0x7c2   : > { %v1993_v11 = vshll.u32 %v1970_v5, 16  ;;  %v1991_v60 = vor.u32 %v1989_v20, %v1987_v7  ;;  %v1988_v14 = vsel %vm1976_vm8, %v1983_v42, %v1987_v7 }
 0x7c3   : > { %v4163_v21 = vpop.f32.mrf.mxu1 }
 0x7c4   : > { %v1995_v37 = vrot.slane %v1993_v11, 1 }
 0x7c5   : > { %v4561_v54 = vpop.eup %4560 }
 0x7c6   : > { %v2052_v47 = vsub.f32 1.0, %v4561_v54  ;;  %v1996_v32 = vsel %vm1976_vm8, %v1991_v60, %v1995_v37 }
 0x7c7   : > { %4165 = vmatpush3.bf16.msra.mxu0 %v1996_v32 }
 0x7c8   : > { %v2059_v25 = vsub.f32 1.0, %v2052_v47   ;;  %4166 = vmatprep.subr.bf16.mxu0 %v6231_v22  ;;  %v2056_v20 = vrot.slane %v2052_v47, %v5635_v31 }
 0x7cb   : > { %4167 = vmatpush3.bf16.msra.mxu0 %v1988_v14 }
 0x7ce   : > { %4169 = vmatmul.mubr.msk.bf16.vlgmr.msra.gmra.mxu0 %vm672_vm6, %v1966_v17 }
 0x88e   : > { %v2036_v55 = vpop.f32.mrf.mxu0 }
 0x88f   : > { %v2037_v9 = vadd.f32 %v2036_v55, %v1974_v15 }
 0x890   : > { %v4170_v58 = vpop.f32.mrf.mxu0 }
 0x891   : > { %v3704_v40 = vmul.f32 -1.442695, %v2037_v9 }
 0x892   : > { %v2039_v5 = vpop.f32.mrf.mxu0 }
 0x893   : > { %4562 = vpow2.f32 %v3704_v40 }
 0x894   : > { %v4171_v22 = vpop.f32.mrf.mxu0 }
 0x8a0   : > { %v4563_v48 = vpop.eup %4562 }
 0x8a1   : > { %v2045_v7 = vadd.f32 1.0, %v4563_v48 }
 0x8a3   : > { %4564 = vrcp.f32 %v2045_v7 }
 0x8b0   : > { %v4565_v11 = vpop.eup %4564 }
 0x8b1   : > { %v2057_v21 = vmul.f32 %v4565_v11, %v2056_v20  }
 0x8b2 LB: >> { %6252 = vst [vmem:[#allocation50_spill] sm:$0xff] %v4775_v21  ;;  %6253 = vst [vmem:[#allocation51_spill] sm:$0xff] %v4779_v25  ;;  %v4574_v53 = vld [vmem:[%s6139_s6] sm:$0xff]   ;;  %v2139_v60 = vpack.c.bf16 %v4787_v59, %v4787_v59  ;;  %v2138_v47 = vpack.c.bf16 %v4791_v2, %v4795_v35  ;;  %v2137_v61 = vpack.c.bf16 %v4799_v16, %v4803_v1  ;;  %v4575_v32 = vld [vmem:[%s6139_s6 + $0x8] sm:$0xff]   ;;  %vm4830_vm9 = vmmov 0   ;;  %s6291_s3 = sld [smem:[#allocation59_spill]]  ;;  %s4819_s0 = sphi %s5711_s0, %s2065_s0   ;;  %v4815_v45 = vphi %v6251_v45, %v6006_v45   ;;  %v4811_v56 = vphi %v5148_v56, %v6002_v56   ;;  %v4807_v4 = vphi %v5649_v4, %v5965_v4   ;;  %v4803_v1 = vphi %v5668_v1, %v6049_v1   ;;  %v4799_v16 = vphi %v1947_v16, %v3366_v16   ;;  %v4795_v35 = vphi %v1952_v35, %v3371_v35   ;;  %v4791_v2 = vphi %v1955_v2, %v3374_v2   ;;  %v4787_v59 = vphi %v1960_v59, %v3379_v59   ;;  %v4783_v10 = vphi %v1898_v10, %v6030_v10   ;;  %v4779_v25 = vphi %v2059_v25, %v3479_v25   ;;  %v4775_v21 = vphi %v2057_v21, %v6305_v21  }
 0x8b3   : >> { %6254 = vst [vmem:[#allocation52_spill] sm:$0xff] %v4783_v10  ;;  %6255 = vst [vmem:[#allocation53_spill] sm:$0xff] %v4807_v4  ;;  %4178 = vmatprep.mubr.msk.bf16.mxu0 %vm877_vm7, %v4574_v53  ;;  %v6258_v37 = vld [vmem:[#allocation13_spill] sm:$0xff]  ;;  %v4576_v42 = vld [vmem:[%s6139_s6 + $0x10] sm:$0xff]   ;;  %s3141_s23 = sld [smem:[#allocation3 + %s4819_s0]]  ;;  %s2065_s0 = sadd.s32 1, %s4819_s0  }
 0x8b4   : >> { %6256 = vst [vmem:[#allocation54_spill] sm:$0xff] %v4811_v56  ;;  %6257 = vst [vmem:[#allocation55_spill] sm:$0xff] %v4815_v45  ;;  %v2205_v54 = vand.u32 %v2139_v60, %v6258_v37  ;;  %v4577_v35 = vld [vmem:[%s6139_s6 + $0x18] sm:$0xff]   ;;  %v4578_v1 = vld [vmem:[%s6139_s6 + $0x20] sm:$0xff]   ;;  %s6302_s2 = sld [smem:[#allocation58_spill]]  ;;  %p2062_p9 = scmp.ge.s32.totalorder %s2065_s0, 8  }
 0x8b5   : >> { %v4579_v16 = vld [vmem:[%s6139_s6 + $0x28] sm:$0xff]   ;;  %v4580_v2 = vld [vmem:[%s6139_s6 + $0x30] sm:$0xff]   ;;  %v4581_v59 = vld [vmem:[%s6139_s6 + $0x38] sm:$0xff]   ;;  %s6306_s17 = scalar_lea.vmem (%p2062_p9), [#allocation6], %s4976_s16  ;;  %s3794_s1 = sshll.u32 (%p2062_p9), %s4927_s10, 6 }
 0x8b6   : >> { %4172 = vmatprep.subr.bf16.mxu0 %v2205_v54  ;;  %v4582_v14 = vld [vmem:[%s6140_s7] sm:$0xff]   ;;  %v6259_v60 = vld [vmem:[#allocation15_spill] sm:$0xff]  ;;  %s3493_s18 = scalar_lea.hbm (%p2062_p9), %s6146_s13, %s3794_s1  ;;  %s6308_s25 = sand.u32 (%p2062_p9), 1, %s4763_s28  }
 0x8b7   : >> { %4173 = vmatpush3.bf16.msra.mxu0 %v2205_v54  ;;  %4210 = vmatprep.mubr.bf16.mxu1 %v4582_v14  ;;  %v6263_v14 = vld [vmem:[#allocation16_spill] sm:$0xff]  ;;  %v6264_v25 = vld [vmem:[#allocation19_spill] sm:$0xff]  ;;  %s3482_s21 = scalar_lea.sflag (%p2062_p9), [#allocation4], %s6308_s25  ;;  %s4832_s0 = smov (%p2062_p9), [#allocation6]  }
 0x8b8   : >> { %4174 = vmatprep.subr.bf16.mxu0 %v2138_v47  ;;  %v6265_v51 = vld [vmem:[#allocation20_spill] sm:$0xff] }
 0x8bb   : >> { %4175 = vmatpush3.bf16.msra.mxu0 %v2138_v47  ;;  %v6260_v47 = vld [vmem:[#allocation17_spill] sm:$0xff] }
 0x8bc   : >> { %4176 = vmatprep.subr.bf16.mxu0 %v2137_v61 }
 0x8bf   : >> { %4177 = vmatpush3.bf16.msra.mxu0 %v2137_v61 }
 0x8c2   : >> { %4179 = vmatmul.mubr.msk.bf16.vlgmr.msra.gmra.mxu0 %vm877_vm7, %v4575_v32  ;;  %v6261_v32 = vld [vmem:[#allocation14_spill] sm:$0xff] }
 0x8c3   : >> { %4182 = vmatprep.mubr.msk.bf16.mxu0 %vm877_vm7, %v4576_v42 }
 0x8ca   : >> { %4183 = vmatmul.mubr.msk.bf16.gmra.mxu0 %vm877_vm7, %v4577_v35 }
 0x8cb   : >> { %4186 = vmatprep.mubr.msk.bf16.mxu0 %vm877_vm7, %v4578_v1  ;;  %v6262_v1 = vld [vmem:[#allocation18_spill] sm:$0xff] }
 0x8d2   : >> { %4187 = vmatmul.mubr.msk.bf16.gmra.mxu0 %vm877_vm7, %v4579_v16 }
 0x8d3   : >> { %4190 = vmatprep.mubr.msk.bf16.mxu0 %vm877_vm7, %v4580_v2 }
 0x8da   : >> { %4191 = vmatmul.mubr.msk.bf16.gmra.mxu0 %vm877_vm7, %v4581_v59 }
 0x982   : >> { %v4180_v17 = vpop.f32.mrf.mxu0 }
 0x984   : >> { %v2241_v15 = vpop.f32.mrf.mxu0 }
 0x986   : >> { %v4181_v8 = vpop.f32.mrf.mxu0 }
 0x988   : >> { %v2244_v55 = vpop.f32.mrf.mxu0 }
 0x98a   : >> { %v4184_v9 = vpop.f32.mrf.mxu0 }
 0x98c   : >> { %v2257_v58 = vpop.f32.mrf.mxu0 }
 0x98e   : >> { %v4185_v40 = vpop.f32.mrf.mxu0 }
 0x990   : >> { %v2260_v5 = vpop.f32.mrf.mxu0 }
 0x992   : >> { %v4188_v22 = vpop.f32.mrf.mxu0 }
 0x993   : >> { %v2282_v45 = vadd.f32 %v4188_v22, %v6264_v25 }
 0x994   : >> { %v2273_v48 = vpop.f32.mrf.mxu0 }
 0x996   : >> { %v4189_v7 = vpop.f32.mrf.mxu0 }
 0x997   : >> { %v2285_v16 = vadd.f32 %v4189_v7, %v6262_v1  ;;  %v6267_v7 = vld [vmem:[#allocation22_spill] sm:$0xff] }
 0x998   : >> { %v2276_v20 = vpop.f32.mrf.mxu0 }
 0x999   : >> { %v2315_v10 = vmax.f32 %v2285_v16, 0.0 }
 0x99a   : >> { %v4192_v11 = vpop.f32.mrf.mxu0 }
 0x99b   : >> { %v2298_v37 = vadd.f32 %v4192_v11, %v6259_v60  ;;  %v2277_v11 = vadd.f32 %v2276_v20, %v6265_v51 }
 0x99c   : >> { %v2289_v53 = vpop.f32.mrf.mxu0 }
 0x99d   : >> { %v2290_v61 = vadd.f32 %v2289_v53, %v6260_v47  ;;  %v2318_v2 = vmax.f32 %v2298_v37, 0.0  ;;  %v2314_v53 = vmax.f32 %v2282_v45, 0.0  ;;  %v2269_v37 = vadd.f32 %v4185_v40, %v6267_v7  ;;  %v6271_v45 = vld [vmem:[#allocation26_spill] sm:$0xff]  ;;  %v4586_v7 = vld [vmem:[%s6140_s7 + $0x20] sm:$0xff]  }
 0x99e   : >> { %v4193_v54 = vpop.f32.mrf.mxu0 }
 0x99f   : >> { %v2301_v42 = vadd.f32 %v4193_v54, %v6261_v32  ;;  %v2316_v4 = vmax.f32 %v2290_v61, 0.0  ;;  %v6266_v54 = vld [vmem:[#allocation21_spill] sm:$0xff]  ;;  %v2341_v32 = vpack.c.bf16 %v2315_v10, %v2314_v53  ;;  %v6269_v61 = vld [vmem:[#allocation24_spill] sm:$0xff]  ;;  %v6272_v10 = vld [vmem:[#allocation27_spill] sm:$0xff] }
 0x9a0   : >> { %v2292_v35 = vpop.f32.mrf.mxu0  ;;  %v2274_v47 = vadd.f32 %v2273_v48, %v6266_v54  ;;  %v2261_v1 = vadd.f32 %v2260_v5, %v6269_v61  ;;  %v2253_v48 = vadd.f32 %v4181_v8, %v6271_v45  ;;  %v2250_v16 = vadd.f32 %v4180_v17, %v6272_v10  ;;  %v4583_v17 = vld [vmem:[%s6140_s7 + $0x8] sm:$0xff]  }
 0x9a1   : >> { %v2319_v59 = vmax.f32 %v2301_v42, 0.0  ;;  %v2293_v21 = vadd.f32 %v2292_v35, %v6263_v14  ;;  %v2313_v42 = vmax.f32 %v2277_v11, 0.0  ;;  %v6268_v35 = vld [vmem:[#allocation23_spill] sm:$0xff] }
 0x9a2   : >> { %v2266_v25 = vadd.f32 %v4184_v9, %v6268_v35  ;;  %v2312_v22 = vmax.f32 %v2274_v47, 0.0  ;;  %v2309_v40 = vmax.f32 %v2261_v1, 0.0  ;;  %v2307_v9 = vmax.f32 %v2253_v48, 0.0  ;;  %v4590_v35 = vld [vmem:[%s6140_s7 + $0x40] sm:$0xff]  }
 0x9a3   : >> { %v2317_v31 = vmax.f32 %v2293_v21, 0.0  ;;  %v2343_v56 = vpack.c.bf16 %v2319_v59, %v2318_v2  ;;  %v2311_v21 = vmax.f32 %v2269_v37, 0.0  ;;  %v6273_v59 = vld [vmem:[#allocation28_spill] sm:$0xff]  ;;  %v2306_v5 = vmax.f32 %v2250_v16, 0.0  ;;  %v4587_v37 = vld [vmem:[%s6140_s7 + $0x28] sm:$0xff]   ;;  %4242 = vmatprep.mubr.bf16.mxu0 %v4590_v35 }
 0x9a4   : >> { %v2340_v51 = vpack.c.bf16 %v2313_v42, %v2312_v22  ;;  %v2245_v14 = vadd.f32 %v2244_v55, %v6273_v59  ;;  %v4584_v55 = vld [vmem:[%s6140_s7 + $0x10] sm:$0xff]   ;;  %v4589_v42 = vld [vmem:[%s6140_s7 + $0x38] sm:$0xff]  }
 0x9a5   : >> { %v2342_v60 = vpack.c.bf16 %v2317_v31, %v2316_v4  ;;  %4194 = vmatprep.subr.bf16.mxu1 %v2343_v56  ;;  %v2310_v31 = vmax.f32 %v2266_v25, 0.0  ;;  %v6275_v16 = vld [vmem:[#allocation30_spill] sm:$0xff] }
 0x9a6   : >> { %4195 = vmatpush3.bf16.msra.mxu1 %v2343_v56  ;;  %v6270_v56 = vld [vmem:[#allocation25_spill] sm:$0xff]  ;;  %v2305_v54 = vmax.f32 %v2245_v14, 0.0  ;;  %v6276_v14 = vld [vmem:[#allocation31_spill] sm:$0xff] }
 0x9a7   : >> { %4196 = vmatprep.subr.bf16.mxu1 %v2342_v60  ;;  %v2258_v4 = vadd.f32 %v2257_v58, %v6270_v56  ;;  %v2339_v20 = vpack.c.bf16 %v2311_v21, %v2310_v31  ;;  %v2337_v58 = vpack.c.bf16 %v2307_v9, %v2306_v5 }
 0x9a9   : >> { %v2308_v2 = vmax.f32 %v2258_v4, 0.0 }
 0x9aa   : >> { %4197 = vmatpush3.bf16.msra.mxu1 %v2342_v60  ;;  %v6274_v60 = vld [vmem:[#allocation29_spill] sm:$0xff] }
 0x9ab   : >> { %4198 = vmatprep.subr.bf16.mxu1 %v2341_v32  ;;  %v2338_v11 = vpack.c.bf16 %v2309_v40, %v2308_v2  ;;  %v2242_v53 = vadd.f32 %v2241_v15, %v6274_v60  ;;  %v4585_v15 = vld [vmem:[%s6140_s7 + $0x18] sm:$0xff]  }
 0x9ad   : >> { %v2304_v8 = vmax.f32 %v2242_v53, 0.0 }
 0x9ae   : >> { %4199 = vmatpush3.bf16.msra.mxu1 %v2341_v32  ;;  %v4588_v32 = vld [vmem:[%s6140_s7 + $0x30] sm:$0xff]  }
 0x9af   : >> { %4200 = vmatprep.subr.bf16.mxu1 %v2340_v51  ;;  %v2336_v47 = vpack.c.bf16 %v2305_v54, %v2304_v8 }
 0x9b2   : >> { %4201 = vmatpush3.bf16.msra.mxu1 %v2340_v51 }
 0x9b3   : >> { %4202 = vmatprep.subr.bf16.mxu1 %v2339_v20 }
 0x9b6   : >> { %4203 = vmatpush3.bf16.msra.mxu1 %v2339_v20 }
 0x9b7   : >> { %4204 = vmatprep.subr.bf16.mxu1 %v2338_v11 }
 0x9ba   : >> { %4205 = vmatpush3.bf16.msra.mxu1 %v2338_v11 }
 0x9bb   : >> { %4206 = vmatprep.subr.bf16.mxu1 %v2337_v58 }
 0x9be   : >> { %4207 = vmatpush3.bf16.msra.mxu1 %v2337_v58 }
 0x9bf   : >> { %4208 = vmatprep.subr.bf16.mxu1 %v2336_v47 }
 0x9c2   : >> { %4209 = vmatpush3.bf16.msra.mxu1 %v2336_v47 }
 0x9c5   : >> { %4211 = vmatmul.mubr.bf16.vlgmr.msra.gmra.mxu1 %v4583_v17 }
 0x9c6   : >> { %4214 = vmatprep.mubr.bf16.mxu1 %v4584_v55 }
 0x9cd   : >> { %4215 = vmatmul.mubr.bf16.gmra.mxu1 %v4585_v15 }
 0x9ce   : >> { %4218 = vmatprep.mubr.bf16.mxu1 %v4586_v7 }
 0x9d5   : >> { %4219 = vmatmul.mubr.bf16.gmra.mxu1 %v4587_v37 }
 0x9d6   : >> { %4222 = vmatprep.mubr.bf16.mxu1 %v4588_v32 }
 0x9dd   : >> { %4223 = vmatmul.mubr.bf16.gmra.mxu1 %v4589_v42 }
 0xa85   : >> { %v4212_v25 = vpop.f32.mrf.mxu1 }
 0xa87   : >> { %v2426_v22 = vpop.f32.mrf.mxu1 }
 0xa89   : >> { %v4213_v21 = vpop.f32.mrf.mxu1 }
 0xa8b   : >> { %v2429_v61 = vpop.f32.mrf.mxu1 }
 0xa8d   : >> { %v4216_v1 = vpop.f32.mrf.mxu1 }
 0xa8f   : >> { %v2442_v51 = vpop.f32.mrf.mxu1 }
 0xa91   : >> { %v4217_v31 = vpop.f32.mrf.mxu1 }
 0xa92   : >> { %v2454_v35 = vadd.f32 %v4217_v31, %v5386_v29 }
 0xa93   : >> { %v2445_v56 = vpop.f32.mrf.mxu1 }
 0xa95   : >> { %v4220_v4 = vpop.f32.mrf.mxu1 }
 0xa96   : >> { %v2467_v8 = vadd.f32 %v4220_v4, %v5377_v63  ;;  %v2451_v4 = vadd.f32 %v4216_v1, %v5390_v6 }
 0xa97   : >> { %v2458_v45 = vpop.f32.mrf.mxu1 }
 0xa98   : >> { %v2499_v32 = vmax.f32 %v2467_v8, 0.0  ;;  %v2459_v42 = vadd.f32 %v2458_v45, %v5381_v19  ;;  %v2438_v45 = vadd.f32 %v4213_v21, %v5401_v57 }
 0xa99   : >> { %v4221_v48 = vpop.f32.mrf.mxu1 }
 0xa9a   : >> { %v2470_v60 = vadd.f32 %v4221_v48, %v5375_v27  ;;  %v2492_v1 = vmax.f32 %v2438_v45, 0.0 }
 0xa9b   : >> { %v2461_v20 = vpop.f32.mrf.mxu1 }
 0xa9c   : >> { %v2500_v15 = vmax.f32 %v2470_v60, 0.0  ;;  %v2462_v7 = vadd.f32 %v2461_v20, %v5379_v39  ;;  %v2430_v60 = vadd.f32 %v2429_v61, %v5408_v12  ;;  %v4592_v61 = vld [vmem:[%s6140_s7 + $0x50] sm:$0xff]  }
 0xa9d   : >> { %v4224_v40 = vpop.f32.mrf.mxu1 }
 0xa9e   : >> { %v2483_v2 = vadd.f32 %v4224_v40, %v6275_v16  ;;  %v2526_v48 = vpack.c.bf16 %v2500_v15, %v2499_v32  ;;  %v2498_v40 = vmax.f32 %v2462_v7, 0.0  ;;  %v2496_v16 = vmax.f32 %v2454_v35, 0.0  ;;  %v4597_v15 = vld [vmem:[%s6140_s7 + $0x78] sm:$0xff]   ;;  %v4598_v7 = vld [vmem:[%s6140_s7 + $0x80] sm:$0xff]  }
 0xa9f   : >> { %v2474_v10 = vpop.f32.mrf.mxu1  ;;  %4274 = vmatprep.mubr.bf16.mxu1 %v4598_v7 }
 0xaa0   : >> { %v2475_v59 = vadd.f32 %v2474_v10, %v5367_v24  ;;  %v2503_v53 = vmax.f32 %v2483_v2, 0.0  ;;  %v2497_v10 = vmax.f32 %v2459_v42, 0.0  ;;  %v2446_v2 = vadd.f32 %v2445_v56, %v5394_v41 }
 0xaa1   : >> { %v4225_v9 = vpop.f32.mrf.mxu1 }
 0xaa2   : >> { %v2486_v11 = vadd.f32 %v4225_v9, %v6276_v14  ;;  %v2501_v47 = vmax.f32 %v2475_v59, 0.0  ;;  %v2525_v20 = vpack.c.bf16 %v2498_v40, %v2497_v10  ;;  %v2495_v9 = vmax.f32 %v2451_v4, 0.0 }
 0xaa3   : >> { %v2477_v5 = vpop.f32.mrf.mxu1  ;;  %v2443_v59 = vadd.f32 %v2442_v51, %v5397_v62  ;;  %v2494_v31 = vmax.f32 %v2446_v2, 0.0 }
 0xaa4   : >> { %v2504_v58 = vmax.f32 %v2486_v11, 0.0  ;;  %v2478_v54 = vadd.f32 %v2477_v5, %v5371_v28  ;;  %v2524_v14 = vpack.c.bf16 %v2496_v16, %v2495_v9  ;;  %v2435_v11 = vadd.f32 %v4212_v25, %v5404_v23  ;;  %v4591_v25 = vld [vmem:[%s6140_s7 + $0x48] sm:$0xff]  }
 0xaa5   : >> { %v2493_v5 = vmax.f32 %v2443_v59, 0.0 }
 0xaa6   : >> { %v2528_v17 = vpack.c.bf16 %v2504_v58, %v2503_v53  ;;  %v2502_v55 = vmax.f32 %v2478_v54, 0.0  ;;  %v2491_v56 = vmax.f32 %v2435_v11, 0.0  ;;  %v2427_v58 = vadd.f32 %v2426_v22, %v5412_v34  ;;  %v4593_v22 = vld [vmem:[%s6140_s7 + $0x58] sm:$0xff]  }
 0xaa7   : >> { %v2523_v53 = vpack.c.bf16 %v2494_v31, %v2493_v5  ;;  %v2490_v54 = vmax.f32 %v2430_v60, 0.0  ;;  %v6277_v5 = vld [vmem:[#allocation32_spill] sm:$0xff] }
 0xaa8   : >> { %v2527_v37 = vpack.c.bf16 %v2502_v55, %v2501_v47  ;;  %4226 = vmatprep.subr.bf16.mxu0 %v2528_v17  ;;  %v2522_v51 = vpack.c.bf16 %v2492_v1, %v2491_v56  ;;  %v2489_v21 = vmax.f32 %v2427_v58, 0.0  ;;  %v4594_v47 = vld [vmem:[%s6140_s7 + $0x60] sm:$0xff]   ;;  %v4596_v55 = vld [vmem:[%s6140_s7 + $0x70] sm:$0xff]  }
 0xaa9   : >> { %4227 = vmatpush3.bf16.msra.mxu0 %v2528_v17  ;;  %v4595_v17 = vld [vmem:[%s6140_s7 + $0x68] sm:$0xff]  }
 0xaaa   : >> { %4228 = vmatprep.subr.bf16.mxu0 %v2527_v37  ;;  %v2521_v8 = vpack.c.bf16 %v2490_v54, %v2489_v21  ;;  %v6279_v54 = vld [vmem:[#allocation33_spill] sm:$0xff] }
 0xaad   : >> { %4229 = vmatpush3.bf16.msra.mxu0 %v2527_v37 }
 0xaae   : >> { %4230 = vmatprep.subr.bf16.mxu0 %v2526_v48 }
 0xab1   : >> { %4231 = vmatpush3.bf16.msra.mxu0 %v2526_v48 }
 0xab2   : >> { %4232 = vmatprep.subr.bf16.mxu0 %v2525_v20 }
 0xab5   : >> { %4233 = vmatpush3.bf16.msra.mxu0 %v2525_v20 }
 0xab6   : >> { %4234 = vmatprep.subr.bf16.mxu0 %v2524_v14 }
 0xab9   : >> { %4235 = vmatpush3.bf16.msra.mxu0 %v2524_v14 }
 0xaba   : >> { %4236 = vmatprep.subr.bf16.mxu0 %v2523_v53 }
 0xabd   : >> { %4237 = vmatpush3.bf16.msra.mxu0 %v2523_v53  ;;  %v6278_v53 = vld [vmem:[#allocation34_spill] sm:$0xff] }
 0xabe   : >> { %4238 = vmatprep.subr.bf16.mxu0 %v2522_v51 }
 0xac1   : >> { %4239 = vmatpush3.bf16.msra.mxu0 %v2522_v51 }
 0xac2   : >> { %4240 = vmatprep.subr.bf16.mxu0 %v2521_v8 }
 0xac5   : >> { %4241 = vmatpush3.bf16.msra.mxu0 %v2521_v8  ;;  %v6280_v8 = vld [vmem:[#allocation35_spill] sm:$0xff] }
 0xac8   : >> { %4243 = vmatmul.mubr.bf16.vlgmr.msra.gmra.mxu0 %v4591_v25 }
 0xac9   : >> { %4246 = vmatprep.mubr.bf16.mxu0 %v4592_v61 }
 0xad0   : >> { %4247 = vmatmul.mubr.bf16.gmra.mxu0 %v4593_v22 }
 0xad1   : >> { %4250 = vmatprep.mubr.bf16.mxu0 %v4594_v47 }
 0xad8   : >> { %4251 = vmatmul.mubr.bf16.gmra.mxu0 %v4595_v17 }
 0xad9   : >> { %4254 = vmatprep.mubr.bf16.mxu0 %v4596_v55  ;;  %v6281_v55 = vld [vmem:[#allocation36_spill] sm:$0xff] }
 0xae0   : >> { %4255 = vmatmul.mubr.bf16.gmra.mxu0 %v4597_v15 }
 0xb88   : >> { %v4244_v37 = vpop.f32.mrf.mxu0 }
 0xb8a   : >> { %v2611_v32 = vpop.f32.mrf.mxu0 }
 0xb8c   : >> { %v4245_v42 = vpop.f32.mrf.mxu0 }
 0xb8e   : >> { %v2614_v35 = vpop.f32.mrf.mxu0 }
 0xb90   : >> { %v4248_v48 = vpop.f32.mrf.mxu0 }
 0xb92   : >> { %v2627_v40 = vpop.f32.mrf.mxu0 }
 0xb94   : >> { %v4249_v4 = vpop.f32.mrf.mxu0 }
 0xb96   : >> { %v2630_v10 = vpop.f32.mrf.mxu0 }
 0xb98   : >> { %v4252_v16 = vpop.f32.mrf.mxu0 }
 0xb99   : >> { %v2652_v25 = vadd.f32 %v4252_v16, %v6280_v8 }
 0xb9a   : >> { %v2643_v2 = vpop.f32.mrf.mxu0 }
 0xb9c   : >> { %v4253_v20 = vpop.f32.mrf.mxu0 }
 0xb9d   : >> { %v2655_v56 = vadd.f32 %v4253_v20, %v6278_v53  ;;  %v6283_v20 = vld [vmem:[#allocation38_spill] sm:$0xff] }
 0xb9e   : >> { %v2646_v9 = vpop.f32.mrf.mxu0 }
 0xb9f   : >> { %v2685_v17 = vmax.f32 %v2655_v56, 0.0  ;;  %v2647_v15 = vadd.f32 %v2646_v9, %v6281_v55  ;;  %v6285_v56 = vld [vmem:[#allocation40_spill] sm:$0xff] }
 0xba0   : >> { %v4256_v59 = vpop.f32.mrf.mxu0 }
 0xba1   : >> { %v2668_v14 = vadd.f32 %v4256_v59, %v5467_v36  ;;  %v2684_v59 = vmax.f32 %v2652_v25, 0.0 }
 0xba2   : >> { %v2659_v45 = vpop.f32.mrf.mxu0 }
 0xba3   : >> { %v2660_v11 = vadd.f32 %v2659_v45, %v5475_v49  ;;  %v2688_v58 = vmax.f32 %v2668_v14, 0.0  ;;  %v6282_v45 = vld [vmem:[#allocation37_spill] sm:$0xff]  ;;  %v2639_v14 = vadd.f32 %v4249_v4, %v6283_v20 }
 0xba4   : >> { %v4257_v31 = vpop.f32.mrf.mxu0  ;;  %v4602_v20 = vld [vmem:[%s6140_s7 + $0xa0] sm:$0xff]  }
 0xba5   : >> { %v2671_v1 = vadd.f32 %v4257_v31, %v6277_v5  ;;  %v2686_v61 = vmax.f32 %v2660_v11, 0.0  ;;  %v2644_v31 = vadd.f32 %v2643_v2, %v6282_v45  ;;  %v2711_v5 = vpack.c.bf16 %v2685_v17, %v2684_v59  ;;  %v6287_v2 = vld [vmem:[#allocation42_spill] sm:$0xff]  ;;  %v6289_v17 = vld [vmem:[#allocation44_spill] sm:$0xff] }
 0xba6   : >> { %v2662_v60 = vpop.f32.mrf.mxu0  ;;  %v2681_v53 = vmax.f32 %v2639_v14, 0.0  ;;  %v2623_v8 = vadd.f32 %v4245_v42, %v6287_v2  ;;  %v2615_v55 = vadd.f32 %v2614_v35, %v6289_v17  ;;  %v4600_v35 = vld [vmem:[%s6140_s7 + $0x90] sm:$0xff]   ;;  %v4603_v14 = vld [vmem:[%s6140_s7 + $0xa8] sm:$0xff]  }
 0xba7   : >> { %v2689_v51 = vmax.f32 %v2671_v1, 0.0  ;;  %v2663_v21 = vadd.f32 %v2662_v60, %v6279_v54  ;;  %v2683_v1 = vmax.f32 %v2647_v15, 0.0  ;;  %v6284_v60 = vld [vmem:[#allocation39_spill] sm:$0xff]  ;;  %v2682_v11 = vmax.f32 %v2644_v31, 0.0  ;;  %v6286_v54 = vld [vmem:[#allocation41_spill] sm:$0xff] }
 0xba8   : >> { %v2636_v16 = vadd.f32 %v4248_v48, %v6284_v60  ;;  %v2677_v48 = vmax.f32 %v2623_v8, 0.0  ;;  %v2675_v45 = vmax.f32 %v2615_v55, 0.0  ;;  %v4829_v60 = vmov 0.0  }
 0xba9   : >> { %v2713_v22 = vpack.c.bf16 %v2689_v51, %v2688_v58  ;;  %v2687_v47 = vmax.f32 %v2663_v21, 0.0  ;;  %v2631_v58 = vadd.f32 %v2630_v10, %v6285_v56  ;;  %v2710_v9 = vpack.c.bf16 %v2683_v1, %v2682_v11  ;;  %v4605_v1 = vld [vmem:[%s6140_s7 + $0xb8] sm:$0xff]   ;;  %4290 = vmatprep.subr.bf16.mxu0 %v4829_v60  ;;  %4306 = vmatprep.mubr.msk.bf16.mxu0 %vm4830_vm9, %v4829_v60  ;;  %v3154_v56 = vld [vmem:[%s6291_s3 + $0x8] sm:$0xff] }
 0xbaa   : >> { %v2680_v51 = vmax.f32 %v2636_v16, 0.0  ;;  %v2628_v21 = vadd.f32 %v2627_v40, %v6286_v54  ;;  %v2876_v16 = vld [vmem:[#allocation2] sm:$0x1]  ;;  %v4831_v11 = vmov 0  }
 0xbab   : >> { %v2712_v7 = vpack.c.bf16 %v2687_v47, %v2686_v61  ;;  %4258 = vmatprep.subr.bf16.mxu1 %v2713_v22  ;;  %v2679_v4 = vmax.f32 %v2631_v58, 0.0  ;;  %v6288_v61 = vld [vmem:[#allocation43_spill] sm:$0xff]  ;;  %4572 = vset.pattern.permute.xlu0 %v4831_v11 }
 0xbac   : >> { %4259 = vmatpush3.bf16.msra.mxu1 %v2713_v22  ;;  %v2709_v25 = vpack.c.bf16 %v2681_v53, %v2680_v51  ;;  %v2620_v22 = vadd.f32 %v4244_v37, %v6288_v61  ;;  %v2678_v47 = vmax.f32 %v2628_v21, 0.0  ;;  %v4599_v37 = vld [vmem:[%s6140_s7 + $0x88] sm:$0xff]   ;;  %4573 = vset.pattern.permute.xlu1 %v4831_v11  ;;  %v3155_v53 = vld [vmem:[%s6291_s3 + $0x10] sm:$0xff]  ;;  %v3277_v58 = vld [vmem:[%s6138_s5 + $0x18] sm:$0xff] }
 0xbad   : >> { %4260 = vmatprep.subr.bf16.mxu1 %v2712_v7  ;;  %2887 = vperm.xlu0 %4572, %v2876_v16   ;;  %v3386_v51 = vld [vmem:[%s6145_s12] sm:$0x7] }
 0xbae   : >> { %v2708_v15 = vpack.c.bf16 %v2679_v4, %v2678_v47  ;;  %v2676_v10 = vmax.f32 %v2620_v22, 0.0 }
 0xbb0   : >> { %4261 = vmatpush3.bf16.msra.mxu1 %v2712_v7  ;;  %v6290_v7 = vld [vmem:[#allocation45_spill] sm:$0xff]  ;;  %v2707_v40 = vpack.c.bf16 %v2677_v48, %v2676_v10 }
 0xbb1   : >> { %4262 = vmatprep.subr.bf16.mxu1 %v2711_v5  ;;  %v2612_v59 = vadd.f32 %v2611_v32, %v6290_v7  ;;  %v4601_v32 = vld [vmem:[%s6140_s7 + $0x98] sm:$0xff]   ;;  %3171 = vperm.xlu0 %4572, %v3155_v53   ;;  %v6292_v7 = vld [vmem:[#allocation46_spill] sm:$0xff] }
 0xbb3   : >> { %v2674_v42 = vmax.f32 %v2612_v59, 0.0 }
 0xbb4   : >> { %4263 = vmatpush3.bf16.msra.mxu1 %v2711_v5  ;;  %v4604_v5 = vld [vmem:[%s6140_s7 + $0xb0] sm:$0xff]  }
 0xbb5   : >> { %4264 = vmatprep.subr.bf16.mxu1 %v2710_v9  ;;  %v2706_v31 = vpack.c.bf16 %v2675_v45, %v2674_v42  ;;  %3166 = vperm.xlu0 %4572, %v3154_v56  }
 0xbb8   : >> { %4265 = vmatpush3.bf16.msra.mxu1 %v2710_v9  ;;  %v3274_v9 = vld [vmem:[%s6138_s5] sm:$0xff] }
 0xbb9   : >> { %4266 = vmatprep.subr.bf16.mxu1 %v2709_v25  ;;  %3298 = vperm.xlu0 %4572, %v3277_v58  }
 0xbbc   : >> { %4267 = vmatpush3.bf16.msra.mxu1 %v2709_v25 }
 0xbbd   : >> { %4268 = vmatprep.subr.bf16.mxu1 %v2708_v15  ;;  %3283 = vperm.xlu0 %4572, %v3274_v9  }
 0xbc0   : >> { %4269 = vmatpush3.bf16.msra.mxu1 %v2708_v15 }
 0xbc1   : >> { %4270 = vmatprep.subr.bf16.mxu1 %v2707_v40  ;;  %3392 = vperm.xlu0 %4572, %v3386_v51  }
 0xbc4   : >> { %4271 = vmatpush3.bf16.msra.mxu1 %v2707_v40 }
 0xbc5   : >> { %4272 = vmatprep.subr.bf16.mxu1 %v2706_v31 }
 0xbc8   : >> { %4273 = vmatpush3.bf16.msra.mxu1 %v2706_v31 }
 0xbc9   : >> { %4324 = vmatprep.subr.bf16.mxu1 %v4829_v60 }
 0xbcb   : >> { %4275 = vmatmul.mubr.bf16.vlgmr.msra.gmra.mxu1 %v4599_v37 }
 0xbcc   : >> { %4278 = vmatprep.mubr.bf16.mxu1 %v4600_v35 }
 0xbd3   : >> { %4279 = vmatmul.mubr.bf16.gmra.mxu1 %v4601_v32  ;;  %v6293_v32 = vld [vmem:[#allocation47_spill] sm:$0xff] }
 0xbd4   : >> { %4282 = vmatprep.mubr.bf16.mxu1 %v4602_v20 }
 0xbdb   : >> { %4283 = vmatmul.mubr.bf16.gmra.mxu1 %v4603_v14 }
 0xbdc   : >> { %4286 = vmatprep.mubr.bf16.mxu1 %v4604_v5 }
 0xbe3   : >> { %4287 = vmatmul.mubr.bf16.gmra.mxu1 %v4605_v1 }
 0xbe4   : >> { %4328 = vmatprep.mubr.msk.bf16.mxu1 %vm4830_vm9, %v4829_v60 }
 0xc8b   : >> { %v4276_v54 = vpop.f32.mrf.mxu1 }
 0xc8d   : >> { %v2796_v21 = vpop.f32.mrf.mxu1 }
 0xc8f   : >> { %v4277_v2 = vpop.f32.mrf.mxu1 }
 0xc91   : >> { %v2799_v8 = vpop.f32.mrf.mxu1 }
 0xc93   : >> { %v4280_v25 = vpop.f32.mrf.mxu1 }
 0xc95   : >> { %v2812_v4 = vpop.f32.mrf.mxu1 }
 0xc97   : >> { %v4281_v61 = vpop.f32.mrf.mxu1 }
 0xc99   : >> { %v2815_v22 = vpop.f32.mrf.mxu1 }
 0xc9b   : >> { %v4284_v47 = vpop.f32.mrf.mxu1 }
 0xc9c   : >> { %v2837_v16 = vadd.f32 %v4284_v47, %v5560_v33  ;;  %v2821_v47 = vadd.f32 %v4280_v25, %v5573_v52  ;;  %v2805_v25 = vadd.f32 %v4276_v54, %v5590_v38 }
 0xc9d   : >> { %v2828_v48 = vpop.f32.mrf.mxu1 }
 0xc9e   : >> { %v2869_v9 = vmax.f32 %v2837_v16, 0.0  ;;  %v2829_v51 = vadd.f32 %v2828_v48, %v5565_v50  ;;  %v2813_v48 = vadd.f32 %v2812_v4, %v5581_v44  ;;  %v2875_v16 = vld [vmem:[%s6142_s9] sm:$0x1] }
 0xc9f   : >> { %v4285_v17 = vpop.f32.mrf.mxu1 }
 0xca0   : >> { %v2840_v14 = vadd.f32 %v4285_v17, %v5558_v26  ;;  %v2824_v17 = vadd.f32 %v4281_v61, %v5570_v46  ;;  %v2808_v61 = vadd.f32 %v4277_v2, %v5586_v0 }
 0xca1   : >> { %v2831_v55 = vpop.f32.mrf.mxu1 }
 0xca2   : >> { %v2870_v53 = vmax.f32 %v2840_v14, 0.0  ;;  %v2832_v56 = vadd.f32 %v2831_v55, %v5562_v13  ;;  %v2816_v55 = vadd.f32 %v2815_v22, %v5578_v3  ;;  %v2800_v22 = vadd.f32 %v2799_v8, %v5595_v43  ;;  %v6294_v14 = vld [vmem:[#allocation48_spill] sm:$0xff] }
 0xca3   : >> { %v4288_v15 = vpop.f32.mrf.mxu1  ;;  %v2797_v4 = vadd.f32 %v2796_v21, %v6294_v14  ;;  %v6295_v21 = vld [vmem:[#allocation52_spill] sm:$0xff] }
 0xca4   : >> { %v2853_v59 = vadd.f32 %v4288_v15, %v6292_v7  ;;  %v2882_v15 = vpack.c.bf16 %v2870_v53, %v2869_v9  ;;  %v2867_v7 = vmax.f32 %v2829_v51, 0.0  ;;  %v2860_v2 = vmax.f32 %v2800_v22, 0.0  ;;  %v6297_v22 = vld [vmem:[#allocation49_spill] sm:$0xff] }
 0xca5   : >> { %v2844_v10 = vpop.f32.mrf.mxu1  ;;  %v2099_v8 = vmul.f32 %v6295_v21, %v6295_v21 }
 0xca6   : >> { %v2873_v31 = vmax.f32 %v2853_v59, 0.0  ;;  %v2845_v37 = vadd.f32 %v2844_v10, %v5552_v30  ;;  %v2868_v10 = vmax.f32 %v2832_v56, 0.0  ;;  %v2866_v59 = vmax.f32 %v2824_v17, 0.0 }
 0xca7   : >> { %v4289_v40 = vpop.f32.mrf.mxu1  ;;  %v2101_v56 = vrot.slane %v2099_v8, 1  ;;  %v2104_v51 = vrot.slane %v2099_v8, 2 }
 0xca8   : >> { %v2856_v45 = vadd.f32 %v4289_v40, %v5556_v18  ;;  %v2871_v11 = vmax.f32 %v2845_v37, 0.0  ;;  %v2881_v40 = vpack.c.bf16 %v2868_v10, %v2867_v7  ;;  %v2863_v37 = vmax.f32 %v2813_v48, 0.0 }
 0xca9   : >> { %v2847_v42 = vpop.f32.mrf.mxu1  ;;  %v2103_v9 = vadd.f32 %v2101_v56, %v2099_v8 }
 0xcaa   : >> { %v2874_v35 = vmax.f32 %v2856_v45, 0.0  ;;  %v2848_v20 = vadd.f32 %v2847_v42, %v6293_v32  ;;  %v2865_v45 = vmax.f32 %v2821_v47, 0.0 }
 0xcab   : >> { %v2106_v10 = vadd.f32 %v2104_v51, %v2103_v9 }
 0xcac   : >> { %v2884_v5 = vpack.c.bf16 %v2874_v35, %v2873_v31  ;;  %v2872_v1 = vmax.f32 %v2848_v20, 0.0  ;;  %v2880_v42 = vpack.c.bf16 %v2866_v59, %v2865_v45  ;;  %v2864_v31 = vmax.f32 %v2816_v55, 0.0 }
 0xcad   : >> { %v2862_v35 = vmax.f32 %v2808_v61, 0.0  ;;  %v2861_v20 = vmax.f32 %v2805_v25, 0.0  ;;  %4612 = vrsqrt.f32 %v2106_v10  ;;  %vm2109_vm10 = vcmp.eq.f32.partialorder %v2106_v10, inf }
 0xcae   : >> { %4291 = vmatpush3.bf16.msra.mxu0 %v2884_v5  ;;  %v2883_v58 = vpack.c.bf16 %v2872_v1, %v2871_v11  ;;  %v2879_v32 = vpack.c.bf16 %v2864_v31, %v2863_v37  ;;  %v2859_v1 = vmax.f32 %v2797_v4, 0.0  ;;  %v6296_v11 = vld [vmem:[#allocation54_spill] sm:$0xff]  ;;  %vm2111_vm11 = vcmp.eq.f32.partialorder %v2106_v10, 0.0 }
 0xcaf   : >> { %4292 = vmatprep.subr.bf16.mxu0 %v4829_v60  ;;  %v2878_v5 = vpack.c.bf16 %v2862_v35, %v2861_v20  ;;  %v2077_v53 = vmul.f32 %v6296_v11, %v6296_v11  ;;  %v6298_v20 = vld [vmem:[#allocation11_spill] sm:$0xff] }
 0xcb0   : >> { %v2877_v54 = vpack.c.bf16 %v2860_v2, %v2859_v1 }
 0xcb2   : >> { %4293 = vmatpush3.bf16.msra.mxu0 %v2883_v58  ;;  %v2079_v58 = vrot.slane %v2077_v53, 1 }
 0xcb3   : >> { %4294 = vmatprep.subr.bf16.mxu0 %v4829_v60 }
 0xcb4   : >> { %v2081_v17 = vadd.f32 %v2079_v58, %v2077_v53 }
 0xcb6   : >> { %4295 = vmatpush3.bf16.msra.mxu0 %v2882_v15  ;;  %v2082_v15 = vrot.slane %v2077_v53, 2 }
 0xcb7   : >> { %4296 = vmatprep.subr.bf16.mxu0 %v4829_v60 }
 0xcb8   : >> { %v2084_v47 = vadd.f32 %v2082_v15, %v2081_v17 }
 0xcba   : >> { %4297 = vmatpush3.bf16.msra.mxu0 %v2881_v40  ;;  %4614 = vrsqrt.f32 %v2084_v47  ;;  %v4613_v7 = vpop.eup %4612  ;;  %v2112_v40 = vand.u32 2147483648, %v2106_v10  ;;  %vm2087_vm12 = vcmp.eq.f32.partialorder %v2084_v47, inf  ;;  %v2090_v61 = vand.u32 2147483648, %v2084_v47 }
 0xcbb   : >> { %4298 = vmatprep.subr.bf16.mxu0 %v4829_v60  ;;  %v2108_v59 = vmul.f32 %v4613_v7, %v2106_v10  ;;  %vm2089_vm13 = vcmp.eq.f32.partialorder %v2084_v47, 0.0 }
 0xcbd   : >> { %v2110_v48 = vsel %vm2109_vm10, %v2106_v10, %v2108_v59 }
 0xcbe   : >> { %4299 = vmatpush3.bf16.msra.mxu0 %v2880_v42  ;;  %v2113_v42 = vsel %vm2111_vm11, %v2112_v40, %v2110_v48  ;;  %v2888_v48 = vpop.permute.xlu0 %2887 }
 0xcbf   : >> { %4300 = vmatprep.subr.bf16.mxu0 %v4829_v60  ;;  %v2114_v25 = vmax.f32 %v2113_v42, 1e-12 }
 0xcc2   : >> { %4301 = vmatpush3.bf16.msra.mxu0 %v2879_v32  ;;  %v2118_v32 = vrot.slane %v2114_v25, %v6297_v22 }
 0xcc3   : >> { %4302 = vmatprep.subr.bf16.mxu0 %v4829_v60 }
 0xcc4   : >> { %4616 = vrcp.f32 %v2118_v32 }
 0xcc6   : >> { %4303 = vmatpush3.bf16.msra.mxu0 %v2878_v5 }
 0xcc7   : >> { %4304 = vmatprep.subr.bf16.mxu0 %v4829_v60  ;;  %v4615_v55 = vpop.eup %4614 }
 0xcc8   : >> { %v2086_v45 = vmul.f32 %v4615_v55, %v2084_v47 }
 0xcca   : >> { %4305 = vmatpush3.bf16.msra.mxu0 %v2877_v54  ;;  %v2088_v31 = vsel %vm2087_vm12, %v2084_v47, %v2086_v45 }
 0xccb   : >> { %4310 = vmatprep.subr.bf16.mxu0 %v4829_v60  ;;  %v2091_v37 = vsel %vm2089_vm13, %v2090_v61, %v2088_v31  ;;  %v2893_v61 = vrot.slane %v2888_v48, %v6297_v22 }
 0xccc   : >> { %v2092_v35 = vmax.f32 %v2091_v37, 1e-12 }
 0xccd   : >> { %4307 = vmatmul.mubr.bf16.vlgmr.msra.gmra.mxu0 %v2875_v16 }
 0xcce   : >> { %4312 = vmatprep.mubr.msk.bf16.mxu0 %vm4830_vm9, %v4829_v60  ;;  %v2096_v14 = vrot.slane %v2092_v35, %v6298_v20 }
 0xcd0   : >> { %4618 = vrcp.f32 %v2096_v14 }
 0xcd1   : >> { %v4617_v4 = vpop.eup %4616 }
 0xcd2   : >> { %v2120_v5 = vmul.f32 %v6295_v21, %v4617_v4 }
 0xcd4   : >> { %v2956_v54 = vrot.slane %v2120_v5, 4  ;;  %v2966_v16 = vrot.slane %v2120_v5, 7  ;;  %v2953_v8 = vrot.slane %v2120_v5, 6  ;;  %v2963_v56 = vrot.slane %v2120_v5, 3 }
 0xcd5   : >> { %v2943_v10 = vrot.slane %v2120_v5, 5 }
 0xcdd   : >> { %v4619_v2 = vpop.eup %4618 }
 0xcde   : >> { %v5950_v1 = vmul.f32 %v6296_v11, %v4619_v2 }
 0xce0   : >> { %v2958_v53 = vmul.f32 %v2956_v54, %v5950_v1  ;;  %v2968_v58 = vmul.f32 %v2966_v16, %v5950_v1  ;;  %v2955_v9 = vmul.f32 %v2953_v8, %v5950_v1  ;;  %v2965_v17 = vmul.f32 %v2963_v56, %v5950_v1 }
 0xce1   : >> { %v2945_v11 = vmul.f32 %v2943_v10, %v5950_v1  ;;  %v6299_v10 = vld [vmem:[#allocation53_spill] sm:$0xff] }
 0xce2   : >> { %v2960_v51 = vrot.slane %v2958_v53, 1  ;;  %v2970_v15 = vrot.slane %v2968_v58, 6 }
 0xce3   : >> { %v2947_v55 = vrot.slane %v2945_v11, 1  ;;  %v2950_v31 = vrot.slane %v2945_v11, 2 }
 0xce4   : >> { %v2962_v21 = vsub.f32 %v2955_v9, %v2960_v51  ;;  %v2972_v47 = vsub.f32 %v2965_v17, %v2970_v15 }
 0xce5   : >> { %v2949_v42 = vadd.f32 %v2947_v55, %v2945_v11 }
 0xce6   : >> { %v2974_v7 = vrot.slane %v2962_v21, 4  ;;  %v2977_v59 = vrot.slane %v2972_v47, 4  ;;  %v2979_v40 = vrot.slane %v2962_v21, 1 }
 0xce7   : >> { %v2952_v14 = vadd.f32 %v2950_v31, %v2949_v42 }
 0xce8   : >> { %v2981_v45 = vsel %vm556_vm1, %v2974_v7, %v2977_v59 }
 0xce9   : >> { %v5960_v25 = vsel %vm557_vm2, %v2981_v45, %v2979_v40  ;;  %v3007_v16 = vmul.f32 %v2952_v14, %v2952_v14 }
 0xcea   : >> { %v2983_v35 = vmul.f32 %v5960_v25, %v5960_v25 }
 0xceb   : >> { %v3008_v58 = vsub.f32 1.0, %v3007_v16 }
 0xcec   : >> { %v2985_v54 = vrot.slane %v2983_v35, 1  ;;  %v2988_v56 = vrot.slane %v2983_v35, 2 }
 0xced   : >> { %v3009_v51 = vmax.f32 %v3008_v58, 1e-05  ;;  %v3153_v58 = vld [vmem:[%s6291_s3] sm:$0xff] }
 0xcee   : >> { %v2987_v53 = vadd.f32 %v2985_v54, %v2983_v35 }
 0xcef   : >> { %vm3012_vm15 = vcmp.eq.f32.partialorder %v3009_v51, inf  ;;  %v3015_v48 = vand.u32 2147483648, %v3009_v51  ;;  %vm3014_vm4 = vcmp.eq.f32.partialorder %v3009_v51, 0.0 }
 0xcf0   : >> { %v2990_v9 = vadd.f32 %v2988_v56, %v2987_v53  ;;  %v3156_v53 = vld [vmem:[%s6291_s3 + $0x18] sm:$0xff] }
 0xcf1   : >> { %3176 = vperm.xlu1 %4573, %v3156_v53  }
 0xcf2   : >> { %vm2993_vm14 = vcmp.eq.f32.partialorder %v2990_v9, inf  ;;  %v2996_v40 = vand.u32 2147483648, %v2990_v9  ;;  %vm2995_vm0 = vcmp.eq.f32.partialorder %v2990_v9, 0.0 }
 0xcf5   : >> { %3161 = vperm.xlu1 %4573, %v3153_v58  }
 0xd8d   : >> { %v2928_v37 = vpop.f32.mrf.mxu0 }
 0xd8e   : >> { %v2929_v32 = vadd.f32 %v2928_v37, %v2893_v61 }
 0xd8f   : >> { %v4308_v4 = vpop.f32.mrf.mxu0 }
 0xd90   : >> { %v3777_v5 = vmul.f32 -1.442695, %v2929_v32 }
 0xd91   : >> { %v2931_v2 = vpop.f32.mrf.mxu0 }
 0xd92   : >> { %4620 = vpow2.f32 %v3777_v5 }
 0xd93   : >> { %v4309_v8 = vpop.f32.mrf.mxu0  ;;  %4622 = vrsqrt.f32 %v2990_v9 }
 0xd94   : >> { %4624 = vrsqrt.f32 %v3009_v51 }
 0xd9f   : >> { %v4621_v17 = vpop.eup %4620 }
 0xda0   : >> { %v2937_v15 = vadd.f32 1.0, %v4621_v17  ;;  %v4623_v21 = vpop.eup %4622  ;;  %v3276_v17 = vld [vmem:[%s6138_s5 + $0x10] sm:$0xff] }
 0xda1   : >> { %v4625_v47 = vpop.eup %4624  ;;  %v2992_v11 = vmul.f32 %v4623_v21, %v2990_v9  ;;  %3293 = vperm.xlu1 %4573, %v3276_v17  }
 0xda2   : >> { %4626 = vrcp.f32 %v2937_v15  ;;  %v3011_v7 = vmul.f32 %v4625_v47, %v3009_v51  ;;  %v3278_v47 = vld [vmem:[%s6138_s5 + $0x20] sm:$0x1] }
 0xda3   : >> { %4628 = vrcp.f32 %v6299_v10  ;;  %v2994_v61 = vsel %vm2993_vm14, %v2990_v9, %v2992_v11 }
 0xda4   : >> { %v3013_v42 = vsel %vm3012_vm15, %v3009_v51, %v3011_v7  ;;  %v2997_v37 = vsel %vm2995_vm0, %v2996_v40, %v2994_v61  ;;  %v3058_v61 = vrot.slane %v5950_v1, 2 }
 0xda5   : >> { %v3016_v35 = vsel %vm3014_vm4, %v3015_v48, %v3013_v42  ;;  %v2998_v14 = vmax.f32 %v2997_v37, 1e-12  ;;  %3303 = vperm.xlu1 %4573, %v3278_v47   ;;  %v3068_v42 = vrot.slane %v5950_v1, 5 }
 0xda7   : >> { %v3002_v54 = vrot.slane %v2998_v14, %v6297_v22 }
 0xda9   : >> { %4630 = vrcp.f32 %v3002_v54 }
 0xdaf   : >> { %v4627_v59 = vpop.eup %4626 }
 0xdb0   : >> { %v2940_v55 = vmul.f32 5.0, %v4627_v59  ;;  %v4629_v45 = vpop.eup %4628 }
 0xdb2   : >> { %v5965_v4 = vadd.f32 1.0, %v2940_v55   ;;  %v3275_v55 = vld [vmem:[%s6138_s5 + $0x8] sm:$0xff] }
 0xdb3   : >> { %3288 = vperm.xlu1 %4573, %v3275_v55  }
 0xdb4   : >> { %v3006_v31 = vmul.f32 %v4629_v45, %v5965_v4 }
 0xdb6   : >> { %v3018_v32 = vrot.slane %v3006_v31, 5  ;;  %v4631_v7 = vpop.eup %4630  ;;  %v3157_v31 = vld [vmem:[%s6291_s3 + $0x20] sm:$0x7] }
 0xdb7   : >> { %v3004_v45 = vmul.f32 %v4631_v7, %v5960_v25  ;;  %3181 = vperm.xlu1 %4573, %v3157_v31  }
 0xdb8   : >> { %v3020_v5 = vmul.f32 %v3018_v32, %v3016_v35  ;;  %v3094_v35 = vrot.slane %v5950_v1, 3  ;;  %v3055_v32 = vrot.slane %v5950_v1, 4 }
 0xdb9   : >> { %v3070_v25 = vmul.f32 %v3068_v42, %v3004_v45 }
 0xdba   : >> { %v3021_v2 = vadd.f32 1.0, %v3020_v5  ;;  %v3060_v5 = vmul.f32 %v3058_v61, %v3004_v45 }
 0xdbb   : >> { %v3072_v58 = vrot.slane %v3070_v25, 6 }
 0xdbc   : >> { %v3022_v16 = vand.u32 2147483647, %v3021_v2  ;;  %v3031_v21 = vand.u32 2147483648, %v3021_v2  ;;  %v3065_v2 = vrot.slane %v5950_v1, 1  ;;  %v3062_v53 = vrot.slane %v3060_v5, 1 }
 0xdbe   : >> { %v3024_v8 = vmul.f32 0.5, %v3022_v16 }
 0xdc0   : >> { %v3025_v56 = vfloor.f32 %v3024_v8  ;;  %v3057_v8 = vmul.f32 %v3055_v32, %v3004_v45 }
 0xdc2   : >> { %v3026_v9 = vmul.f32 2.0, %v3025_v56  ;;  %v3067_v56 = vmul.f32 %v3065_v2, %v3004_v45 }
 0xdc4   : >> { %v3027_v51 = vsub.f32 %v3022_v16, %v3026_v9  ;;  %v3096_v16 = vmul.f32 %v3094_v35, %v3004_v45  ;;  %v3074_v17 = vsub.f32 %v3067_v56, %v3072_v58 }
 0xdc6   : >> { %vm3028_vm5 = vcmp.eq.f32.partialorder %v3027_v51, 2.0  ;;  %v3098_v9 = vrot.slane %v3096_v16, 1  ;;  %v3079_v47 = vrot.slane %v3074_v17, 1 }
 0xdc7   : >> { %v3029_v15 = vsel %vm3028_vm5, 0.0, %v3027_v51  ;;  %v3064_v51 = vsub.f32 %v3057_v8, %v3062_v53 }
 0xdc8   : >> { %v3030_v10 = vand.u32 2147483647, %v3029_v15  ;;  %v3100_v15 = vadd.f32 %v3098_v9, %v3096_v16 }
 0xdc9   : >> { %v3081_v7 = vrot.slane %v3064_v51, 6 }
 0xdca   : >> { %v3032_v11 = vor.u32 %v3031_v21, %v3030_v10  ;;  %v3101_v10 = vrot.slane %v3096_v16, 2  ;;  %v3076_v21 = vrot.slane %v3064_v51, 1 }
 0xdcc   : >> { %vm3033_vm10 = vcmp.ne.f32.partialorder %v3032_v11, 0.0  ;;  %vm3034_vm11 = vcmp.lt.f32.partialorder %v3032_v11, 0.0  ;;  %v3036_v59 = vadd.f32 2.0, %v3032_v11 }
 0xdcd   : >> { %vm3035_vm12 = vmand %vm3034_vm11, %vm3033_vm10 }
 0xdce   : >> { %v3037_v40 = vsel %vm3035_vm12, %v3036_v59, %v3032_v11  ;;  %v3103_v11 = vadd.f32 %v3101_v10, %v3100_v15  ;;  %v3083_v59 = vsel %vm556_vm1, %v3076_v21, %v3079_v47 }
 0xdcf   : >> { %v3778_v48 = vadd.f32 -1.0, %v3037_v40 }
 0xdd0   : >> { %v3107_v42 = vrot.slane %v3103_v11, %v6297_v22 }
 0xdd1   : >> { %v3039_v37 = vmul.f32 %v3778_v48, %v3778_v48  ;;  %v3088_v61 = vrot.slane %v3778_v48, %v6298_v20 }
 0xdd2   : >> { %v3108_v2 = vmul.f32 %v3107_v42, %v3004_v45 }
 0xdd3   : >> { %v3040_v14 = vsub.f32 1.0, %v3039_v37  ;;  %v3084_v37 = vsel %vm557_vm2, %v3083_v59, %v3081_v7 }
 0xdd4   : >> { %v3089_v5 = vmul.f32 %v3088_v61, %v3084_v37 }
 0xdd5   : >> { %v3041_v54 = vmax.f32 %v3040_v14, 1e-05 }
 0xdd6   : >> { %v3091_v53 = vrot.slane %v3089_v5, 5  ;;  %v4607_v5 = vld [vmem:[%s6302_s2 + $0x8] sm:$0xff]  }
 0xdd7   : >> { %4632 = vrsqrt.f32 %v3041_v54  ;;  %vm3044_vm13 = vcmp.eq.f32.partialorder %v3041_v54, inf  ;;  %v3047_v31 = vand.u32 2147483648, %v3041_v54  ;;  %vm3046_vm14 = vcmp.eq.f32.partialorder %v3041_v54, 0.0 }
 0xde4   : >> { %v4633_v55 = vpop.eup %4632 }
 0xde5   : >> { %v3043_v40 = vmul.f32 %v4633_v55, %v3041_v54 }
 0xde7   : >> { %v3045_v35 = vsel %vm3044_vm13, %v3041_v54, %v3043_v40  ;;  %v3142_v40 = vstv %s3141_s23  ;;  %s6307_s23 = smov (%p2062_p9), %s6306_s17 }
 0xde8   : >> { %v3048_v32 = vsel %vm3046_vm14, %v3047_v31, %v3045_v35  ;;  %v6300_v31 = vld [vmem:[#allocation55_spill] sm:$0xff]  ;;  %v6301_v35 = vld [vmem:[#allocation10_spill] sm:$0xff]  ;;  %s3495_s24 = sshll.u32 (%p2062_p9), %s6307_s23, 4  ;;  %s3496_s24 = int_to_ptr.vmem [resolvable:$true] %s3495_s24 }
 0xde9   : >> { %v3052_v14 = vrot.slane %v3048_v32, %v6298_v20  ;;  %v3109_v25 = vsub.f32 1.0, %v3048_v32  ;;  %s4659_s26 = scalar_lea.vmem (%p2062_p9), %s3496_s24, 64 }
 0xdea   : > { %p4660_p10 = scmp.ne.s32.totalorder (%p2062_p9), %s3496_s24, %s4659_s26 }
 0xdeb   : >> { %v3053_v16 = vmul.f32 %v3052_v14, %v5950_v1  ;;  %v3113_v8 = vrot.slane %v3109_v25, %v6298_v20  ;;  %v4606_v14 = vld [vmem:[%s6302_s2] sm:$0xff]   ;;  %v3177_v25 = vpop.permute.xlu1 %3176 }
 0xdec   : > { %p4661_p12 = pnand (%p2062_p9), %p4660_p10, %p4944_p5 }
 0xded   : >> { %v3114_v48 = vmul.f32 %v3113_v8, %v3108_v2  ;;  %v3093_v56 = vadd.f32 %v3091_v53, %v3053_v16  ;;  %v4608_v2 = vld [vmem:[%s6302_s2 + $0x10] ss:$0 sps:$4 sm:$0x33]   ;;  %s4663_s2 = sshll.u32 (%p2062_p9), %s4832_s0, 4  ;;  %s4664_s2 = int_to_ptr.vmem [resolvable:$false] %s4663_s2 }
 0xdee   : > { %p4662_p13 = pneg (%p2062_p9), %p4661_p12  ;;  %s4665_s3 = scalar_lea.vmem (%p2062_p9), %s4664_s2, 128 }
 0xdef   : >> { %v3116_v58 = vrot.slane %v3114_v48, 5  ;;  %v3162_v16 = vpop.permute.xlu1 %3161  ;;  %p4666_p0 = scmp.lt.s32.totalorder (%p2062_p9), %s3496_s24, %s4664_s2  ;;  %p4667_p1 = scmp.lt.s32.totalorder (%p2062_p9), %s4665_s3, %s4659_s26 }
 0xdf1   : >> { %v3118_v9 = vadd.f32 %v3116_v58, %v3093_v56  ;;  %p4668_p2 = por (%p2062_p9), %p4667_p1, %p4666_p0 }
 0xdf3   : >> { %v3119_v51 = vmul.f32 %v3118_v9, %v3118_v9  ;;  %p4669_p3 = pnand (%p2062_p9), %p4668_p2, %p4662_p13 }
 0xdf5   : >> { %v3121_v17 = vrot.slane %v3119_v51, 1  ;;  %v3124_v54 = vrot.slane %v3119_v51, 2 }
 0xdf7   : >> { %v3123_v15 = vadd.f32 %v3121_v17, %v3119_v51  ;;  %v3172_v51 = vpop.permute.xlu0 %3171 }
 0xdf9   : >> { %v3126_v10 = vadd.f32 %v3124_v54, %v3123_v15 }
 0xdfb   : >> { %4634 = vrsqrt.f32 %v3126_v10  ;;  %vm3129_vm15 = vcmp.eq.f32.partialorder %v3126_v10, inf  ;;  %v3132_v45 = vand.u32 2147483648, %v3126_v10  ;;  %vm3131_vm0 = vcmp.eq.f32.partialorder %v3126_v10, 0.0 }
 0xe08   : >> { %v4635_v21 = vpop.eup %4634 }
 0xe09   : >> { %v3128_v47 = vmul.f32 %v4635_v21, %v3126_v10 }
 0xe0b   : >> { %v3130_v11 = vsel %vm3129_vm15, %v3126_v10, %v3128_v47  ;;  %v3167_v47 = vpop.permute.xlu0 %3166 }
 0xe0c   : >> { %v3133_v1 = vsel %vm3131_vm0, %v3132_v45, %v3130_v11 }
 0xe0d   : >> { %v3134_v7 = vmax.f32 %v3133_v1, 1e-12 }
 0xe0f   : >> { %v3138_v59 = vrot.slane %v3134_v7, %v6298_v20 }
 0xe11   : >> { %4636 = vrcp.f32 %v3138_v59 }
 0xe1c   : >> { %v3294_v8 = vpop.permute.xlu1 %3293 }
 0xe1e   : >> { %v4637_v55 = vpop.eup %4636 }
 0xe1f   : >> { %v6002_v56 = vmul.f32 %v4637_v55, %v3118_v9  }
 0xe20   : >> { %v3304_v58 = vpop.permute.xlu1 %3303 }
 0xe21   : >> { %v3143_v61 = vmul.f32 %v3142_v40, %v6002_v56 }
 0xe23   : >> { %v3145_v42 = vrot.slane %v3143_v61, 3 }
 0xe25   : >> { %v6006_v45 = vadd.f32 %v6300_v31, %v3145_v42  }
 0xe27   : >> { %v3158_v37 = vpack.c.bf16 %v6006_v45, %v6006_v45 }
 0xe29   : >> { %v3207_v32 = vand.u32 %v3158_v37, %v6301_v35 }
 0xe2b   : >> { %4311 = vmatpush3.bf16.msra.mxu0 %v3207_v32 }
 0xe2c   : >> { %4340 = vmatprep.subr.bf16.mxu0 %v4829_v60 }
 0xe2e   : >> { %4313 = vmatmul.mubr.msk.bf16.vlgmr.msra.gmra.mxu0 %vm546_vm3, %v4606_v14  ;;  %v3289_v54 = vpop.permute.xlu1 %3288 }
 0xe2f   : >> { %4316 = vmatprep.mubr.msk.bf16.mxu0 %vm4830_vm9, %v4829_v60 }
 0xe32   : >> { %v3182_v42 = vpop.permute.xlu1 %3181 }
 0xe36   : >> { %4317 = vmatmul.mubr.msk.bf16.gmra.mxu0 %vm546_vm3, %v4607_v5 }
 0xe37   : >> { %4320 = vmatprep.mubr.msk.bf16.mxu0 %vm4830_vm9, %v4829_v60 }
 0xe3e   : >> { %4321 = vmatmul.mubr.msk.bf16.gmra.mxu0 %vm546_vm3, %v4608_v2 }
 0xe3f   : >> { %4344 = vmatprep.mubr.msk.bf16.mxu0 %vm4830_vm9, %v4829_v60 }
 0xeee   : >> { %v3243_v53 = vpop.f32.mrf.mxu0 }
 0xeef   : >> { %v3244_v55 = vadd.f32 %v3243_v53, %v3162_v16  ;;  %v4610_v53 = vld [vmem:[%s6137_s4 + $0x8] sm:$0xff]  }
 0xef0   : >> { %v4314_v48 = vpop.f32.mrf.mxu0 }
 0xef1   : >> { %v3265_v14 = vmax.f32 %v3244_v55, 0.0  ;;  %v4611_v48 = vld [vmem:[%s6137_s4 + $0x10] ss:$0 sps:$4 sm:$0x11]  }
 0xef2   : >> { %v3246_v9 = vpop.f32.mrf.mxu0 }
 0xef3   : >> { %v3247_v1 = vadd.f32 %v3246_v9, %v3167_v47  ;;  %v3299_v9 = vpop.permute.xlu0 %3298 }
 0xef4   : >> { %v4315_v17 = vpop.f32.mrf.mxu0 }
 0xef5   : >> { %v3266_v37 = vmax.f32 %v3247_v1, 0.0 }
 0xef6   : >> { %v3251_v15 = vpop.f32.mrf.mxu0 }
 0xef7   : >> { %v3252_v21 = vadd.f32 %v3251_v15, %v3172_v51  ;;  %v3279_v2 = vpack.c.bf16 %v3266_v37, %v3265_v14  ;;  %v3284_v51 = vpop.permute.xlu0 %3283 }
 0xef8   : >> { %v4318_v10 = vpop.f32.mrf.mxu0 }
 0xef9   : >> { %v3267_v40 = vmax.f32 %v3252_v21, 0.0 }
 0xefa   : >> { %v3254_v11 = vpop.f32.mrf.mxu0 }
 0xefb   : >> { %v3255_v7 = vadd.f32 %v3254_v11, %v3177_v25  ;;  %v4609_v25 = vld [vmem:[%s6137_s4] sm:$0xff]  }
 0xefc   : >> { %v4319_v59 = vpop.f32.mrf.mxu0 }
 0xefd   : >> { %v3268_v61 = vmax.f32 %v3255_v7, 0.0 }
 0xefe   : >> { %v3259_v31 = vpop.f32.mrf.mxu0 }
 0xeff   : >> { %v3280_v35 = vpack.c.bf16 %v3268_v61, %v3267_v40  ;;  %v6030_v10 = vadd.f32 %v3259_v31, %v3182_v42  }
 0xf00   : >> { %v4322_v32 = vpop.f32.mrf.mxu0 }
 0xf01   : >> { %4325 = vmatpush3.bf16.msra.mxu1 %v3280_v35 }
 0xf02   : >> { %4326 = vmatprep.subr.bf16.mxu1 %v4829_v60  ;;  %v3262_v5 = vpop.f32.mrf.mxu0 }
 0xf04   : >> { %v4323_v16 = vpop.f32.mrf.mxu0 }
 0xf05   : >> { %4327 = vmatpush3.bf16.msra.mxu1 %v3279_v2 }
 0xf08   : >> { %4329 = vmatmul.mubr.msk.bf16.vlgmr.msra.gmra.mxu1 %vm672_vm6, %v4609_v25 }
 0xf09   : >> { %4332 = vmatprep.mubr.msk.bf16.mxu1 %vm4830_vm9, %v4829_v60 }
 0xf10   : >> { %4333 = vmatmul.mubr.msk.bf16.gmra.mxu1 %vm672_vm6, %v4610_v53 }
 0xf11   : >> { %4336 = vmatprep.mubr.msk.bf16.mxu1 %vm4830_vm9, %v4829_v60 }
 0xf18   : >> { %4337 = vmatmul.mubr.msk.bf16.gmra.mxu1 %vm672_vm6, %v4611_v48 }
 0xfc8   : >> { %v3362_v17 = vpop.f32.mrf.mxu1 }
 0xfc9   : >> { %v6049_v1 = vadd.f32 %v3362_v17, %v3284_v51  }
 0xfca   : >> { %v4330_v15 = vpop.f32.mrf.mxu1 }
 0xfcb   : >> { %v3384_v21 = vmax.f32 %v6049_v1, 0.0 }
 0xfcc   : >> { %v3365_v47 = vpop.f32.mrf.mxu1 }
 0xfcd   : >> { %v3466_v11 = vsub.f32 0.0, %v3384_v21  ;;  %v3366_v16 = vadd.f32 %v3365_v47, %v3289_v54  }
 0xfce   : >> { %v4331_v7 = vpop.f32.mrf.mxu1 }
 0xfcf   : >> { %v3467_v59 = vmul.f32 0.12857144, %v3466_v11  ;;  %v3387_v37 = vpack.c.bf16 %v3366_v16, %v6049_v1 }
 0xfd0   : >> { %v3370_v55 = vpop.f32.mrf.mxu1 }
 0xfd1   : >> { %v3468_v40 = vmul.f32 1.442695, %v3467_v59  ;;  %v3371_v35 = vadd.f32 %v3370_v55, %v3294_v8   ;;  %v3398_v53 = vshll.u32 %v3387_v37, 16  ;;  %v3396_v55 = vshrl.u32 %v3387_v37, 16 }
 0xfd2   : >> { %v4334_v61 = vpop.f32.mrf.mxu1 }
 0xfd3   : >> { %4638 = vpow2.f32 %v3468_v40  ;;  %v3400_v7 = vrot.slane %v3398_v53, 1 }
 0xfd4   : >> { %v3373_v42 = vpop.f32.mrf.mxu1 }
 0xfd5   : >> { %v3374_v2 = vadd.f32 %v3373_v42, %v3299_v9   ;;  %v6303_v42 = vld [vmem:[#allocation51_spill] sm:$0xff] }
 0xfd6   : >> { %v4335_v31 = vpop.f32.mrf.mxu1 }
 0xfd7   : >> { %v3388_v32 = vpack.c.bf16 %v3374_v2, %v3371_v35 }
 0xfd8   : >> { %v3378_v14 = vpop.f32.mrf.mxu1 }
 0xfd9   : >> { %v3403_v5 = vshll.u32 %v3388_v32, 16  ;;  %v3379_v59 = vadd.f32 %v3378_v14, %v3304_v58   ;;  %v3407_v15 = vshrl.u32 %v3388_v32, 16  ;;  %v3401_v58 = vor.u32 %v3400_v7, %v3396_v55  ;;  %v3385_v32 = vld [vmem:[%s6144_s11] sm:$0x3]  ;;  %v3393_v14 = vpop.permute.xlu0 %3392 }
 0xfda   : >> { %v4338_v25 = vpop.f32.mrf.mxu1 }
 0xfdb   : >> { %v3405_v48 = vrot.slane %v3403_v5, 1  ;;  %v3389_v51 = vpack.c.bf16 %v3379_v59, %v3379_v59 }
 0xfdc   : >> { %v3381_v17 = vpop.f32.mrf.mxu1 }
 0xfdd   : >> { %v3411_v21 = vshll.u32 %v3389_v51, 16  ;;  %v3409_v47 = vor.u32 %v3407_v15, %v3405_v48  ;;  %v3406_v31 = vsel %vm1976_vm8, %v3401_v58, %v3405_v48 }
 0xfde   : >> { %v4339_v11 = vpop.f32.mrf.mxu1 }
 0xfdf   : >> { %v3413_v54 = vrot.slane %v3411_v21, 1 }
 0xfe0   : >> { %v4639_v8 = vpop.eup %4638 }
 0xfe1   : >> { %v3470_v9 = vsub.f32 1.0, %v4639_v8  ;;  %v3414_v40 = vsel %vm1976_vm8, %v3409_v47, %v3413_v54  ;;  %v6304_v47 = vld [vmem:[#allocation50_spill] sm:$0xff] }
 0xfe2   : >> { %4341 = vmatpush3.bf16.msra.mxu0 %v3414_v40 }
 0xfe3   : >> { %v3478_v61 = vsub.f32 1.0, %v3470_v9  ;;  %4342 = vmatprep.subr.bf16.mxu0 %v4829_v60  ;;  %v3471_v48 = vmul.f32 %v6303_v42, %v3470_v9 }
 0xfe5   : >> { %v3479_v25 = vmul.f32 %v6303_v42, %v3478_v61   ;;  %v3475_v11 = vrot.slane %v3471_v48, %v6297_v22 }
 0xfe6   : >> { %4343 = vmatpush3.bf16.msra.mxu0 %v3406_v31 }
 0xfe9   : >> { %4345 = vmatmul.mubr.msk.bf16.vlgmr.msra.gmra.mxu0 %vm672_vm6, %v3385_v32 }
0x10a9   : >> { %v3454_v37 = vpop.f32.mrf.mxu0 }
0x10aa   : >> { %v3455_v5 = vadd.f32 %v3454_v37, %v3393_v14 }
0x10ab   : >> { %v4346_v53 = vpop.f32.mrf.mxu0 }
0x10ac   : >> { %v3792_v51 = vmul.f32 -1.442695, %v3455_v5 }
0x10ad   : >> { %v3457_v17 = vpop.f32.mrf.mxu0 }
0x10ae   : >> { %4640 = vpow2.f32 %v3792_v51 }
0x10af   : >> { %v4347_v60 = vpop.f32.mrf.mxu0 }
0x10bb   : >> { %v4641_v15 = vpop.eup %4640 }
0x10bc   : >> { %v3463_v21 = vadd.f32 1.0, %v4641_v15 }
0x10be   : >> { %4642 = vrcp.f32 %v3463_v21 }
0x10cb   : >> { %v4643_v7 = vpop.eup %4642 }
0x10cc   : >> { %v3476_v54 = vmul.f32 %v4643_v7, %v3475_v11  ;;  %2064 = sbr.rel (!%p2062_p9) target bundleno = 2226 (0x8b2), region = 121 }
0x10ce   : >> { %v3477_v8 = vadd.f32 %v6304_v47, %v3476_v54  }
0x10d0   : >> { %v6305_v21 = vmov %v3477_v8  ;;  %3480 = vst [vmem:[%s6306_s17] sm:$0x7] (%p2062_p9), %v3477_v8 }
0x10d1   : > { %4672 = shalt.err (!%p4669_p3)
}
0x10d2   : > { %s4673_s10 = scalar_lea.hbm %s3493_s18, 64  ;;  %s4677_s1 = scalar_lea.hbm %s6146_s13, 128 }
0x10d3   : > { %p4674_p4 = scmp.ne.s32.totalorder %s3493_s18, %s4673_s10  ;;  %p4678_p11 = scmp.lt.s32.totalorder %s3493_s18, %s6146_s13 }
0x10d4   : > { %p4679_p9 = scmp.lt.s32.totalorder %s4677_s1, %s4673_s10 }
0x10d5   : > { %p4675_p7 = pnand %p4674_p4, %p4944_p5 }
0x10d6   : > { %p4680_p10 = por %p4679_p9, %p4678_p11 }
0x10d7   : > { %p4676_p8 = pneg %p4675_p7 }
0x10d9   : > { %p4681_p12 = pnand %p4680_p10, %p4676_p8 }
0x10db   : > { %4684 = shalt.err (!%p4681_p12)
}
0x10dc   : > { %4352 = dma.vmem_to_hbm [thread:$0]  (%p4944_p5), %s3496_s24, 64, %s3493_s18, %s3482_s21  }
0x10dd PF: > { %p4364_p13 = scmp.ge.s32.totalorder %s4771_s30, 2  ;;  %s3507_s2 = sand.u32 1, %s4759_s27  }
0x10de   : > { %s3508_s3 = scalar_lea.sflag [#allocation4], %s3507_s2 }
0x10df   : > { %p4359_p0 = pnand %p4364_p13, %p4948_p6 }
0x10e1   : > { %p4360_p1 = pneg %p4359_p0 }
0x10e3   : > { %4754 = dma.done.wait (%p4360_p1), %s3508_s3, 64  }
0x10e4   : > { %4756 = vsyncadd (%p4360_p1), %s3508_s3, 4294967232  ;;  %s6309_s23 = sld [smem:[#allocation9_spill]]  ;;  %p26_p2 = scmp.ge.s32.totalorder %s4931_s15, 4  }
0x10e5   : > { %s6310_s27 = smov %s4763_s28  ;;  %s6311_s28 = smov %s4767_s29 }
0x10e6   : > { %s6313_s30 = smov %s4931_s15  ;;  %28 = sbr.rel (!%p26_p2) target bundleno = 9 (0x9), region = 132 }
0x10ea   : > { %s6312_s29 = smov %s6309_s23 }
0x10eb   :  { %3513 = vsyncpa [#allocation4], 1 }
0x10ec   :  { %3515 = vsyncpa [#allocation4 + $0x1], 1 }
0x10ed   :  { %3516 = vsyncpa [#allocation5], 1 }
0x10ee   :  { %3518 = vsyncpa [#allocation5 + $0x1], 1 }

</bundles_post_ra>
